<compile_context>
chip_gen: v6e
topology: v6e:2x2x1
jax: 0.10.0
libtpu: 0.0.40
codegen_flags: <defaults>
</compile_context>

<pallas_src>
import functools

import jax
import jax.numpy as jnp
from jax.experimental import pallas as pl
from jax.experimental.pallas import tpu as pltpu


# ----------------------------- Pallas kernel ------------------------------ #
def _sa_block(x, w_ref, layer, params, xmr_ref, *, B, C, N):
    """One SA_Layer forward on activations laid out as (C, B*N) float32.

    w_ref   : (6C, C) bf16 ref, rows = [wqkv1; wt1; wqkv2; wt2]
    params  : (C, 8) f32 value, cols = [bv1, bt1, g1, be1, bv2, bt2, g2, be2]
    xmr_ref : (C, B*N) bf16 scratch holding (x - x_r), feeds trans_conv
    """
    f32 = jnp.float32
    bf16 = jnp.bfloat16

    base = layer * 3 * C
    wqkv = w_ref[base:base + 2 * C, :]              # (2C, C) bf16
    wt = w_ref[base + 2 * C:base + 3 * C, :]        # (C,  C) bf16
    off = 4 * layer
    bv = params[:, off + 0:off + 1]                 # (C, 1) f32
    bt = params[:, off + 1:off + 2]
    gamma = params[:, off + 2:off + 3]
    beta = params[:, off + 3:off + 4]

    # Fused q/k/v 1x1 conv: one [2C, C] x [C, B*N] MXU push (bf16 in, f32 acc),
    # operating on the full 256-lane slab.
    qkv = jnp.dot(wqkv, x.astype(bf16), preferred_element_type=f32)   # (2C, B*N)
    q_bf = qkv[0:C // 2, :].astype(bf16)                              # (C/2, B*N)
    k_bf = qkv[C // 2:C, :].astype(bf16)                              # (C/2, B*N)
    v_bf = (qkv[C:2 * C, :] + bv).astype(bf16)                        # (C,   B*N)

    # Per-batch attention (B is tiny & static -> unrolled; lane slices only).
    # TODO(synk): switch to lax.fori_loop + a query-tiled two-pass softmax
    # (column normalization needs a second pass) before scaling B or N.
    for b in range(B):
        lo, hi = b * N, (b + 1) * N
        qb = q_bf[:, lo:hi]                                           # (C/2, N)
        kb = k_bf[:, lo:hi]                                           # (C/2, N)
        # energy[i, j] = sum_o q[o, i] * k[o, j] : contract dim 0 of both
        # operands directly (no explicit transpose / relayout).
        energy = jax.lax.dot_general(
            qb, kb, dimension_numbers=(((0,), (0,)), ((), ())),
            preferred_element_type=f32)                               # (N, N)

        # softmax over keys (last dim)
        m = jnp.max(energy, axis=-1, keepdims=True)
        e = jnp.exp(energy - m)
        denom = jnp.sum(e, axis=-1, keepdims=True)
        att = e * pl.reciprocal(denom, approx=True)
        # extra column normalization: att / (1e-9 + att.sum over queries)
        col = jnp.sum(att, axis=0, keepdims=True)                     # (1, N)
        att = att * pl.reciprocal(col + 1e-9, approx=True)

        # x_r = v @ att ; stash (x - x_r) for the fused trans_conv below.
        xr_b = jnp.dot(v_bf[:, lo:hi], att.astype(bf16),
                       preferred_element_type=f32)                    # (C, N)
        xmr_ref[:, lo:hi] = (x[:, lo:hi] - xr_b).astype(bf16)

    # trans_conv(x - x_r) + bias: one wide [C, C] x [C, B*N] MXU push.
    y = jnp.dot(wt, xmr_ref[...], preferred_element_type=f32) + bt    # (C, B*N)

    # BatchNorm1d (training-mode stats over batch*points == the lane axis),
    # one pass: var = E[y^2] - mean^2, gamma folded into the rsqrt scale.
    mean = jnp.mean(y, axis=1, keepdims=True)                         # (C, 1)
    msq = jnp.mean(y * y, axis=1, keepdims=True)                      # (C, 1)
    var = msq - mean * mean
    scale = gamma * jax.lax.rsqrt(var + 1e-5)
    y_bn = (y - mean) * scale + beta

    # ReLU + residual
    return x + jnp.maximum(y_bn, 0.0)


def _ptl_kernel(x_ref, w_ref, p_ref, o_ref, xf_ref, xmr_ref, *, B, C, N):
    # Fold (B, C, N) -> (C, B*N) inside VMEM (no wrapper-side HBM transpose).
    # Each (C, N) slab is lane-dense (N = 128).
    for b in range(B):
        xf_ref[:, b * N:(b + 1) * N] = x_ref[b, :, :]
    x = xf_ref[...]                                                   # (C, B*N)
    params = p_ref[...]                                               # (C, 8)

    x1 = _sa_block(x, w_ref, 0, params, xmr_ref, B=B, C=C, N=N)
    x2 = _sa_block(x1, w_ref, 1, params, xmr_ref, B=B, C=C, N=N)

    # Fused torch.cat((x1, x2), dim=1), stored straight back in the native
    # (B, 2C, N) layout: each (C, N) store is an unmasked lane-dense slab.
    for b in range(B):
        lo, hi = b * N, (b + 1) * N
        o_ref[b, 0:C, :] = x1[:, lo:hi].astype(o_ref.dtype)
        o_ref[b, C:2 * C, :] = x2[:, lo:hi].astype(o_ref.dtype)


# ------------------------------ JAX wrapper -------------------------------- #
@jax.jit
def point_transformer_last(x, params_sa1, params_sa2):
    """Point_Transformer_Last forward: x (B, C, N) f32 -> (B, 2C, N) f32."""
    B, C, N = x.shape

    # Pack all weights into one bf16 array and all per-channel vectors into one
    # f32 array -> 3 input DMAs total (x, W, P) instead of 13.
    def wpack(p):
        wqkv, _, wt, _, _, _ = p
        return jnp.concatenate([wqkv, wt], axis=0)                    # (3C, C)

    def ppack(p):
        _, bv, _, bt, gamma, beta = p
        return jnp.concatenate([bv, bt, gamma, beta], axis=1)         # (C, 4)

    W = jnp.concatenate([wpack(params_sa1), wpack(params_sa2)],
                        axis=0).astype(jnp.bfloat16)                  # (6C, C)
    P = jnp.concatenate([ppack(params_sa1), ppack(params_sa2)],
                        axis=1).astype(jnp.float32)                   # (C, 8)

    vmem = lambda: pl.BlockSpec(memory_space=pltpu.MemorySpace.VMEM)
    return pl.pallas_call(
        functools.partial(_ptl_kernel, B=B, C=C, N=N),
        out_shape=jax.ShapeDtypeStruct((B, 2 * C, N), x.dtype),
        in_specs=[vmem(), vmem(), vmem()],
        out_specs=vmem(),
        scratch_shapes=[pltpu.VMEM((C, B * N), jnp.float32),   # folded x
                        pltpu.VMEM((C, B * N), jnp.bfloat16)], # x - x_r
    )(x, W, P)


# ------------------------- deterministic parameters ------------------------ #
def init_sa_params(key, C, dtype=jnp.float32):
    ks = jax.random.split(key, 4)
    s = 1.0 / (C ** 0.5)
    wqkv = jax.random.uniform(ks[0], (2 * C, C), dtype, -s, s)  # [wq; wk; wv] fused
    bv = jax.random.uniform(ks[1], (C, 1), dtype, -s, s)        # v_conv bias
    wt = jax.random.uniform(ks[2], (C, C), dtype, -s, s)        # trans_conv weight
    bt = jax.random.uniform(ks[3], (C, 1), dtype, -s, s)        # trans_conv bias
    gamma = jnp.ones((C, 1), dtype)                             # BN weight
    beta = jnp.zeros((C, 1), dtype)                             # BN bias
    return (wqkv, bv, wt, bt, gamma, beta)


# ------------------------------- reference --------------------------------- #
def sa_layer_ref(x, params):
    """Pure-JAX SA_Layer; mirrors the kernel's bf16 MXU operand precision."""
    wqkv, bv, wt, bt, gamma, beta = params
    B, C, N = x.shape
    bf, f32 = jnp.bfloat16, jnp.float32
    qkv = jnp.einsum('oc,bcn->bon', wqkv.astype(bf), x.astype(bf),
                     preferred_element_type=f32)
    q, k = qkv[:, :C // 2], qkv[:, C // 2:C]
    v = qkv[:, C:] + bv[None]
    energy = jnp.einsum('boi,boj->bij', q.astype(bf), k.astype(bf),
                        preferred_element_type=f32)
    att = jax.nn.softmax(energy, axis=-1)
    att = att / (1e-9 + jnp.sum(att, axis=1, keepdims=True))
    x_r = jnp.einsum('bci,bij->bcj', v.astype(bf), att.astype(bf),
                     preferred_element_type=f32)
    y = jnp.einsum('oc,bcn->bon', wt.astype(bf), (x - x_r).astype(bf),
                   preferred_element_type=f32) + bt[None]
    mean = jnp.mean(y, axis=(0, 2), keepdims=True)
    var = jnp.mean((y - mean) ** 2, axis=(0, 2), keepdims=True)
    y_bn = (y - mean) * jax.lax.rsqrt(var + 1e-5) * gamma[None] + beta[None]
    return x + jnp.maximum(y_bn, 0.0)


def point_transformer_last_ref(x, p1, p2):
    x1 = sa_layer_ref(x, p1)
    x2 = sa_layer_ref(x1, p2)
    return jnp.concatenate([x1, x2], axis=1)


# ---------------------------------- main ----------------------------------- #
if __name__ == "__main__":
    B, C, N = 2, 64, 128  # batch, embedding_dim, num_points

    key = jax.random.PRNGKey(0)
    kx, kp1, kp2 = jax.random.split(key, 3)
    x = jax.random.normal(kx, (B, C, N), jnp.float32)

    params_sa1 = init_sa_params(kp1, C)
    params_sa2 = init_sa_params(kp2, C)

    out = jax.block_until_ready(point_transformer_last(x, params_sa1, params_sa2))
    assert out.shape == (B, 2 * C, N), out.shape

    ref = jax.block_until_ready(point_transformer_last_ref(x, params_sa1, params_sa2))
    err = float(jnp.max(jnp.abs(out - ref)))
    # bf16 MXU operands + approx-reciprocal softmax -> tolerance looser than pure f32.
    assert err < 2e-2, f"max abs err {err}"

    print("KERNEL_OK")
</pallas_src>

<mosaic_0001>
module attributes {stable_mosaic.version = 11 : i64} {
  func.func @_ptl_kernel(%arg0: memref<2x64x128xf32, #tpu.memory_space<vmem>>, %arg1: memref<384x64xbf16, #tpu.memory_space<vmem>>, %arg2: memref<64x8xf32, #tpu.memory_space<vmem>>, %arg3: memref<2x128x128xf32, #tpu.memory_space<vmem>>, %arg4: memref<64x256xf32, #tpu.memory_space<vmem>>, %arg5: memref<64x256xbf16, #tpu.memory_space<vmem>>) attributes {dimension_semantics = [], scalar_prefetch = 0 : i64, scratch_operands = 2 : i64, tpu.core_type = #tpu.core_type<tc>} {
    %c0 = arith.constant 0 : index
    %c0_0 = arith.constant 0 : index
    %c0_1 = arith.constant 0 : index
    %0 = vector.load %arg0[%c0, %c0_0, %c0_1] : memref<2x64x128xf32, #tpu.memory_space<vmem>>, vector<1x64x128xf32>
    %1 = vector.shape_cast %0 : vector<1x64x128xf32> to vector<64x128xf32>
    %c0_2 = arith.constant 0 : index
    %c0_3 = arith.constant 0 : index
    %2 = vector.load %arg4[%c0_2, %c0_3] : memref<64x256xf32, #tpu.memory_space<vmem>>, vector<64x128xf32>
    tpu.vector_store %arg4[%c0_2, %c0_3], %1 {strides = array<i32>} : memref<64x256xf32, #tpu.memory_space<vmem>>, vector<64x128xf32>,
    %c1 = arith.constant 1 : index
    %c0_4 = arith.constant 0 : index
    %c0_5 = arith.constant 0 : index
    %3 = vector.load %arg0[%c1, %c0_4, %c0_5] : memref<2x64x128xf32, #tpu.memory_space<vmem>>, vector<1x64x128xf32>
    %4 = vector.shape_cast %3 : vector<1x64x128xf32> to vector<64x128xf32>
    %c0_6 = arith.constant 0 : index
    %c128 = arith.constant 128 : index
    %5 = vector.load %arg4[%c0_6, %c128] : memref<64x256xf32, #tpu.memory_space<vmem>>, vector<64x128xf32>
    tpu.vector_store %arg4[%c0_6, %c128], %4 {strides = array<i32>} : memref<64x256xf32, #tpu.memory_space<vmem>>, vector<64x128xf32>,
    %c0_7 = arith.constant 0 : index
    %c0_8 = arith.constant 0 : index
    %6 = vector.load %arg4[%c0_7, %c0_8] : memref<64x256xf32, #tpu.memory_space<vmem>>, vector<64x256xf32>
    %c0_9 = arith.constant 0 : index
    %c0_10 = arith.constant 0 : index
    %7 = vector.load %arg2[%c0_9, %c0_10] : memref<64x8xf32, #tpu.memory_space<vmem>>, vector<64x8xf32>
    %c0_11 = arith.constant 0 : index
    %c0_12 = arith.constant 0 : index
    %8 = vector.load %arg1[%c0_11, %c0_12] : memref<384x64xbf16, #tpu.memory_space<vmem>>, vector<128x64xbf16>
    %c128_13 = arith.constant 128 : index
    %c0_14 = arith.constant 0 : index
    %9 = vector.load %arg1[%c128_13, %c0_14] : memref<384x64xbf16, #tpu.memory_space<vmem>>, vector<64x64xbf16>
    %10 = vector.extract_strided_slice %7 {offsets = [0, 0], sizes = [64, 1], strides = [1, 1]} : vector<64x8xf32> to vector<64x1xf32>
    %11 = vector.extract_strided_slice %7 {offsets = [0, 1], sizes = [64, 1], strides = [1, 1]} : vector<64x8xf32> to vector<64x1xf32>
    %12 = vector.extract_strided_slice %7 {offsets = [0, 2], sizes = [64, 1], strides = [1, 1]} : vector<64x8xf32> to vector<64x1xf32>
    %13 = vector.extract_strided_slice %7 {offsets = [0, 3], sizes = [64, 1], strides = [1, 1]} : vector<64x8xf32> to vector<64x1xf32>
    %14 = arith.truncf %6 : vector<64x256xf32> to vector<64x256xbf16>
    %cst = arith.constant dense<0.000000e+00> : vector<128x256xf32>
    %15 = tpu.matmul %8, %14, %cst {dimension_numbers = #tpu.dot_dimension_numbers<[1], [0], [0], [1], [0, 0, 1, 1], [], []>} : vector<128x64xbf16>, vector<64x256xbf16>, vector<128x256xf32> -> vector<128x256xf32>
    %16 = vector.extract_strided_slice %15 {offsets = [0, 0], sizes = [32, 256], strides = [1, 1]} : vector<128x256xf32> to vector<32x256xf32>
    %17 = arith.truncf %16 : vector<32x256xf32> to vector<32x256xbf16>
    %18 = vector.extract_strided_slice %15 {offsets = [32, 0], sizes = [32, 256], strides = [1, 1]} : vector<128x256xf32> to vector<32x256xf32>
    %19 = arith.truncf %18 : vector<32x256xf32> to vector<32x256xbf16>
    %20 = vector.extract_strided_slice %15 {offsets = [64, 0], sizes = [64, 256], strides = [1, 1]} : vector<128x256xf32> to vector<64x256xf32>
    %21 = vector.broadcast %10 : vector<64x1xf32> to vector<64x256xf32>
    %22 = arith.addf %20, %21 : vector<64x256xf32>
    %23 = arith.truncf %22 : vector<64x256xf32> to vector<64x256xbf16>
    %24 = vector.extract_strided_slice %17 {offsets = [0, 0], sizes = [32, 128], strides = [1, 1]} : vector<32x256xbf16> to vector<32x128xbf16>
    %25 = vector.extract_strided_slice %19 {offsets = [0, 0], sizes = [32, 128], strides = [1, 1]} : vector<32x256xbf16> to vector<32x128xbf16>
    %cst_15 = arith.constant dense<0.000000e+00> : vector<128x128xf32>
    %26 = tpu.matmul %24, %25, %cst_15 {dimension_numbers = #tpu.dot_dimension_numbers<[0], [0], [1], [1], [0, 1, 1, 1], [], []>} : vector<32x128xbf16>, vector<32x128xbf16>, vector<128x128xf32> -> vector<128x128xf32>
    %cst_16 = arith.constant dense<0xFF800000> : vector<128xf32>
    %27 = vector.multi_reduction <maximumf>, %26, %cst_16 [1] : vector<128x128xf32> to vector<128xf32>
    %28 = vector.shape_cast %27 : vector<128xf32> to vector<128x1xf32>
    %29 = vector.broadcast %28 : vector<128x1xf32> to vector<128x128xf32>
    %30 = arith.subf %26, %29 : vector<128x128xf32>
    %31 = math.exp %30 : vector<128x128xf32>
    %cst_17 = arith.constant dense<0.000000e+00> : vector<128xf32>
    %32 = vector.multi_reduction <add>, %31, %cst_17 [1] : vector<128x128xf32> to vector<128xf32>
    %33 = vector.shape_cast %32 : vector<128xf32> to vector<128x1xf32>
    %34 = tpu.reciprocal %33 {approx = true} : vector<128x1xf32> -> vector<128x1xf32>
    %35 = vector.broadcast %34 : vector<128x1xf32> to vector<128x128xf32>
    %36 = arith.mulf %31, %35 : vector<128x128xf32>
    %cst_18 = arith.constant dense<0.000000e+00> : vector<128xf32>
    %37 = vector.multi_reduction <add>, %36, %cst_18 [0] : vector<128x128xf32> to vector<128xf32>
    %38 = vector.shape_cast %37 : vector<128xf32> to vector<1x128xf32>
    %cst_19 = arith.constant 9.99999971E-10 : f32
    %39 = vector.broadcast %cst_19 : f32 to vector<1x128xf32>
    %40 = arith.addf %38, %39 : vector<1x128xf32>
    %41 = tpu.reciprocal %40 {approx = true} : vector<1x128xf32> -> vector<1x128xf32>
    %42 = vector.broadcast %41 : vector<1x128xf32> to vector<128x128xf32>
    %43 = arith.mulf %36, %42 : vector<128x128xf32>
    %44 = vector.extract_strided_slice %23 {offsets = [0, 0], sizes = [64, 128], strides = [1, 1]} : vector<64x256xbf16> to vector<64x128xbf16>
    %45 = arith.truncf %43 : vector<128x128xf32> to vector<128x128xbf16>
    %cst_20 = arith.constant dense<0.000000e+00> : vector<64x128xf32>
    %46 = tpu.matmul %44, %45, %cst_20 {dimension_numbers = #tpu.dot_dimension_numbers<[1], [0], [0], [1], [0, 0, 1, 1], [], []>} : vector<64x128xbf16>, vector<128x128xbf16>, vector<64x128xf32> -> vector<64x128xf32>
    %47 = vector.extract_strided_slice %6 {offsets = [0, 0], sizes = [64, 128], strides = [1, 1]} : vector<64x256xf32> to vector<64x128xf32>
    %48 = arith.subf %47, %46 : vector<64x128xf32>
    %49 = arith.truncf %48 : vector<64x128xf32> to vector<64x128xbf16>
    %c0_21 = arith.constant 0 : index
    %c0_22 = arith.constant 0 : index
    %50 = vector.load %arg5[%c0_21, %c0_22] : memref<64x256xbf16, #tpu.memory_space<vmem>>, vector<64x128xbf16>
    tpu.vector_store %arg5[%c0_21, %c0_22], %49 {strides = array<i32>} : memref<64x256xbf16, #tpu.memory_space<vmem>>, vector<64x128xbf16>,
    %51 = vector.extract_strided_slice %17 {offsets = [0, 128], sizes = [32, 128], strides = [1, 1]} : vector<32x256xbf16> to vector<32x128xbf16>
    %52 = vector.extract_strided_slice %19 {offsets = [0, 128], sizes = [32, 128], strides = [1, 1]} : vector<32x256xbf16> to vector<32x128xbf16>
    %cst_23 = arith.constant dense<0.000000e+00> : vector<128x128xf32>
    %53 = tpu.matmul %51, %52, %cst_23 {dimension_numbers = #tpu.dot_dimension_numbers<[0], [0], [1], [1], [0, 1, 1, 1], [], []>} : vector<32x128xbf16>, vector<32x128xbf16>, vector<128x128xf32> -> vector<128x128xf32>
    %cst_24 = arith.constant dense<0xFF800000> : vector<128xf32>
    %54 = vector.multi_reduction <maximumf>, %53, %cst_24 [1] : vector<128x128xf32> to vector<128xf32>
    %55 = vector.shape_cast %54 : vector<128xf32> to vector<128x1xf32>
    %56 = vector.broadcast %55 : vector<128x1xf32> to vector<128x128xf32>
    %57 = arith.subf %53, %56 : vector<128x128xf32>
    %58 = math.exp %57 : vector<128x128xf32>
    %cst_25 = arith.constant dense<0.000000e+00> : vector<128xf32>
    %59 = vector.multi_reduction <add>, %58, %cst_25 [1] : vector<128x128xf32> to vector<128xf32>
    %60 = vector.shape_cast %59 : vector<128xf32> to vector<128x1xf32>
    %61 = tpu.reciprocal %60 {approx = true} : vector<128x1xf32> -> vector<128x1xf32>
    %62 = vector.broadcast %61 : vector<128x1xf32> to vector<128x128xf32>
    %63 = arith.mulf %58, %62 : vector<128x128xf32>
    %cst_26 = arith.constant dense<0.000000e+00> : vector<128xf32>
    %64 = vector.multi_reduction <add>, %63, %cst_26 [0] : vector<128x128xf32> to vector<128xf32>
    %65 = vector.shape_cast %64 : vector<128xf32> to vector<1x128xf32>
    %cst_27 = arith.constant 9.99999971E-10 : f32
    %66 = vector.broadcast %cst_27 : f32 to vector<1x128xf32>
    %67 = arith.addf %65, %66 : vector<1x128xf32>
    %68 = tpu.reciprocal %67 {approx = true} : vector<1x128xf32> -> vector<1x128xf32>
    %69 = vector.broadcast %68 : vector<1x128xf32> to vector<128x128xf32>
    %70 = arith.mulf %63, %69 : vector<128x128xf32>
    %71 = vector.extract_strided_slice %23 {offsets = [0, 128], sizes = [64, 128], strides = [1, 1]} : vector<64x256xbf16> to vector<64x128xbf16>
    %72 = arith.truncf %70 : vector<128x128xf32> to vector<128x128xbf16>
    %cst_28 = arith.constant dense<0.000000e+00> : vector<64x128xf32>
    %73 = tpu.matmul %71, %72, %cst_28 {dimension_numbers = #tpu.dot_dimension_numbers<[1], [0], [0], [1], [0, 0, 1, 1], [], []>} : vector<64x128xbf16>, vector<128x128xbf16>, vector<64x128xf32> -> vector<64x128xf32>
    %74 = vector.extract_strided_slice %6 {offsets = [0, 128], sizes = [64, 128], strides = [1, 1]} : vector<64x256xf32> to vector<64x128xf32>
    %75 = arith.subf %74, %73 : vector<64x128xf32>
    %76 = arith.truncf %75 : vector<64x128xf32> to vector<64x128xbf16>
    %c0_29 = arith.constant 0 : index
    %c128_30 = arith.constant 128 : index
    %77 = vector.load %arg5[%c0_29, %c128_30] : memref<64x256xbf16, #tpu.memory_space<vmem>>, vector<64x128xbf16>
    tpu.vector_store %arg5[%c0_29, %c128_30], %76 {strides = array<i32>} : memref<64x256xbf16, #tpu.memory_space<vmem>>, vector<64x128xbf16>,
    %c0_31 = arith.constant 0 : index
    %c0_32 = arith.constant 0 : index
    %78 = vector.load %arg5[%c0_31, %c0_32] : memref<64x256xbf16, #tpu.memory_space<vmem>>, vector<64x256xbf16>
    %cst_33 = arith.constant dense<0.000000e+00> : vector<64x256xf32>
    %79 = tpu.matmul %9, %78, %cst_33 {dimension_numbers = #tpu.dot_dimension_numbers<[1], [0], [0], [1], [0, 0, 1, 1], [], []>} : vector<64x64xbf16>, vector<64x256xbf16>, vector<64x256xf32> -> vector<64x256xf32>
    %80 = vector.broadcast %11 : vector<64x1xf32> to vector<64x256xf32>
    %81 = arith.addf %79, %80 : vector<64x256xf32>
    %cst_34 = arith.constant dense<0.000000e+00> : vector<64xf32>
    %82 = vector.multi_reduction <add>, %81, %cst_34 [1] : vector<64x256xf32> to vector<64xf32>
    %83 = vector.shape_cast %82 : vector<64xf32> to vector<64x1xf32>
    %cst_35 = arith.constant 2.560000e+02 : f32
    %84 = vector.broadcast %cst_35 : f32 to vector<64x1xf32>
    %85 = arith.divf %83, %84 : vector<64x1xf32>
    %86 = arith.mulf %81, %81 : vector<64x256xf32>
    %cst_36 = arith.constant dense<0.000000e+00> : vector<64xf32>
    %87 = vector.multi_reduction <add>, %86, %cst_36 [1] : vector<64x256xf32> to vector<64xf32>
    %88 = vector.shape_cast %87 : vector<64xf32> to vector<64x1xf32>
    %cst_37 = arith.constant 2.560000e+02 : f32
    %89 = vector.broadcast %cst_37 : f32 to vector<64x1xf32>
    %90 = arith.divf %88, %89 : vector<64x1xf32>
    %91 = arith.mulf %85, %85 : vector<64x1xf32>
    %92 = arith.subf %90, %91 : vector<64x1xf32>
    %cst_38 = arith.constant 9.99999974E-6 : f32
    %93 = vector.broadcast %cst_38 : f32 to vector<64x1xf32>
    %94 = arith.addf %92, %93 : vector<64x1xf32>
    %95 = math.rsqrt %94 : vector<64x1xf32>
    %96 = arith.mulf %12, %95 : vector<64x1xf32>
    %97 = vector.broadcast %85 : vector<64x1xf32> to vector<64x256xf32>
    %98 = arith.subf %81, %97 : vector<64x256xf32>
    %99 = vector.broadcast %96 : vector<64x1xf32> to vector<64x256xf32>
    %100 = arith.mulf %98, %99 : vector<64x256xf32>
    %101 = vector.broadcast %13 : vector<64x1xf32> to vector<64x256xf32>
    %102 = arith.addf %100, %101 : vector<64x256xf32>
    %cst_39 = arith.constant 0.000000e+00 : f32
    %103 = vector.broadcast %cst_39 : f32 to vector<64x256xf32>
    %104 = arith.maximumf %102, %103 : vector<64x256xf32>
    %105 = arith.addf %6, %104 : vector<64x256xf32>
    %c192 = arith.constant 192 : index
    %c0_40 = arith.constant 0 : index
    %106 = vector.load %arg1[%c192, %c0_40] : memref<384x64xbf16, #tpu.memory_space<vmem>>, vector<128x64xbf16>
    %c320 = arith.constant 320 : index
    %c0_41 = arith.constant 0 : index
    %107 = vector.load %arg1[%c320, %c0_41] : memref<384x64xbf16, #tpu.memory_space<vmem>>, vector<64x64xbf16>
    %108 = vector.extract_strided_slice %7 {offsets = [0, 4], sizes = [64, 1], strides = [1, 1]} : vector<64x8xf32> to vector<64x1xf32>
    %109 = vector.extract_strided_slice %7 {offsets = [0, 5], sizes = [64, 1], strides = [1, 1]} : vector<64x8xf32> to vector<64x1xf32>
    %110 = vector.extract_strided_slice %7 {offsets = [0, 6], sizes = [64, 1], strides = [1, 1]} : vector<64x8xf32> to vector<64x1xf32>
    %111 = vector.extract_strided_slice %7 {offsets = [0, 7], sizes = [64, 1], strides = [1, 1]} : vector<64x8xf32> to vector<64x1xf32>
    %112 = arith.truncf %105 : vector<64x256xf32> to vector<64x256xbf16>
    %cst_42 = arith.constant dense<0.000000e+00> : vector<128x256xf32>
    %113 = tpu.matmul %106, %112, %cst_42 {dimension_numbers = #tpu.dot_dimension_numbers<[1], [0], [0], [1], [0, 0, 1, 1], [], []>} : vector<128x64xbf16>, vector<64x256xbf16>, vector<128x256xf32> -> vector<128x256xf32>
    %114 = vector.extract_strided_slice %113 {offsets = [0, 0], sizes = [32, 256], strides = [1, 1]} : vector<128x256xf32> to vector<32x256xf32>
    %115 = arith.truncf %114 : vector<32x256xf32> to vector<32x256xbf16>
    %116 = vector.extract_strided_slice %113 {offsets = [32, 0], sizes = [32, 256], strides = [1, 1]} : vector<128x256xf32> to vector<32x256xf32>
    %117 = arith.truncf %116 : vector<32x256xf32> to vector<32x256xbf16>
    %118 = vector.extract_strided_slice %113 {offsets = [64, 0], sizes = [64, 256], strides = [1, 1]} : vector<128x256xf32> to vector<64x256xf32>
    %119 = vector.broadcast %108 : vector<64x1xf32> to vector<64x256xf32>
    %120 = arith.addf %118, %119 : vector<64x256xf32>
    %121 = arith.truncf %120 : vector<64x256xf32> to vector<64x256xbf16>
    %122 = vector.extract_strided_slice %115 {offsets = [0, 0], sizes = [32, 128], strides = [1, 1]} : vector<32x256xbf16> to vector<32x128xbf16>
    %123 = vector.extract_strided_slice %117 {offsets = [0, 0], sizes = [32, 128], strides = [1, 1]} : vector<32x256xbf16> to vector<32x128xbf16>
    %cst_43 = arith.constant dense<0.000000e+00> : vector<128x128xf32>
    %124 = tpu.matmul %122, %123, %cst_43 {dimension_numbers = #tpu.dot_dimension_numbers<[0], [0], [1], [1], [0, 1, 1, 1], [], []>} : vector<32x128xbf16>, vector<32x128xbf16>, vector<128x128xf32> -> vector<128x128xf32>
    %cst_44 = arith.constant dense<0xFF800000> : vector<128xf32>
    %125 = vector.multi_reduction <maximumf>, %124, %cst_44 [1] : vector<128x128xf32> to vector<128xf32>
    %126 = vector.shape_cast %125 : vector<128xf32> to vector<128x1xf32>
    %127 = vector.broadcast %126 : vector<128x1xf32> to vector<128x128xf32>
    %128 = arith.subf %124, %127 : vector<128x128xf32>
    %129 = math.exp %128 : vector<128x128xf32>
    %cst_45 = arith.constant dense<0.000000e+00> : vector<128xf32>
    %130 = vector.multi_reduction <add>, %129, %cst_45 [1] : vector<128x128xf32> to vector<128xf32>
    %131 = vector.shape_cast %130 : vector<128xf32> to vector<128x1xf32>
    %132 = tpu.reciprocal %131 {approx = true} : vector<128x1xf32> -> vector<128x1xf32>
    %133 = vector.broadcast %132 : vector<128x1xf32> to vector<128x128xf32>
    %134 = arith.mulf %129, %133 : vector<128x128xf32>
    %cst_46 = arith.constant dense<0.000000e+00> : vector<128xf32>
    %135 = vector.multi_reduction <add>, %134, %cst_46 [0] : vector<128x128xf32> to vector<128xf32>
    %136 = vector.shape_cast %135 : vector<128xf32> to vector<1x128xf32>
    %cst_47 = arith.constant 9.99999971E-10 : f32
    %137 = vector.broadcast %cst_47 : f32 to vector<1x128xf32>
    %138 = arith.addf %136, %137 : vector<1x128xf32>
    %139 = tpu.reciprocal %138 {approx = true} : vector<1x128xf32> -> vector<1x128xf32>
    %140 = vector.broadcast %139 : vector<1x128xf32> to vector<128x128xf32>
    %141 = arith.mulf %134, %140 : vector<128x128xf32>
    %142 = vector.extract_strided_slice %121 {offsets = [0, 0], sizes = [64, 128], strides = [1, 1]} : vector<64x256xbf16> to vector<64x128xbf16>
    %143 = arith.truncf %141 : vector<128x128xf32> to vector<128x128xbf16>
    %cst_48 = arith.constant dense<0.000000e+00> : vector<64x128xf32>
    %144 = tpu.matmul %142, %143, %cst_48 {dimension_numbers = #tpu.dot_dimension_numbers<[1], [0], [0], [1], [0, 0, 1, 1], [], []>} : vector<64x128xbf16>, vector<128x128xbf16>, vector<64x128xf32> -> vector<64x128xf32>
    %145 = vector.extract_strided_slice %105 {offsets = [0, 0], sizes = [64, 128], strides = [1, 1]} : vector<64x256xf32> to vector<64x128xf32>
    %146 = arith.subf %145, %144 : vector<64x128xf32>
    %147 = arith.truncf %146 : vector<64x128xf32> to vector<64x128xbf16>
    %c0_49 = arith.constant 0 : index
    %c0_50 = arith.constant 0 : index
    %148 = vector.load %arg5[%c0_49, %c0_50] : memref<64x256xbf16, #tpu.memory_space<vmem>>, vector<64x128xbf16>
    tpu.vector_store %arg5[%c0_49, %c0_50], %147 {strides = array<i32>} : memref<64x256xbf16, #tpu.memory_space<vmem>>, vector<64x128xbf16>,
    %149 = vector.extract_strided_slice %115 {offsets = [0, 128], sizes = [32, 128], strides = [1, 1]} : vector<32x256xbf16> to vector<32x128xbf16>
    %150 = vector.extract_strided_slice %117 {offsets = [0, 128], sizes = [32, 128], strides = [1, 1]} : vector<32x256xbf16> to vector<32x128xbf16>
    %cst_51 = arith.constant dense<0.000000e+00> : vector<128x128xf32>
    %151 = tpu.matmul %149, %150, %cst_51 {dimension_numbers = #tpu.dot_dimension_numbers<[0], [0], [1], [1], [0, 1, 1, 1], [], []>} : vector<32x128xbf16>, vector<32x128xbf16>, vector<128x128xf32> -> vector<128x128xf32>
    %cst_52 = arith.constant dense<0xFF800000> : vector<128xf32>
    %152 = vector.multi_reduction <maximumf>, %151, %cst_52 [1] : vector<128x128xf32> to vector<128xf32>
    %153 = vector.shape_cast %152 : vector<128xf32> to vector<128x1xf32>
    %154 = vector.broadcast %153 : vector<128x1xf32> to vector<128x128xf32>
    %155 = arith.subf %151, %154 : vector<128x128xf32>
    %156 = math.exp %155 : vector<128x128xf32>
    %cst_53 = arith.constant dense<0.000000e+00> : vector<128xf32>
    %157 = vector.multi_reduction <add>, %156, %cst_53 [1] : vector<128x128xf32> to vector<128xf32>
    %158 = vector.shape_cast %157 : vector<128xf32> to vector<128x1xf32>
    %159 = tpu.reciprocal %158 {approx = true} : vector<128x1xf32> -> vector<128x1xf32>
    %160 = vector.broadcast %159 : vector<128x1xf32> to vector<128x128xf32>
    %161 = arith.mulf %156, %160 : vector<128x128xf32>
    %cst_54 = arith.constant dense<0.000000e+00> : vector<128xf32>
    %162 = vector.multi_reduction <add>, %161, %cst_54 [0] : vector<128x128xf32> to vector<128xf32>
    %163 = vector.shape_cast %162 : vector<128xf32> to vector<1x128xf32>
    %cst_55 = arith.constant 9.99999971E-10 : f32
    %164 = vector.broadcast %cst_55 : f32 to vector<1x128xf32>
    %165 = arith.addf %163, %164 : vector<1x128xf32>
    %166 = tpu.reciprocal %165 {approx = true} : vector<1x128xf32> -> vector<1x128xf32>
    %167 = vector.broadcast %166 : vector<1x128xf32> to vector<128x128xf32>
    %168 = arith.mulf %161, %167 : vector<128x128xf32>
    %169 = vector.extract_strided_slice %121 {offsets = [0, 128], sizes = [64, 128], strides = [1, 1]} : vector<64x256xbf16> to vector<64x128xbf16>
    %170 = arith.truncf %168 : vector<128x128xf32> to vector<128x128xbf16>
    %cst_56 = arith.constant dense<0.000000e+00> : vector<64x128xf32>
    %171 = tpu.matmul %169, %170, %cst_56 {dimension_numbers = #tpu.dot_dimension_numbers<[1], [0], [0], [1], [0, 0, 1, 1], [], []>} : vector<64x128xbf16>, vector<128x128xbf16>, vector<64x128xf32> -> vector<64x128xf32>
    %172 = vector.extract_strided_slice %105 {offsets = [0, 128], sizes = [64, 128], strides = [1, 1]} : vector<64x256xf32> to vector<64x128xf32>
    %173 = arith.subf %172, %171 : vector<64x128xf32>
    %174 = arith.truncf %173 : vector<64x128xf32> to vector<64x128xbf16>
    %c0_57 = arith.constant 0 : index
    %c128_58 = arith.constant 128 : index
    %175 = vector.load %arg5[%c0_57, %c128_58] : memref<64x256xbf16, #tpu.memory_space<vmem>>, vector<64x128xbf16>
    tpu.vector_store %arg5[%c0_57, %c128_58], %174 {strides = array<i32>} : memref<64x256xbf16, #tpu.memory_space<vmem>>, vector<64x128xbf16>,
    %c0_59 = arith.constant 0 : index
    %c0_60 = arith.constant 0 : index
    %176 = vector.load %arg5[%c0_59, %c0_60] : memref<64x256xbf16, #tpu.memory_space<vmem>>, vector<64x256xbf16>
    %cst_61 = arith.constant dense<0.000000e+00> : vector<64x256xf32>
    %177 = tpu.matmul %107, %176, %cst_61 {dimension_numbers = #tpu.dot_dimension_numbers<[1], [0], [0], [1], [0, 0, 1, 1], [], []>} : vector<64x64xbf16>, vector<64x256xbf16>, vector<64x256xf32> -> vector<64x256xf32>
    %178 = vector.broadcast %109 : vector<64x1xf32> to vector<64x256xf32>
    %179 = arith.addf %177, %178 : vector<64x256xf32>
    %cst_62 = arith.constant dense<0.000000e+00> : vector<64xf32>
    %180 = vector.multi_reduction <add>, %179, %cst_62 [1] : vector<64x256xf32> to vector<64xf32>
    %181 = vector.shape_cast %180 : vector<64xf32> to vector<64x1xf32>
    %cst_63 = arith.constant 2.560000e+02 : f32
    %182 = vector.broadcast %cst_63 : f32 to vector<64x1xf32>
    %183 = arith.divf %181, %182 : vector<64x1xf32>
    %184 = arith.mulf %179, %179 : vector<64x256xf32>
    %cst_64 = arith.constant dense<0.000000e+00> : vector<64xf32>
    %185 = vector.multi_reduction <add>, %184, %cst_64 [1] : vector<64x256xf32> to vector<64xf32>
    %186 = vector.shape_cast %185 : vector<64xf32> to vector<64x1xf32>
    %cst_65 = arith.constant 2.560000e+02 : f32
    %187 = vector.broadcast %cst_65 : f32 to vector<64x1xf32>
    %188 = arith.divf %186, %187 : vector<64x1xf32>
    %189 = arith.mulf %183, %183 : vector<64x1xf32>
    %190 = arith.subf %188, %189 : vector<64x1xf32>
    %cst_66 = arith.constant 9.99999974E-6 : f32
    %191 = vector.broadcast %cst_66 : f32 to vector<64x1xf32>
    %192 = arith.addf %190, %191 : vector<64x1xf32>
    %193 = math.rsqrt %192 : vector<64x1xf32>
    %194 = arith.mulf %110, %193 : vector<64x1xf32>
    %195 = vector.broadcast %183 : vector<64x1xf32> to vector<64x256xf32>
    %196 = arith.subf %179, %195 : vector<64x256xf32>
    %197 = vector.broadcast %194 : vector<64x1xf32> to vector<64x256xf32>
    %198 = arith.mulf %196, %197 : vector<64x256xf32>
    %199 = vector.broadcast %111 : vector<64x1xf32> to vector<64x256xf32>
    %200 = arith.addf %198, %199 : vector<64x256xf32>
    %cst_67 = arith.constant 0.000000e+00 : f32
    %201 = vector.broadcast %cst_67 : f32 to vector<64x256xf32>
    %202 = arith.maximumf %200, %201 : vector<64x256xf32>
    %203 = arith.addf %105, %202 : vector<64x256xf32>
    %204 = vector.extract_strided_slice %105 {offsets = [0, 0], sizes = [64, 128], strides = [1, 1]} : vector<64x256xf32> to vector<64x128xf32>
    %c0_68 = arith.constant 0 : index
    %c0_69 = arith.constant 0 : index
    %c0_70 = arith.constant 0 : index
    %205 = vector.load %arg3[%c0_68, %c0_69, %c0_70] : memref<2x128x128xf32, #tpu.memory_space<vmem>>, vector<1x64x128xf32>
    %206 = vector.shape_cast %205 : vector<1x64x128xf32> to vector<64x128xf32>
    %207 = vector.shape_cast %204 : vector<64x128xf32> to vector<1x64x128xf32>
    tpu.vector_store %arg3[%c0_68, %c0_69, %c0_70], %207 {strides = array<i32>} : memref<2x128x128xf32, #tpu.memory_space<vmem>>, vector<1x64x128xf32>,
    %208 = vector.extract_strided_slice %203 {offsets = [0, 0], sizes = [64, 128], strides = [1, 1]} : vector<64x256xf32> to vector<64x128xf32>
    %c0_71 = arith.constant 0 : index
    %c64 = arith.constant 64 : index
    %c0_72 = arith.constant 0 : index
    %209 = vector.load %arg3[%c0_71, %c64, %c0_72] : memref<2x128x128xf32, #tpu.memory_space<vmem>>, vector<1x64x128xf32>
    %210 = vector.shape_cast %209 : vector<1x64x128xf32> to vector<64x128xf32>
    %211 = vector.shape_cast %208 : vector<64x128xf32> to vector<1x64x128xf32>
    tpu.vector_store %arg3[%c0_71, %c64, %c0_72], %211 {strides = array<i32>} : memref<2x128x128xf32, #tpu.memory_space<vmem>>, vector<1x64x128xf32>,
    %212 = vector.extract_strided_slice %105 {offsets = [0, 128], sizes = [64, 128], strides = [1, 1]} : vector<64x256xf32> to vector<64x128xf32>
    %c1_73 = arith.constant 1 : index
    %c0_74 = arith.constant 0 : index
    %c0_75 = arith.constant 0 : index
    %213 = vector.load %arg3[%c1_73, %c0_74, %c0_75] : memref<2x128x128xf32, #tpu.memory_space<vmem>>, vector<1x64x128xf32>
    %214 = vector.shape_cast %213 : vector<1x64x128xf32> to vector<64x128xf32>
    %215 = vector.shape_cast %212 : vector<64x128xf32> to vector<1x64x128xf32>
    tpu.vector_store %arg3[%c1_73, %c0_74, %c0_75], %215 {strides = array<i32>} : memref<2x128x128xf32, #tpu.memory_space<vmem>>, vector<1x64x128xf32>,
    %216 = vector.extract_strided_slice %203 {offsets = [0, 128], sizes = [64, 128], strides = [1, 1]} : vector<64x256xf32> to vector<64x128xf32>
    %c1_76 = arith.constant 1 : index
    %c64_77 = arith.constant 64 : index
    %c0_78 = arith.constant 0 : index
    %217 = vector.load %arg3[%c1_76, %c64_77, %c0_78] : memref<2x128x128xf32, #tpu.memory_space<vmem>>, vector<1x64x128xf32>
    %218 = vector.shape_cast %217 : vector<1x64x128xf32> to vector<64x128xf32>
    %219 = vector.shape_cast %216 : vector<64x128xf32> to vector<1x64x128xf32>
    tpu.vector_store %arg3[%c1_76, %c64_77, %c0_78], %219 {strides = array<i32>} : memref<2x128x128xf32, #tpu.memory_space<vmem>>, vector<1x64x128xf32>,
    return
  }
}

</mosaic_0001>

<bundles_post_ra>
// kernel: point_transformer_last.1
= control target key start
LH: loop header
LB: loop body
LE: loop exit
PB: predicated region body
PF: predicated region fallthrough
CT: control target
= control target key end

     0   :  { %v5980_v7 = vmov 0   ;;  %vm145_vm0 = vcmask 523264   ;;  %s5976_s0 = inlined_call_operand.vmem [shape: f32[2,64,128], index: 0, kind: input, shape index: {}]   ;;  %s5977_s1 = inlined_call_operand.vmem [shape: bf16[384,64], index: 1, kind: input, shape index: {}]   ;;  %s5978_s2 = inlined_call_operand.vmem [shape: f32[64,8], index: 2, kind: input, shape index: {}]   ;;  %s5979_s3 = inlined_call_operand.hbm [shape: f32[2,128,128], index: 3, kind: output, shape index: {}]  }
   0x1   :  { %v3363_v0 = vld [vmem:[%s5976_s0 + $0x70] sm:$0xff]  ;;  %v3364_v1 = vld [vmem:[%s5976_s0 + $0x78] sm:$0xff]  ;;  %v3361_v5 = vld [vmem:[%s5976_s0 + $0x60] sm:$0xff]  ;;  %202 = vmatprep.mubr.bf16.mxu0 %v5980_v7  ;;  %272 = vmatprep.mubr.bf16.mxu1 %v5980_v7 }
   0x2   :  { %v22_v2 = vld [vmem:[%s5976_s0 + $0x30] sm:$0xff]  ;;  %v104_v3 = vpack.c.bf16 %v3364_v1, %v3363_v0  ;;  %v23_v4 = vld [vmem:[%s5976_s0 + $0x38] sm:$0xff]  ;;  %v3362_v6 = vld [vmem:[%s5976_s0 + $0x68] sm:$0xff]  ;;  %3808 = vset.pattern.permute.xlu1 %v5980_v7 }
   0x3   :  { %v103_v8 = vpack.c.bf16 %v23_v4, %v22_v2  ;;  %v102_v9 = vpack.c.bf16 %v3362_v6, %v3361_v5  ;;  %v20_v10 = vld [vmem:[%s5976_s0 + $0x20] sm:$0xff]  ;;  %v21_v11 = vld [vmem:[%s5976_s0 + $0x28] sm:$0xff]  ;;  %v3359_v12 = vld [vmem:[%s5976_s0 + $0x50] sm:$0xff] }
   0x4   :  { %178 = vmatprep.subr.bf16.mxu0 %v104_v3  ;;  %v3360_v13 = vld [vmem:[%s5976_s0 + $0x58] sm:$0xff]  ;;  %3789 = vmatprep.subr.bf16.mxu1 %v104_v3  ;;  %v101_v14 = vpack.c.bf16 %v21_v11, %v20_v10  ;;  %v4323_v15 = vld [vmem:[%s5976_s0 + $0x10] sm:$0xff]  ;;  %v3357_v18 = vld [vmem:[%s5976_s0 + $0x40] sm:$0xff] }
   0x5   :  { %179 = vmatpush1.bf16.msra.mxu0 %v103_v8  ;;  %v4328_v16 = vld [vmem:[%s5976_s0 + $0x18] sm:$0xff]  ;;  %3793 = vmatpush1.bf16.msra.mxu1 %v103_v8  ;;  %v100_v17 = vpack.c.bf16 %v3360_v13, %v3359_v12  ;;  %v3358_v19 = vld [vmem:[%s5976_s0 + $0x48] sm:$0xff]  ;;  %v4341_v21 = vld [vmem:[%s5976_s0] sm:$0xff] }
   0x6   :  { %180 = vmatprep.subr.bf16.mxu0 %v102_v9  ;;  %3790 = vmatprep.subr.bf16.mxu1 %v102_v9  ;;  %v99_v20 = vpack.c.bf16 %v4328_v16, %v4323_v15  ;;  %v98_v22 = vpack.c.bf16 %v3358_v19, %v3357_v18  ;;  %v4346_v23 = vld [vmem:[%s5976_s0 + $0x8] sm:$0xff]  ;;  %v3830_v25 = vld [vmem:[%s5977_s1] sm:$0xff]  }
   0x7   :  { %v97_v24 = vpack.c.bf16 %v4346_v23, %v4341_v21 }
   0x9   :  { %181 = vmatpush1.bf16.msra.mxu0 %v101_v14  ;;  %3794 = vmatpush1.bf16.msra.mxu1 %v101_v14 }
   0xa   :  { %182 = vmatprep.subr.bf16.mxu0 %v100_v17  ;;  %3791 = vmatprep.subr.bf16.mxu1 %v100_v17 }
   0xd   :  { %183 = vmatpush1.bf16.msra.mxu0 %v99_v20  ;;  %3795 = vmatpush1.bf16.msra.mxu1 %v99_v20 }
   0xe   :  { %184 = vmatprep.subr.bf16.mxu0 %v98_v22  ;;  %3792 = vmatprep.subr.bf16.mxu1 %v98_v22 }
  0x11   :  { %185 = vmatpush1.bf16.msra.mxu0 %v97_v24  ;;  %3796 = vmatpush1.bf16.msra.mxu1 %v97_v24 }
  0x14   :  { %3373 = vmatmul.mubr.msk.bf16.vlgmr.msra.gmra.mxu0 %vm145_vm0, %v3830_v25 }
  0x15   :  { %212 = vmatprep.mubr.bf16.mxu0 %v5980_v7 }
  0x16   :  { %8 = vsyncpa [#allocation5], 0  ;;  %v3831_v26 = vld [vmem:[%s5977_s1 + $0x8] sm:$0xff]   ;;  %v3832_v27 = vld [vmem:[%s5977_s1 + $0x10] sm:$0xff]   ;;  %vm371_vm1 = vcmask 261120  }
  0x17   :  { %v3833_v28 = vld [vmem:[%s5977_s1 + $0x18] sm:$0xff]   ;;  %v3835_v19 = vld [vmem:[%s5977_s1 + $0x20] sm:$0xff]   ;;  %v3836_v20 = vld [vmem:[%s5977_s1 + $0x28] sm:$0xff]  }
  0x18   :  { %v3834_v29 = vld [vmem:[%s5977_s1 + $0x38] sm:$0xff]   ;;  %v3837_v22 = vld [vmem:[%s5977_s1 + $0x30] sm:$0xff]  }
  0x19   :  { %3380 = vmatmul.mubr.msk.bf16.vlgmr.msra.gmra.mxu1 %vm145_vm0, %v3834_v29 }
  0x1c   :  { %3374 = vmatmul.mubr.msk.bf16.gmra.mxu0 %vm145_vm0, %v3831_v26 }
  0x1d   :  { %222 = vmatprep.mubr.bf16.mxu0 %v5980_v7 }
  0x24   :  { %3375 = vmatmul.mubr.msk.bf16.gmra.mxu0 %vm145_vm0, %v3832_v27 }
  0x25   :  { %232 = vmatprep.mubr.bf16.mxu0 %v5980_v7 }
  0x2c   :  { %3376 = vmatmul.mubr.msk.bf16.gmra.mxu0 %vm145_vm0, %v3833_v28 }
  0x2d   :  { %242 = vmatprep.mubr.bf16.mxu0 %v5980_v7 }
  0x34   :  { %3377 = vmatmul.mubr.msk.bf16.gmra.mxu0 %vm145_vm0, %v3835_v19 }
  0x35   :  { %252 = vmatprep.mubr.bf16.mxu0 %v5980_v7 }
  0x3c   :  { %3378 = vmatmul.mubr.msk.bf16.gmra.mxu0 %vm145_vm0, %v3836_v20 }
  0x3d   :  { %262 = vmatprep.mubr.bf16.mxu0 %v5980_v7 }
  0x44   :  { %3379 = vmatmul.mubr.msk.bf16.gmra.mxu0 %vm145_vm0, %v3837_v22 }
  0xd4   :  { %v204_v30 = vpop.f32.mrf.mxu0 }
  0xd6   :  { %v4374_v31 = vpop.f32.mrf.mxu0 }
  0xd8   :  { %v208_v32 = vpop.f32.mrf.mxu0 }
  0xd9   :  { %v283_v33 = vpack.c.bf16 %v208_v32, %v204_v30  ;;  %v4399_v60 = vpop.f32.mrf.mxu1 }
  0xda   :  { %v4376_v34 = vpop.f32.mrf.mxu0 }
  0xdb   :  { %v284_v35 = vpack.c.bf16 %v4376_v34, %v4374_v31  ;;  %355 = vxpose.xlu0.c.b16.start [1/2] (short) %v283_v33, 128  ;;  %v4401_v61 = vpop.f32.mrf.mxu1 }
  0xdc   :  { %v214_v36 = vpop.f32.mrf.mxu0 }
  0xdd   :  { %v4403_v62 = vpop.f32.mrf.mxu1 }
  0xde   :  { %v4380_v37 = vpop.f32.mrf.mxu0 }
  0xdf   :  { %v4405_v63 = vpop.f32.mrf.mxu1 }
  0xe0   :  { %v218_v38 = vpop.f32.mrf.mxu0 }
  0xe1   :  { %v285_v39 = vpack.c.bf16 %v218_v38, %v214_v36 }
  0xe2   :  { %v4382_v40 = vpop.f32.mrf.mxu0 }
  0xe3   :  { %v286_v41 = vpack.c.bf16 %v4382_v40, %v4380_v37  ;;  %356 = vxpose.xlu0.c.b16.end [2/2] (short) %v285_v39, 128 }
  0xe4   :  { %v224_v42 = vpop.f32.mrf.mxu0 }
  0xe6   :  { %v226_v43 = vpop.f32.mrf.mxu0 }
  0xe8   :  { %v228_v44 = vpop.f32.mrf.mxu0 }
  0xe9   :  { %v287_v50 = vpack.c.bf16 %v228_v44, %v224_v42 }
  0xea   :  { %v230_v45 = vpop.f32.mrf.mxu0 }
  0xeb   :  { %v4386_v46 = vpack.c.bf16 %v230_v45, %v226_v43 }
  0xec   :  { %v234_v47 = vpop.f32.mrf.mxu0  ;;  %3809 = vset.pattern.permute.xlu0 %v5980_v7 }
  0xee   :  { %v4389_v48 = vpop.f32.mrf.mxu0 }
  0xf0   :  { %v238_v49 = vpop.f32.mrf.mxu0 }
  0xf1   :  { %v289_v51 = vpack.c.bf16 %v238_v49, %v234_v47 }
  0xf3   :  { %3613 = vmatprep.subr.bf16.mxu1 %v289_v51 }
  0xf4   :  { %3614 = vmatpush3.bf16.msra.mxu1 %v289_v51 }
  0xf5   :  { %3615 = vmatprep.subr.bf16.mxu1 %v287_v50 }
  0xf8   :  { %3616 = vmatpush3.bf16.msra.mxu1 %v287_v50 }
 0x141   :  { %v363_v52 = vpop.trf.xlu0 }
 0x142   :  { %3617 = vmatprep.mubr.msk.bf16.mxu1 %vm371_vm1, %v363_v52 }
 0x145   :  { %v364_v53 = vpop.trf.xlu0 }
 0x146   :  { %3618 = vmatmul.mubr.msk.bf16.vlgmr.msra.gmra.mxu1 %vm371_vm1, %v364_v53 }
 0x149   :  { %v365_v54 = vpop.trf.xlu0 }
 0x14a   :  { %3621 = vmatprep.mubr.msk.bf16.mxu1 %vm371_vm1, %v365_v54 }
 0x14d   :  { %v366_v55 = vpop.trf.xlu0 }
 0x14e   :  { %3622 = vmatmul.mubr.msk.bf16.gmra.mxu1 %vm371_vm1, %v366_v55 }
 0x151   :  { %v367_v56 = vpop.trf.xlu0 }
 0x152   :  { %3625 = vmatprep.mubr.msk.bf16.mxu1 %vm371_vm1, %v367_v56 }
 0x155   :  { %v368_v57 = vpop.trf.xlu0 }
 0x156   :  { %3626 = vmatmul.mubr.msk.bf16.gmra.mxu1 %vm371_vm1, %v368_v57 }
 0x159   :  { %v369_v58 = vpop.trf.xlu0 }
 0x15a   :  { %3629 = vmatprep.mubr.msk.bf16.mxu1 %vm371_vm1, %v369_v58 }
 0x15d   :  { %v370_v59 = vpop.trf.xlu0 }
 0x15e   :  { %3630 = vmatmul.mubr.msk.bf16.gmra.mxu1 %vm371_vm1, %v370_v59 }
 0x206   :  { %v3619_v0 = vpop.f32.mrf.mxu1 }
 0x207   :  { %497 = vmax.xlane.f32.xlu0 %v3619_v0 }
 0x208   :  { %v430_v1 = vpop.f32.mrf.mxu1 }
 0x209   :  { %493 = vmax.xlane.f32.xlu1 %v430_v1 }
 0x20a   :  { %v3620_v2 = vpop.f32.mrf.mxu1 }
 0x20c   :  { %v433_v3 = vpop.f32.mrf.mxu1 }
 0x20d   :  { %499 = vmax.xlane.f32.xlu1 %v3620_v2 }
 0x20e   :  { %v3623_v4 = vpop.f32.mrf.mxu1 }
 0x210   :  { %v446_v5 = vpop.f32.mrf.mxu1 }
 0x211   :  { %495 = vmax.xlane.f32.xlu1 %v433_v3 }
 0x212   :  { %v4407_v6 = vpop.f32.mrf.mxu1 }
 0x214   :  { %v449_v8 = vpop.f32.mrf.mxu1 }
 0x215   :  { %505 = vmax.xlane.f32.xlu1 %v3623_v4 }
 0x216   :  { %v4409_v9 = vpop.f32.mrf.mxu1 }
 0x218   :  { %v4411_v10 = vpop.f32.mrf.mxu1 }
 0x219   :  { %501 = vmax.xlane.f32.xlu1 %v446_v5 }
 0x21a   :  { %v4413_v11 = vpop.f32.mrf.mxu1 }
 0x21c   :  { %v4415_v12 = vpop.f32.mrf.mxu1 }
 0x21d   :  { %507 = vmax.xlane.f32.xlu1 %v4407_v6 }
 0x21e   :  { %v4418_v13 = vpop.f32.mrf.mxu1 }
 0x220   :  { %v4420_v14 = vpop.f32.mrf.mxu1 }
 0x221   :  { %503 = vmax.xlane.f32.xlu1 %v449_v8 }
 0x222   :  { %v4422_v17 = vpop.f32.mrf.mxu1 }
 0x224   :  { %v4424_v18 = vpop.f32.mrf.mxu1 }
 0x225   :  { %513 = vmax.xlane.f32.xlu1 %v4409_v9  ;;  %519 = vmax.xlane.f32.xlu0 %v4424_v18 }
 0x229   :  { %509 = vmax.xlane.f32.xlu1 %v4411_v10  ;;  %523 = vmax.xlane.f32.xlu0 %v4422_v17 }
 0x22d   :  { %511 = vmax.xlane.f32.xlu1 %v4415_v12 }
 0x231   :  { %515 = vmax.xlane.f32.xlu1 %v4413_v11 }
 0x235   :  { %517 = vmax.xlane.f32.xlu1 %v4420_v14 }
 0x239   :  { %521 = vmax.xlane.f32.xlu1 %v4418_v13 }
 0x290   :  { %v498_v24 = vpop.xlane.xlu0 %497 }
 0x291   :  { %v527_v26 = vsub.f32 %v3619_v0, %v498_v24 }
 0x292   :  { %v494_v25 = vpop.xlane.xlu1 %493 }
 0x293   :  { %v525_v27 = vsub.f32 %v430_v1, %v494_v25  ;;  %v545_v30 = vmul.f32 1.442695, %v527_v26 }
 0x295   :  { %v541_v28 = vmul.f32 1.442695, %v525_v27 }
 0x296   :  { %v500_v29 = vpop.xlane.xlu1 %499 }
 0x297   :  { %3878 = vpow2.f32 %v541_v28  ;;  %v528_v33 = vsub.f32 %v3620_v2, %v500_v29 }
 0x298   :  { %3880 = vpow2.f32 %v545_v30 }
 0x299   :  { %v547_v42 = vmul.f32 1.442695, %v528_v33 }
 0x29a   :  { %v496_v32 = vpop.xlane.xlu1 %495 }
 0x29b   :  { %v526_v36 = vsub.f32 %v433_v3, %v496_v32 }
 0x29d   :  { %v543_v38 = vmul.f32 1.442695, %v526_v36 }
 0x29e   :  { %v506_v39 = vpop.xlane.xlu1 %505 }
 0x29f   :  { %3882 = vpow2.f32 %v543_v38  ;;  %v531_v44 = vsub.f32 %v3623_v4, %v506_v39 }
 0x2a0   :  { %3884 = vpow2.f32 %v547_v42 }
 0x2a1   :  { %v553_v51 = vmul.f32 1.442695, %v531_v44 }
 0x2a2   :  { %v502_v43 = vpop.xlane.xlu1 %501 }
 0x2a3   :  { %v529_v45 = vsub.f32 %v446_v5, %v502_v43 }
 0x2a4   :  { %v4448_v47 = vpop.eup %3878 }
 0x2a5   :  { %v549_v49 = vmul.f32 1.442695, %v529_v45  ;;  %573 = vadd.xlane.f32.xlu1 %v4448_v47  ;;  %v4451_v52 = vpop.eup %3880 }
 0x2a6   :  { %v508_v50 = vpop.xlane.xlu1 %507 }
 0x2a7   :  { %3886 = vpow2.f32 %v549_v49  ;;  %v532_v54 = vsub.f32 %v4407_v6, %v508_v50  ;;  %v65_v50 = vld [vmem:[%s5978_s2] sm:$0xff] }
 0x2a8   :  { %3888 = vpow2.f32 %v553_v51  ;;  %v67_v51 = vld [vmem:[%s5978_s2 + $0x10] sm:$0xff] }
 0x2a9   :  { %577 = vadd.xlane.f32.xlu1 %v4451_v52  ;;  %v555_v59 = vmul.f32 1.442695, %v532_v54  ;;  %v68_v54 = vld [vmem:[%s5978_s2 + $0x18] sm:$0xff] }
 0x2aa   :  { %v504_v53 = vpop.xlane.xlu1 %503 }
 0x2ab   :  { %v530_v55 = vsub.f32 %v449_v8, %v504_v53  ;;  %v66_v53 = vld [vmem:[%s5978_s2 + $0x8] sm:$0xff] }
 0x2ac   :  { %v4455_v56 = vpop.eup %3882 }
 0x2ad   :  { %v551_v57 = vmul.f32 1.442695, %v530_v55  ;;  %575 = vadd.xlane.f32.xlu0 %v4455_v56  ;;  %v4458_v0 = vpop.eup %3884  ;;  %v4520_v55 = vld [vmem:[%s5978_s2 + $0x20] sm:$0xff] }
 0x2ae   :  { %v514_v58 = vpop.xlane.xlu1 %513  ;;  %v520_v5 = vpop.xlane.xlu0 %519 }
 0x2af   :  { %3890 = vpow2.f32 %v551_v57  ;;  %v535_v1 = vsub.f32 %v4409_v9, %v514_v58  ;;  %v538_v9 = vsub.f32 %v4424_v18, %v520_v5  ;;  %v4526_v57 = vld [vmem:[%s5978_s2 + $0x28] sm:$0xff]  ;;  %v4532_v58 = vld [vmem:[%s5978_s2 + $0x30] sm:$0xff] }
 0x2b0   :  { %3892 = vpow2.f32 %v555_v59  ;;  %v4538_v59 = vld [vmem:[%s5978_s2 + $0x38] sm:$0xff] }
 0x2b1   :  { %579 = vadd.xlane.f32.xlu0 %v4458_v0  ;;  %v561_v8 = vmul.f32 1.442695, %v535_v1  ;;  %v567_v29 = vmul.f32 1.442695, %v538_v9 }
 0x2b2   :  { %v510_v2 = vpop.xlane.xlu1 %509  ;;  %v524_v25 = vpop.xlane.xlu0 %523 }
 0x2b3   :  { %v533_v3 = vsub.f32 %v4411_v10, %v510_v2 }
 0x2b4   :  { %v4463_v4 = vpop.eup %3886 }
 0x2b5   :  { %v557_v6 = vmul.f32 1.442695, %v533_v3  ;;  %581 = vadd.xlane.f32.xlu1 %v4463_v4  ;;  %v4467_v22 = vpop.eup %3888 }
 0x2b6   :  { %v512_v19 = vpop.xlane.xlu1 %511 }
 0x2b7   :  { %3894 = vpow2.f32 %v557_v6  ;;  %v534_v20 = vsub.f32 %v4415_v12, %v512_v19  ;;  %v540_v12 = vsub.f32 %v4422_v17, %v524_v25 }
 0x2b8   :  { %3896 = vpow2.f32 %v561_v8 }
 0x2b9   :  { %v559_v24 = vmul.f32 1.442695, %v534_v20  ;;  %585 = vadd.xlane.f32.xlu1 %v4467_v22  ;;  %v571_v36 = vmul.f32 1.442695, %v540_v12 }
 0x2ba   :  { %v516_v10 = vpop.xlane.xlu1 %515 }
 0x2bb   :  { %3898 = vpow2.f32 %v559_v24  ;;  %v536_v26 = vsub.f32 %v4413_v11, %v516_v10 }
 0x2bc   :  { %v4472_v27 = vpop.eup %3890 }
 0x2bd   :  { %v563_v28 = vmul.f32 1.442695, %v536_v26  ;;  %583 = vadd.xlane.f32.xlu0 %v4472_v27  ;;  %v4477_v33 = vpop.eup %3892 }
 0x2be   :  { %v518_v30 = vpop.xlane.xlu1 %517 }
 0x2bf   :  { %3900 = vpow2.f32 %v563_v28  ;;  %v537_v32 = vsub.f32 %v4420_v14, %v518_v30 }
 0x2c0   :  { %3902 = vpow2.f32 %v567_v29 }
 0x2c1   :  { %v565_v18 = vmul.f32 1.442695, %v537_v32  ;;  %587 = vadd.xlane.f32.xlu0 %v4477_v33 }
 0x2c2   :  { %v522_v11 = vpop.xlane.xlu1 %521 }
 0x2c3   :  { %3904 = vpow2.f32 %v565_v18  ;;  %v539_v38 = vsub.f32 %v4418_v13, %v522_v11  ;;  %v4570_v11 = vpop.f32.mrf.mxu0 }
 0x2c4   :  { %v4481_v39 = vpop.eup %3894  ;;  %3906 = vpow2.f32 %v571_v36 }
 0x2c5   :  { %v569_v42 = vmul.f32 1.442695, %v539_v38  ;;  %589 = vadd.xlane.f32.xlu1 %v4481_v39  ;;  %v4484_v17 = vpop.eup %3896  ;;  %v244_v38 = vpop.f32.mrf.mxu0 }
 0x2c7   :  { %3908 = vpow2.f32 %v569_v42 }
 0x2c8   :  { %v4486_v14 = vpop.eup %3898 }
 0x2c9   :  { %593 = vadd.xlane.f32.xlu1 %v4484_v17  ;;  %591 = vadd.xlane.f32.xlu0 %v4486_v14 }
 0x2cc   :  { %v4490_v43 = vpop.eup %3900 }
 0x2cd   :  { %595 = vadd.xlane.f32.xlu0 %v4490_v43  ;;  %v4493_v13 = vpop.eup %3902 }
 0x2d0   :  { %v4495_v44 = vpop.eup %3904 }
 0x2d1   :  { %597 = vadd.xlane.f32.xlu1 %v4495_v44  ;;  %599 = vadd.xlane.f32.xlu0 %v4493_v13  ;;  %v4499_v45 = vpop.eup %3906 }
 0x2d4   :  { %v4501_v49 = vpop.eup %3908 }
 0x2d5   :  { %601 = vadd.xlane.f32.xlu1 %v4501_v49  ;;  %603 = vadd.xlane.f32.xlu0 %v4499_v45 }
 0x2e6   :  { %293 = vperm.xlu1 %3808, %v65_v50  }
 0x2ea   :  { %303 = vperm.xlu1 %3808, %v67_v51  }
 0x2eb   :  { %298 = vperm.xlu0 %3809, %v66_v53  }
 0x2ee   :  { %308 = vperm.xlu1 %3808, %v68_v54  }
 0x2f2   :  { %313 = vperm.xlu1 %3808, %v4520_v55  }
 0x2f6   :  { %318 = vperm.xlu1 %3808, %v4526_v57  }
 0x2fa   :  { %323 = vperm.xlu1 %3808, %v4532_v58  }
 0x2fe   :  { %328 = vperm.xlu1 %3808, %v4538_v59  }
 0x321   :  { %797 = vxpose.xlu1.c.b16.start [1/2] (short) %v284_v35, 128 }
 0x325   :  { %798 = vxpose.xlu1.c.b16.end [2/2] (short) %v286_v41, 128 }
 0x32e   :  { %v574_v1 = vpop.xlane.xlu1 %573 }
 0x332   :  { %v578_v3 = vpop.xlane.xlu1 %577 }
 0x336   :  { %v576_v2 = vpop.xlane.xlu0 %575 }
 0x337   :  { %3910 = vrcp.f32 %v576_v2 }
 0x338   :  { %3912 = vrcp.f32 %v574_v1  ;;  %v246_v1 = vpop.f32.mrf.mxu0 }
 0x339   :  { %3914 = vrcp.f32 %v578_v3 }
 0x33a   :  { %v580_v5 = vpop.xlane.xlu0 %579 }
 0x33b   :  { %3916 = vrcp.f32 %v580_v5 }
 0x33e   :  { %v582_v6 = vpop.xlane.xlu1 %581 }
 0x33f   :  { %3918 = vrcp.f32 %v582_v6 }
 0x342   :  { %v586_v24 = vpop.xlane.xlu1 %585 }
 0x344   :  { %v3911_v8 = vpop.eup %3910 }
 0x345   :  { %v3913_v20 = vpop.eup %3912  ;;  %v4548_v31 = vmul.f32 %v3911_v8, %v4455_v56 }
 0x346   :  { %v584_v19 = vpop.xlane.xlu0 %583  ;;  %v4551_v34 = vmul.f32 %v3913_v20, %v4448_v47  ;;  %v3915_v37 = vpop.eup %3914 }
 0x347   :  { %3920 = vrcp.f32 %v584_v19  ;;  %v4556_v9 = vmul.f32 %v3915_v37, %v4451_v52  ;;  %v248_v19 = vpop.f32.mrf.mxu0 }
 0x348   :  { %3922 = vrcp.f32 %v586_v24  ;;  %v637_v40 = vadd.f32 %v4548_v31, %v4551_v34  ;;  %v3917_v41 = vpop.eup %3916 }
 0x349   :  { %v4560_v26 = vmul.f32 %v3917_v41, %v4458_v0 }
 0x34a   :  { %v588_v35 = vpop.xlane.xlu0 %587  ;;  %v638_v56 = vadd.f32 %v637_v40, %v4556_v9 }
 0x34b   :  { %3924 = vrcp.f32 %v588_v35 }
 0x34c   :  { %v3919_v25 = vpop.eup %3918  ;;  %v639_v30 = vadd.f32 %v638_v56, %v4560_v26 }
 0x34d   :  { %v4563_v47 = vmul.f32 %v3919_v25, %v4463_v4  ;;  %v250_v25 = vpop.f32.mrf.mxu0 }
 0x34e   :  { %v590_v10 = vpop.xlane.xlu1 %589 }
 0x34f   :  { %3926 = vrcp.f32 %v590_v10  ;;  %v640_v32 = vadd.f32 %v639_v30, %v4563_v47 }
 0x352   :  { %v594_v28 = vpop.xlane.xlu1 %593  ;;  %v592_v29 = vpop.xlane.xlu0 %591 }
 0x353   :  { %3928 = vrcp.f32 %v594_v28 }
 0x354   :  { %v3921_v12 = vpop.eup %3920  ;;  %3930 = vrcp.f32 %v592_v29 }
 0x355   :  { %v4567_v52 = vmul.f32 %v3921_v12, %v4472_v27  ;;  %v3923_v36 = vpop.eup %3922 }
 0x356   :  { %v596_v18 = vpop.xlane.xlu0 %595  ;;  %v4574_v42 = vmul.f32 %v3923_v36, %v4467_v22 }
 0x357   :  { %3932 = vrcp.f32 %v596_v18  ;;  %v641_v0 = vadd.f32 %v640_v32, %v4567_v52 }
 0x358   :  { %v3925_v4 = vpop.eup %3924 }
 0x359   :  { %v642_v27 = vadd.f32 %v641_v0, %v4574_v42  ;;  %v4578_v54 = vmul.f32 %v3925_v4, %v4477_v33 }
 0x35a   :  { %v598_v50 = vpop.xlane.xlu1 %597  ;;  %v600_v51 = vpop.xlane.xlu0 %599 }
 0x35b   :  { %3934 = vrcp.f32 %v598_v50  ;;  %v643_v22 = vadd.f32 %v642_v27, %v4578_v54 }
 0x35c   :  { %v3927_v53 = vpop.eup %3926  ;;  %3936 = vrcp.f32 %v600_v51 }
 0x35d   :  { %v4581_v2 = vmul.f32 %v3927_v53, %v4481_v39 }
 0x35e   :  { %v602_v3 = vpop.xlane.xlu1 %601  ;;  %v604_v5 = vpop.xlane.xlu0 %603 }
 0x35f   :  { %3938 = vrcp.f32 %v602_v3  ;;  %v644_v20 = vadd.f32 %v643_v22, %v4581_v2 }
 0x360   :  { %v3929_v6 = vpop.eup %3928  ;;  %3940 = vrcp.f32 %v604_v5 }
 0x361   :  { %v3931_v8 = vpop.eup %3930  ;;  %v631_v37 = vmul.f32 %v3929_v6, %v4484_v17 }
 0x362   :  { %v630_v24 = vmul.f32 %v3931_v8, %v4486_v14  ;;  %v294_v33 = vpop.permute.xlu1 %293 }
 0x363   :  { %v331_v41 = vadd.f32 %v294_v33, %v244_v38  ;;  %v332_v10 = vadd.f32 %v294_v33, %v246_v1 }
 0x364   :  { %v3933_v35 = vpop.eup %3932  ;;  %v645_v40 = vadd.f32 %v644_v20, %v630_v24 }
 0x365   :  { %v632_v39 = vmul.f32 %v3933_v35, %v4490_v43 }
 0x366   :  { %v4588_v56 = vpop.permute.xlu1 %303  ;;  %v646_v28 = vadd.f32 %v645_v40, %v631_v37  ;;  %v299_v29 = vpop.permute.xlu0 %298 }
 0x367   :  { %v333_v12 = vadd.f32 %v299_v29, %v248_v19  ;;  %v334_v30 = vadd.f32 %v299_v29, %v250_v25 }
 0x368   :  { %v3935_v32 = vpop.eup %3934  ;;  %v647_v36 = vadd.f32 %v646_v28, %v632_v39 }
 0x369   :  { %v3937_v18 = vpop.eup %3936  ;;  %v633_v14 = vmul.f32 %v3935_v32, %v4495_v44  ;;  %v347_v0 = vpack.c.bf16 %v333_v12, %v331_v41  ;;  %v348_v4 = vpack.c.bf16 %v334_v30, %v332_v10 }
 0x36a   :  { %v4591_v17 = vpop.permute.xlu1 %308  ;;  %v634_v43 = vmul.f32 %v3937_v18, %v4493_v13 }
 0x36b   :  { %v648_v38 = vadd.f32 %v647_v36, %v633_v14  ;;  %3649 = vmatprep.mubr.bf16.mxu1 %v347_v0  ;;  %3693 = vmatprep.mubr.bf16.mxu0 %v348_v4 }
 0x36c   :  { %v3939_v50 = vpop.eup %3938 }
 0x36d   :  { %v3941_v51 = vpop.eup %3940  ;;  %v635_v53 = vmul.f32 %v3939_v50, %v4501_v49  ;;  %v649_v27 = vadd.f32 %v648_v38, %v634_v43 }
 0x36e   :  { %v4595_v1 = vpop.permute.xlu1 %313  ;;  %v636_v3 = vmul.f32 %v3941_v51, %v4499_v45 }
 0x36f   :  { %v650_v44 = vadd.f32 %v649_v27, %v635_v53 }
 0x371   :  { %v651_v5 = vadd.f32 %v650_v44, %v636_v3 }
 0x372   :  { %v4598_v6 = vpop.permute.xlu1 %318 }
 0x373   :  { %v652_v22 = vrot.slane %v651_v5, 4 }
 0x375   :  { %v653_v8 = vadd.f32 %v652_v22, %v651_v5 }
 0x376   :  { %v4600_v19 = vpop.permute.xlu1 %323 }
 0x377   :  { %v654_v13 = vrot.slane %v653_v8, 2  ;;  %v4606_v49 = vadd.f32 %v4600_v19, %v4401_v61 }
 0x379   :  { %v655_v20 = vadd.f32 %v654_v13, %v653_v8 }
 0x37a   :  { %v4602_v33 = vpop.permute.xlu1 %328 }
 0x37b   :  { %v4610_v35 = vadd.f32 %v4602_v33, %v4405_v63  ;;  %v656_v45 = vrot.slane %v655_v20, 1  ;;  %v254_v63 = vpop.f32.mrf.mxu0 }
 0x37c   :  { %v335_v8 = vadd.f32 %v4588_v56, %v254_v63 }
 0x37d   :  { %v354_v40 = vpack.c.bf16 %v4610_v35, %v4606_v49  ;;  %v657_v41 = vadd.f32 %v656_v45, %v655_v20  ;;  %v4615_v50 = vpop.f32.mrf.mxu0 }
 0x37f   :  { %v658_v10 = vadd.f32 1e-09, %v657_v41 }
 0x381   :  { %3942 = vrcp.f32 %v658_v10 }
 0x383   :  { %v805_v45 = vpop.trf.xlu1 }
 0x387   :  { %v806_v10 = vpop.trf.xlu1 }
 0x38e   :  { %v3943_v25 = vpop.eup %3942 }
 0x38f   :  { %v674_v28 = vmul.f32 %v3943_v25, %v635_v53  ;;  %v675_v29 = vmul.f32 %v3943_v25, %v636_v3  ;;  %v672_v12 = vmul.f32 %v3943_v25, %v633_v14  ;;  %v673_v30 = vmul.f32 %v3943_v25, %v634_v43  ;;  %v258_v53 = vpop.f32.mrf.mxu0 }
 0x390   :  { %v670_v18 = vmul.f32 %v3943_v25, %v631_v37  ;;  %v671_v36 = vmul.f32 %v3943_v25, %v632_v39  ;;  %v668_v4 = vmul.f32 %v3943_v25, %v4581_v2  ;;  %v669_v38 = vmul.f32 %v3943_v25, %v630_v24 }
 0x391   :  { %v683_v32 = vpack.c.bf16 %v675_v29, %v674_v28  ;;  %v682_v61 = vpack.c.bf16 %v673_v30, %v672_v12  ;;  %v666_v14 = vmul.f32 %v3943_v25, %v4574_v42  ;;  %v667_v43 = vmul.f32 %v3943_v25, %v4578_v54  ;;  %v4621_v2 = vpop.f32.mrf.mxu0 }
 0x392   :  { %v681_v0 = vpack.c.bf16 %v671_v36, %v670_v18  ;;  %v680_v51 = vpack.c.bf16 %v669_v38, %v668_v4  ;;  %v664_v39 = vmul.f32 %v3943_v25, %v4563_v47  ;;  %v665_v27 = vmul.f32 %v3943_v25, %v4567_v52 }
 0x393   :  { %3633 = vmatprep.subr.bf16.mxu1 %v683_v32  ;;  %v679_v37 = vpack.c.bf16 %v667_v43, %v666_v14  ;;  %v662_v3 = vmul.f32 %v3943_v25, %v4556_v9  ;;  %v663_v44 = vmul.f32 %v3943_v25, %v4560_v26  ;;  %v264_v42 = vpop.f32.mrf.mxu0  ;;  %v660_v5 = vmul.f32 %v3943_v25, %v4551_v34 }
 0x394   :  { %3634 = vmatpush3.bf16.msra.mxu1 %v683_v32  ;;  %v678_v24 = vpack.c.bf16 %v665_v27, %v664_v39  ;;  %v661_v22 = vmul.f32 %v3943_v25, %v4548_v31  ;;  %v337_v9 = vadd.f32 %v4591_v17, %v258_v53  ;;  %v339_v26 = vadd.f32 %v4595_v1, %v264_v42  ;;  %v4177_v42 = vld [vmem:[%s5976_s0 + $0x28] sm:$0xff] }
 0x395   :  { %3635 = vmatprep.subr.bf16.mxu1 %v682_v61  ;;  %v677_v54 = vpack.c.bf16 %v663_v44, %v662_v3  ;;  %v4627_v47 = vpop.f32.mrf.mxu0  ;;  %v290_v31 = vpack.c.bf16 %v4570_v11, %v4389_v48  ;;  %v345_v25 = vadd.f32 %v4602_v33, %v4403_v62  ;;  %v343_v28 = vadd.f32 %v4600_v19, %v4399_v60  ;;  %v807_v48 = vpop.trf.xlu1 }
 0x396   :  { %v676_v52 = vpack.c.bf16 %v661_v22, %v660_v5  ;;  %v349_v34 = vpack.c.bf16 %v337_v9, %v335_v8 }
 0x397   :  { %v268_v13 = vpop.f32.mrf.mxu0  ;;  %v353_v29 = vpack.c.bf16 %v345_v25, %v343_v28 }
 0x398   :  { %3636 = vmatpush3.bf16.msra.mxu1 %v682_v61  ;;  %v341_v20 = vadd.f32 %v4598_v6, %v268_v13 }
 0x399   :  { %3637 = vmatprep.subr.bf16.mxu1 %v681_v0  ;;  %v808_v11 = vpop.trf.xlu1 }
 0x39a   :  { %v351_v41 = vpack.c.bf16 %v341_v20, %v339_v26 }
 0x39c   :  { %3638 = vmatpush3.bf16.msra.mxu1 %v681_v0 }
 0x39d   :  { %3639 = vmatprep.subr.bf16.mxu1 %v680_v51  ;;  %v809_v12 = vpop.trf.xlu1 }
 0x3a0   :  { %3640 = vmatpush3.bf16.msra.mxu1 %v680_v51 }
 0x3a1   :  { %3641 = vmatprep.subr.bf16.mxu1 %v679_v37  ;;  %v810_v62 = vpop.trf.xlu1 }
 0x3a4   :  { %3642 = vmatpush3.bf16.msra.mxu1 %v679_v37 }
 0x3a5   :  { %3643 = vmatprep.subr.bf16.mxu1 %v678_v24  ;;  %v811_v33 = vpop.trf.xlu1 }
 0x3a8   :  { %3644 = vmatpush3.bf16.msra.mxu1 %v678_v24 }
 0x3a9   :  { %3645 = vmatprep.subr.bf16.mxu1 %v677_v54 }
 0x3ac   :  { %3646 = vmatpush3.bf16.msra.mxu1 %v677_v54 }
 0x3ad   :  { %3647 = vmatprep.subr.bf16.mxu1 %v676_v52 }
 0x3b0   :  { %3648 = vmatpush3.bf16.msra.mxu1 %v676_v52 }
 0x3b1   :  { %3657 = vmatprep.subr.bf16.mxu1 %v290_v31 }
 0x3b3   :  { %3650 = vmatmul.mubr.bf16.vlgmr.msra.gmra.mxu1 %v349_v34 }
 0x3b4   :  { %3653 = vmatprep.mubr.bf16.mxu1 %v351_v41  ;;  %3658 = vmatpush3.bf16.msra.mxu1 %v290_v31 }
 0x3b5   :  { %3659 = vmatprep.subr.bf16.mxu1 %v4386_v46 }
 0x3b8   :  { %3660 = vmatpush3.bf16.msra.mxu1 %v4386_v46  ;;  %v812_v46 = vpop.trf.xlu1 }
 0x3bb   :  { %3654 = vmatmul.mubr.bf16.gmra.mxu1 %v353_v29 }
 0x3bc   :  { %3661 = vmatprep.mubr.msk.bf16.mxu1 %vm371_vm1, %v805_v45 }
 0x3c3   :  { %3662 = vmatmul.mubr.msk.bf16.vlgmr.msra.gmra.mxu1 %vm371_vm1, %v806_v10 }
 0x3c4   :  { %3665 = vmatprep.mubr.msk.bf16.mxu1 %vm371_vm1, %v807_v48 }
 0x3cb   :  { %3666 = vmatmul.mubr.msk.bf16.gmra.mxu1 %vm371_vm1, %v808_v11 }
 0x3cc   :  { %3669 = vmatprep.mubr.msk.bf16.mxu1 %vm371_vm1, %v809_v12 }
 0x3d3   :  { %3670 = vmatmul.mubr.msk.bf16.gmra.mxu1 %vm371_vm1, %v810_v62 }
 0x3d4   :  { %3673 = vmatprep.mubr.msk.bf16.mxu1 %vm371_vm1, %v811_v33 }
 0x3db   :  { %3674 = vmatmul.mubr.msk.bf16.gmra.mxu1 %vm371_vm1, %v812_v46 }
 0x3dc   :  { %1382 = vmatprep.mubr.bf16.mxu1 %v5980_v7 }
 0x473   :  { %v3651_v60 = vpop.f32.mrf.mxu1 }
 0x474   :  { %v751_v19 = vsub.f32 %v4323_v15, %v3651_v60  ;;  %v4174_v15 = vld [vmem:[%s5976_s0 + $0x30] sm:$0xff] }
 0x475   :  { %v718_v30 = vpop.f32.mrf.mxu1 }
 0x476   :  { %v3495_v32 = vpack.c.bf16 %v751_v19, %v751_v19  ;;  %v749_v61 = vsub.f32 %v4341_v21, %v718_v30 }
 0x477   :  { %v3652_v18 = vpop.f32.mrf.mxu1 }
 0x478   :  { %791 = vst [vmem:[#allocation3 + $0x10] sm:$0xf] %v3495_v32  ;;  %v3493_v36 = vpack.c.bf16 %v749_v61, %v749_v61  ;;  %v752_v63 = vsub.f32 %v4328_v16, %v3652_v18  ;;  %v4175_v16 = vld [vmem:[%s5976_s0 + $0x20] sm:$0xff] }
 0x479   :  { %v721_v0 = vpop.f32.mrf.mxu1 }
 0x47a   :  { %789 = vst [vmem:[#allocation3] sm:$0xf] %v3493_v36  ;;  %v3496_v4 = vpack.c.bf16 %v752_v63, %v752_v63  ;;  %v750_v38 = vsub.f32 %v4346_v23, %v721_v0  ;;  %v4176_v23 = vld [vmem:[%s5976_s0 + $0x38] sm:$0xff] }
 0x47b   :  { %v3655_v51 = vpop.f32.mrf.mxu1 }
 0x47c   :  { %792 = vst [vmem:[#allocation3 + $0x18] sm:$0xf] %v3496_v4  ;;  %v3494_v14 = vpack.c.bf16 %v750_v38, %v750_v38  ;;  %v755_v43 = vsub.f32 %v4174_v15, %v3655_v51 }
 0x47d   :  { %v734_v53 = vpop.f32.mrf.mxu1 }
 0x47e   :  { %790 = vst [vmem:[#allocation3 + $0x8] sm:$0xf] %v3494_v14  ;;  %v3499_v21 = vpack.c.bf16 %v755_v43, %v755_v43  ;;  %v753_v37 = vsub.f32 %v4175_v16, %v734_v53 }
 0x47f   :  { %v3656_v39 = vpop.f32.mrf.mxu1 }
 0x480   :  { %795 = vst [vmem:[#allocation3 + $0x30] sm:$0xf] %v3499_v21  ;;  %v3497_v27 = vpack.c.bf16 %v753_v37, %v753_v37  ;;  %v756_v24 = vsub.f32 %v4176_v23, %v3656_v39 }
 0x481   :  { %v737_v3 = vpop.f32.mrf.mxu1 }
 0x482   :  { %793 = vst [vmem:[#allocation3 + $0x20] sm:$0xf] %v3497_v27  ;;  %v3500_v44 = vpack.c.bf16 %v756_v24, %v756_v24  ;;  %v754_v54 = vsub.f32 %v4177_v42, %v737_v3 }
 0x483   :  { %v3663_v5 = vpop.f32.mrf.mxu1 }
 0x484   :  { %796 = vst [vmem:[#allocation3 + $0x38] sm:$0xf] %v3500_v44  ;;  %v3498_v22 = vpack.c.bf16 %v754_v54, %v754_v54  ;;  %938 = vmax.xlane.f32.xlu0 %v3663_v5 }
 0x485   :  { %v871_v52 = vpop.f32.mrf.mxu1 }
 0x486   :  { %794 = vst [vmem:[#allocation3 + $0x28] sm:$0xf] %v3498_v22 }
 0x487   :  { %v3664_v8 = vpop.f32.mrf.mxu1 }
 0x488   :  { %934 = vmax.xlane.f32.xlu0 %v871_v52  ;;  %940 = vmax.xlane.f32.xlu1 %v3664_v8 }
 0x489   :  { %v874_v9 = vpop.f32.mrf.mxu1 }
 0x48b   :  { %v3667_v13 = vpop.f32.mrf.mxu1 }
 0x48c   :  { %936 = vmax.xlane.f32.xlu0 %v874_v9 }
 0x48d   :  { %v887_v26 = vpop.f32.mrf.mxu1 }
 0x48f   :  { %v3668_v20 = vpop.f32.mrf.mxu1 }
 0x490   :  { %946 = vmax.xlane.f32.xlu0 %v3667_v13 }
 0x491   :  { %v890_v45 = vpop.f32.mrf.mxu1 }
 0x493   :  { %v4666_v31 = vpop.f32.mrf.mxu1 }
 0x494   :  { %942 = vmax.xlane.f32.xlu0 %v887_v26 }
 0x495   :  { %v4668_v34 = vpop.f32.mrf.mxu1 }
 0x497   :  { %v4670_v41 = vpop.f32.mrf.mxu1 }
 0x498   :  { %948 = vmax.xlane.f32.xlu0 %v3668_v20 }
 0x499   :  { %v4672_v10 = vpop.f32.mrf.mxu1 }
 0x49b   :  { %v4674_v25 = vpop.f32.mrf.mxu1 }
 0x49c   :  { %944 = vmax.xlane.f32.xlu0 %v890_v45 }
 0x49d   :  { %v4676_v28 = vpop.f32.mrf.mxu1 }
 0x49f   :  { %v4678_v29 = vpop.f32.mrf.mxu1 }
 0x4a0   :  { %954 = vmax.xlane.f32.xlu0 %v4666_v31 }
 0x4a1   :  { %v4681_v48 = vpop.f32.mrf.mxu1 }
 0x4a2   :  { %960 = vmax.xlane.f32.xlu1 %v4681_v48 }
 0x4a4   :  { %950 = vmax.xlane.f32.xlu0 %v4668_v34 }
 0x4a6   :  { %964 = vmax.xlane.f32.xlu1 %v4678_v29 }
 0x4a8   :  { %952 = vmax.xlane.f32.xlu0 %v4672_v10 }
 0x4ac   :  { %956 = vmax.xlane.f32.xlu0 %v4670_v41 }
 0x4b0   :  { %958 = vmax.xlane.f32.xlu0 %v4676_v28 }
 0x4b4   :  { %962 = vmax.xlane.f32.xlu0 %v4674_v25 }
 0x50d   :  { %v939_v11 = vpop.xlane.xlu0 %938 }
 0x50e   :  { %v968_v12 = vsub.f32 %v3663_v5, %v939_v11 }
 0x510   :  { %v986_v19 = vmul.f32 1.442695, %v968_v12 }
 0x511   :  { %v935_v62 = vpop.xlane.xlu0 %934  ;;  %v941_v46 = vpop.xlane.xlu1 %940 }
 0x512   :  { %v966_v33 = vsub.f32 %v871_v52, %v935_v62  ;;  %v969_v32 = vsub.f32 %v3664_v8, %v941_v46 }
 0x514   :  { %v982_v60 = vmul.f32 1.442695, %v966_v33  ;;  %v988_v63 = vmul.f32 1.442695, %v969_v32 }
 0x515   :  { %v937_v30 = vpop.xlane.xlu0 %936 }
 0x516   :  { %3944 = vpow2.f32 %v982_v60  ;;  %v967_v61 = vsub.f32 %v874_v9, %v937_v30 }
 0x517   :  { %3946 = vpow2.f32 %v986_v19 }
 0x518   :  { %v984_v18 = vmul.f32 1.442695, %v967_v61 }
 0x519   :  { %v947_v36 = vpop.xlane.xlu0 %946 }
 0x51a   :  { %3948 = vpow2.f32 %v984_v18  ;;  %v972_v4 = vsub.f32 %v3667_v13, %v947_v36 }
 0x51b   :  { %3950 = vpow2.f32 %v988_v63 }
 0x51c   :  { %v994_v15 = vmul.f32 1.442695, %v972_v4 }
 0x51d   :  { %v943_v0 = vpop.xlane.xlu0 %942 }
 0x51e   :  { %v970_v38 = vsub.f32 %v887_v26, %v943_v0 }
 0x520   :  { %v990_v51 = vmul.f32 1.442695, %v970_v38 }
 0x521   :  { %v949_v14 = vpop.xlane.xlu0 %948 }
 0x522   :  { %3952 = vpow2.f32 %v990_v51  ;;  %v973_v16 = vsub.f32 %v3668_v20, %v949_v14 }
 0x523   :  { %v4690_v43 = vpop.eup %3944  ;;  %3954 = vpow2.f32 %v994_v15 }
 0x524   :  { %1014 = vadd.xlane.f32.xlu0 %v4690_v43  ;;  %v4693_v21 = vpop.eup %3946  ;;  %v996_v24 = vmul.f32 1.442695, %v973_v16 }
 0x525   :  { %v945_v53 = vpop.xlane.xlu0 %944 }
 0x526   :  { %v971_v37 = vsub.f32 %v890_v45, %v945_v53 }
 0x527   :  { %v4695_v39 = vpop.eup %3948 }
 0x528   :  { %v992_v27 = vmul.f32 1.442695, %v971_v37  ;;  %1018 = vadd.xlane.f32.xlu0 %v4693_v21  ;;  %1016 = vadd.xlane.f32.xlu1 %v4695_v39  ;;  %v4699_v3 = vpop.eup %3950 }
 0x529   :  { %v955_v23 = vpop.xlane.xlu0 %954 }
 0x52a   :  { %3956 = vpow2.f32 %v992_v27  ;;  %v976_v44 = vsub.f32 %v4666_v31, %v955_v23 }
 0x52b   :  { %3958 = vpow2.f32 %v996_v24  ;;  %v961_v22 = vpop.xlane.xlu1 %960 }
 0x52c   :  { %1020 = vadd.xlane.f32.xlu1 %v4699_v3  ;;  %v1002_v8 = vmul.f32 1.442695, %v976_v44  ;;  %v979_v45 = vsub.f32 %v4681_v48, %v961_v22 }
 0x52d   :  { %v951_v42 = vpop.xlane.xlu0 %950 }
 0x52e   :  { %v974_v54 = vsub.f32 %v4668_v34, %v951_v42  ;;  %v1008_v33 = vmul.f32 1.442695, %v979_v45 }
 0x52f   :  { %v4704_v5 = vpop.eup %3952  ;;  %v965_v34 = vpop.xlane.xlu1 %964 }
 0x530   :  { %v998_v52 = vmul.f32 1.442695, %v974_v54  ;;  %1022 = vadd.xlane.f32.xlu0 %v4704_v5  ;;  %v4708_v26 = vpop.eup %3954 }
 0x531   :  { %v953_v9 = vpop.xlane.xlu0 %952 }
 0x532   :  { %3960 = vpow2.f32 %v998_v52  ;;  %v975_v13 = vsub.f32 %v4672_v10, %v953_v9  ;;  %v981_v10 = vsub.f32 %v4678_v29, %v965_v34 }
 0x533   :  { %3962 = vpow2.f32 %v1002_v8 }
 0x534   :  { %v1000_v20 = vmul.f32 1.442695, %v975_v13  ;;  %1026 = vadd.xlane.f32.xlu0 %v4708_v26  ;;  %v1012_v30 = vmul.f32 1.442695, %v981_v10 }
 0x535   :  { %v957_v31 = vpop.xlane.xlu0 %956 }
 0x536   :  { %3964 = vpow2.f32 %v1000_v20  ;;  %v977_v11 = vsub.f32 %v4670_v41, %v957_v31 }
 0x537   :  { %v4713_v12 = vpop.eup %3956 }
 0x538   :  { %v1004_v62 = vmul.f32 1.442695, %v977_v11  ;;  %1024 = vadd.xlane.f32.xlu1 %v4713_v12  ;;  %v4718_v19 = vpop.eup %3958 }
 0x539   :  { %v959_v46 = vpop.xlane.xlu0 %958 }
 0x53a   :  { %3966 = vpow2.f32 %v1004_v62  ;;  %v978_v60 = vsub.f32 %v4676_v28, %v959_v46 }
 0x53b   :  { %3968 = vpow2.f32 %v1008_v33 }
 0x53c   :  { %v1006_v48 = vmul.f32 1.442695, %v978_v60  ;;  %1028 = vadd.xlane.f32.xlu1 %v4718_v19 }
 0x53d   :  { %v963_v41 = vpop.xlane.xlu0 %962 }
 0x53e   :  { %3970 = vpow2.f32 %v1006_v48  ;;  %v980_v32 = vsub.f32 %v4674_v25, %v963_v41 }
 0x53f   :  { %v4722_v61 = vpop.eup %3960  ;;  %3972 = vpow2.f32 %v1012_v30 }
 0x540   :  { %v1010_v18 = vmul.f32 1.442695, %v980_v32  ;;  %1030 = vadd.xlane.f32.xlu0 %v4722_v61  ;;  %v4725_v29 = vpop.eup %3962 }
 0x542   :  { %3974 = vpow2.f32 %v1010_v18 }
 0x543   :  { %v4727_v28 = vpop.eup %3964 }
 0x544   :  { %1034 = vadd.xlane.f32.xlu0 %v4725_v29  ;;  %1032 = vadd.xlane.f32.xlu1 %v4727_v28 }
 0x547   :  { %v4731_v36 = vpop.eup %3966 }
 0x548   :  { %1036 = vadd.xlane.f32.xlu1 %v4731_v36  ;;  %v4734_v25 = vpop.eup %3968 }
 0x54b   :  { %v4736_v63 = vpop.eup %3970 }
 0x54c   :  { %1038 = vadd.xlane.f32.xlu0 %v4736_v63  ;;  %1040 = vadd.xlane.f32.xlu1 %v4734_v25  ;;  %v4740_v0 = vpop.eup %3972 }
 0x54f   :  { %v4742_v4 = vpop.eup %3974 }
 0x550   :  { %1042 = vadd.xlane.f32.xlu0 %v4742_v4  ;;  %1044 = vadd.xlane.f32.xlu1 %v4740_v0 }
 0x5ad   :  { %v1015_v38 = vpop.xlane.xlu0 %1014 }
 0x5b1   :  { %v1017_v51 = vpop.xlane.xlu1 %1016  ;;  %v1019_v14 = vpop.xlane.xlu0 %1018 }
 0x5b2   :  { %3976 = vrcp.f32 %v1017_v51 }
 0x5b3   :  { %3978 = vrcp.f32 %v1015_v38 }
 0x5b4   :  { %3980 = vrcp.f32 %v1019_v14 }
 0x5b5   :  { %v1021_v15 = vpop.xlane.xlu1 %1020 }
 0x5b6   :  { %3982 = vrcp.f32 %v1021_v15 }
 0x5b9   :  { %v1023_v53 = vpop.xlane.xlu0 %1022 }
 0x5ba   :  { %3984 = vrcp.f32 %v1023_v53 }
 0x5bd   :  { %v1027_v23 = vpop.xlane.xlu0 %1026 }
 0x5bf   :  { %v3977_v16 = vpop.eup %3976 }
 0x5c0   :  { %v3979_v27 = vpop.eup %3978  ;;  %v4747_v24 = vmul.f32 %v3977_v16, %v4695_v39 }
 0x5c1   :  { %v1025_v37 = vpop.xlane.xlu1 %1024  ;;  %v4750_v44 = vmul.f32 %v3979_v27, %v4690_v43  ;;  %v3981_v54 = vpop.eup %3980 }
 0x5c2   :  { %3986 = vrcp.f32 %v1025_v37  ;;  %v4755_v8 = vmul.f32 %v3981_v54, %v4693_v21 }
 0x5c3   :  { %3988 = vrcp.f32 %v1027_v23  ;;  %v1078_v22 = vadd.f32 %v4747_v24, %v4750_v44  ;;  %v3983_v52 = vpop.eup %3982 }
 0x5c4   :  { %v4759_v20 = vmul.f32 %v3983_v52, %v4699_v3 }
 0x5c5   :  { %v1029_v42 = vpop.xlane.xlu1 %1028  ;;  %v1079_v39 = vadd.f32 %v1078_v22, %v4755_v8 }
 0x5c6   :  { %3990 = vrcp.f32 %v1029_v42 }
 0x5c7   :  { %v3985_v13 = vpop.eup %3984  ;;  %v1080_v11 = vadd.f32 %v1079_v39, %v4759_v20 }
 0x5c8   :  { %v4762_v43 = vmul.f32 %v3985_v13, %v4704_v5 }
 0x5c9   :  { %v1031_v9 = vpop.xlane.xlu0 %1030 }
 0x5ca   :  { %3992 = vrcp.f32 %v1031_v9  ;;  %v1081_v62 = vadd.f32 %v1080_v11, %v4762_v43 }
 0x5cd   :  { %v1035_v45 = vpop.xlane.xlu0 %1034  ;;  %v1033_v31 = vpop.xlane.xlu1 %1032 }
 0x5ce   :  { %3994 = vrcp.f32 %v1035_v45 }
 0x5cf   :  { %v3987_v34 = vpop.eup %3986  ;;  %3996 = vrcp.f32 %v1033_v31 }
 0x5d0   :  { %v4766_v21 = vmul.f32 %v3987_v34, %v4713_v12  ;;  %v3989_v10 = vpop.eup %3988 }
 0x5d1   :  { %v1037_v33 = vpop.xlane.xlu1 %1036  ;;  %v1068_v5 = vmul.f32 %v3989_v10, %v4708_v26 }
 0x5d2   :  { %3998 = vrcp.f32 %v1037_v33  ;;  %v1082_v3 = vadd.f32 %v1081_v62, %v4766_v21 }
 0x5d3   :  { %v3991_v46 = vpop.eup %3990 }
 0x5d4   :  { %v1083_v41 = vadd.f32 %v1082_v3, %v1068_v5  ;;  %v1069_v32 = vmul.f32 %v3991_v46, %v4718_v19 }
 0x5d5   :  { %v1039_v60 = vpop.xlane.xlu0 %1038  ;;  %v1041_v48 = vpop.xlane.xlu1 %1040 }
 0x5d6   :  { %4000 = vrcp.f32 %v1039_v60  ;;  %v1084_v14 = vadd.f32 %v1083_v41, %v1069_v32 }
 0x5d7   :  { %v3993_v30 = vpop.eup %3992  ;;  %4002 = vrcp.f32 %v1041_v48 }
 0x5d8   :  { %v1070_v12 = vmul.f32 %v3993_v30, %v4722_v61 }
 0x5d9   :  { %v1043_v18 = vpop.xlane.xlu0 %1042  ;;  %v1045_v38 = vpop.xlane.xlu1 %1044 }
 0x5da   :  { %4004 = vrcp.f32 %v1043_v18  ;;  %v1085_v53 = vadd.f32 %v1084_v14, %v1070_v12 }
 0x5db   :  { %v3995_v51 = vpop.eup %3994  ;;  %4006 = vrcp.f32 %v1045_v38 }
 0x5dc   :  { %v3997_v15 = vpop.eup %3996  ;;  %v1072_v37 = vmul.f32 %v3995_v51, %v4725_v29 }
 0x5dd   :  { %v1071_v26 = vmul.f32 %v3997_v15, %v4727_v28 }
 0x5df   :  { %v3999_v16 = vpop.eup %3998  ;;  %v1086_v27 = vadd.f32 %v1085_v53, %v1071_v26 }
 0x5e0   :  { %v1073_v23 = vmul.f32 %v3999_v16, %v4731_v36 }
 0x5e1   :  { %v1087_v19 = vadd.f32 %v1086_v27, %v1072_v37 }
 0x5e3   :  { %v4001_v42 = vpop.eup %4000  ;;  %v1088_v22 = vadd.f32 %v1087_v19, %v1073_v23 }
 0x5e4   :  { %v4003_v54 = vpop.eup %4002  ;;  %v1074_v61 = vmul.f32 %v4001_v42, %v4736_v63 }
 0x5e5   :  { %v1075_v52 = vmul.f32 %v4003_v54, %v4734_v25  ;;  %v270_v54 = vpop.f32.mrf.mxu0 }
 0x5e6   :  { %v1089_v9 = vadd.f32 %v1088_v22, %v1074_v61  ;;  %v4840_v22 = vld [vmem:[%s5976_s0 + $0x58] sm:$0xff] }
 0x5e7   :  { %v4005_v13 = vpop.eup %4004 }
 0x5e8   :  { %v4007_v39 = vpop.eup %4006  ;;  %v1076_v45 = vmul.f32 %v4005_v13, %v4742_v4  ;;  %v1090_v28 = vadd.f32 %v1089_v9, %v1075_v52 }
 0x5e9   :  { %v1077_v31 = vmul.f32 %v4007_v39, %v4740_v0  ;;  %v4846_v39 = vld [vmem:[%s5976_s0 + $0x48] sm:$0xff] }
 0x5ea   :  { %v1091_v29 = vadd.f32 %v1090_v28, %v1076_v45 }
 0x5ec   :  { %v1092_v34 = vadd.f32 %v1091_v29, %v1077_v31  ;;  %v4852_v29 = vld [vmem:[%s5976_s0 + $0x70] sm:$0xff] }
 0x5ee   :  { %v1093_v11 = vrot.slane %v1092_v34, 4 }
 0x5f0   :  { %v1094_v36 = vadd.f32 %v1093_v11, %v1092_v34 }
 0x5f2   :  { %v1095_v62 = vrot.slane %v1094_v36, 2 }
 0x5f4   :  { %v1096_v33 = vadd.f32 %v1095_v62, %v1094_v36  ;;  %v4858_v62 = vld [vmem:[%s5976_s0 + $0x60] sm:$0xff] }
 0x5f6   :  { %v1097_v10 = vrot.slane %v1096_v33, 1 }
 0x5f8   :  { %v1098_v3 = vadd.f32 %v1097_v10, %v1096_v33 }
 0x5fa   :  { %v1099_v63 = vadd.f32 1e-09, %v1098_v3 }
 0x5fc   :  { %4008 = vrcp.f32 %v1099_v63  ;;  %v4864_v63 = vld [vmem:[%s5976_s0 + $0x78] sm:$0xff] }
 0x609   :  { %v4009_v46 = vpop.eup %4008 }
 0x60a   :  { %v1115_v25 = vmul.f32 %v4009_v46, %v1076_v45  ;;  %v1116_v60 = vmul.f32 %v4009_v46, %v1077_v31  ;;  %v1113_v48 = vmul.f32 %v4009_v46, %v1074_v61  ;;  %v1114_v30 = vmul.f32 %v4009_v46, %v1075_v52 }
 0x60b   :  { %v1111_v18 = vmul.f32 %v4009_v46, %v1072_v37  ;;  %v1112_v0 = vmul.f32 %v4009_v46, %v1073_v23  ;;  %v1109_v51 = vmul.f32 %v4009_v46, %v1070_v12  ;;  %v1110_v14 = vmul.f32 %v4009_v46, %v1071_v26 }
 0x60c   :  { %v1124_v41 = vpack.c.bf16 %v1116_v60, %v1115_v25  ;;  %v1123_v4 = vpack.c.bf16 %v1114_v30, %v1113_v48  ;;  %v1107_v53 = vmul.f32 %v4009_v46, %v1068_v5  ;;  %v1108_v16 = vmul.f32 %v4009_v46, %v1069_v32  ;;  %v4870_v48 = vld [vmem:[%s5976_s0 + $0x68] sm:$0xff] }
 0x60d   :  { %v1122_v38 = vpack.c.bf16 %v1112_v0, %v1111_v18  ;;  %v1121_v15 = vpack.c.bf16 %v1110_v14, %v1109_v51  ;;  %v1105_v19 = vmul.f32 %v4009_v46, %v4762_v43  ;;  %v1106_v42 = vmul.f32 %v4009_v46, %v4766_v21  ;;  %v3840_v18 = vld [vmem:[#allocation3 + $0x30] ss:$8 sps:$4 sm:$0xff]  }
 0x60e   :  { %3677 = vmatprep.subr.bf16.mxu0 %v1124_v41  ;;  %v1120_v27 = vpack.c.bf16 %v1108_v16, %v1107_v53  ;;  %v1103_v23 = vmul.f32 %v4009_v46, %v4755_v8  ;;  %v1104_v12 = vmul.f32 %v4009_v46, %v4759_v20  ;;  %v1101_v5 = vmul.f32 %v4009_v46, %v4750_v44  ;;  %v3846_v14 = vld [vmem:[#allocation3 + $0x10] ss:$8 sps:$4 sm:$0xff]   ;;  %v3849_v53 = vld [vmem:[#allocation3] ss:$8 sps:$4 sm:$0xff]  }
 0x60f   :  { %3678 = vmatpush3.bf16.msra.mxu0 %v1124_v41  ;;  %v1119_v37 = vpack.c.bf16 %v1106_v42, %v1105_v19  ;;  %v1102_v32 = vmul.f32 %v4009_v46, %v4747_v24  ;;  %v336_v21 = vadd.f32 %v4588_v56, %v4615_v50  ;;  %v338_v8 = vadd.f32 %v4591_v17, %v4621_v2  ;;  %v4804_v17 = vld [vmem:[%s5978_s2 + $0x10] sm:$0xff]  ;;  %v3850_v16 = vld [vmem:[%s5977_s1 + $0x40] sm:$0xff]   ;;  %v3853_v42 = vld [vmem:[%s5977_s1 + $0x58] sm:$0xff]  }
 0x610   :  { %3679 = vmatprep.subr.bf16.mxu0 %v1123_v4  ;;  %v1118_v26 = vpack.c.bf16 %v1104_v12, %v1103_v23  ;;  %v340_v20 = vadd.f32 %v4595_v1, %v4627_v47  ;;  %v342_v61 = vadd.f32 %v4598_v6, %v270_v54  ;;  %v4257_v56 = vmov 1   ;;  %v4810_v1 = vld [vmem:[%s5978_s2 + $0x18] sm:$0xff]  ;;  %v3852_v19 = vld [vmem:[%s5977_s1 + $0x50] sm:$0xff]  }
 0x611   :  { %v1117_v43 = vpack.c.bf16 %v1102_v32, %v1101_v5  ;;  %v350_v44 = vpack.c.bf16 %v338_v8, %v336_v21  ;;  %3811 = vset.pattern.permute.xlu1 %v4257_v56  ;;  %3810 = vset.pattern.permute.xlu0 %v4257_v56 }
 0x612   :  { %v352_v24 = vpack.c.bf16 %v342_v61, %v340_v20  ;;  %1275 = vperm.xlu1 %3811, %v4538_v59   ;;  %1271 = vperm.xlu0 %3810, %v4532_v58   ;;  %v4828_v59 = vld [vmem:[%s5976_s0 + $0x50] sm:$0xff] }
 0x613   :  { %3680 = vmatpush3.bf16.msra.mxu0 %v1123_v4 }
 0x614   :  { %3681 = vmatprep.subr.bf16.mxu0 %v1122_v38 }
 0x616   :  { %1263 = vperm.xlu1 %3811, %v4520_v55   ;;  %v4816_v55 = vld [vmem:[%s5978_s2] sm:$0xff] }
 0x617   :  { %3682 = vmatpush3.bf16.msra.mxu0 %v1122_v38  ;;  %v3843_v38 = vld [vmem:[#allocation3 + $0x20] ss:$8 sps:$4 sm:$0xff]  }
 0x618   :  { %3683 = vmatprep.subr.bf16.mxu0 %v1121_v15 }
 0x61a   :  { %1267 = vperm.xlu1 %3811, %v4526_v57   ;;  %v4822_v57 = vld [vmem:[%s5978_s2 + $0x8] sm:$0xff] }
 0x61b   :  { %3684 = vmatpush3.bf16.msra.mxu0 %v1121_v15 }
 0x61c   :  { %3685 = vmatprep.subr.bf16.mxu0 %v1120_v27 }
 0x61e   :  { %1255 = vperm.xlu1 %3811, %v4804_v17  }
 0x61f   :  { %3686 = vmatpush3.bf16.msra.mxu0 %v1120_v27  ;;  %v3851_v27 = vld [vmem:[%s5977_s1 + $0x48] sm:$0xff]  }
 0x620   :  { %3687 = vmatprep.subr.bf16.mxu0 %v1119_v37 }
 0x622   :  { %1259 = vperm.xlu1 %3811, %v4810_v1  }
 0x623   :  { %3688 = vmatpush3.bf16.msra.mxu0 %v1119_v37 }
 0x624   :  { %3689 = vmatprep.subr.bf16.mxu0 %v1118_v26 }
 0x626   :  { %1247 = vperm.xlu1 %3811, %v4816_v55  }
 0x627   :  { %3690 = vmatpush3.bf16.msra.mxu0 %v1118_v26 }
 0x628   :  { %3691 = vmatprep.subr.bf16.mxu0 %v1117_v43 }
 0x62a   :  { %1251 = vperm.xlu1 %3811, %v4822_v57  }
 0x62b   :  { %3692 = vmatpush3.bf16.msra.mxu0 %v1117_v43 }
 0x62e   :  { %3694 = vmatmul.mubr.bf16.vlgmr.msra.gmra.mxu0 %v350_v44 }
 0x62f   :  { %3697 = vmatprep.mubr.bf16.mxu0 %v352_v24 }
 0x636   :  { %3698 = vmatmul.mubr.bf16.gmra.mxu0 %v354_v40  ;;  %v4834_v40 = vld [vmem:[%s5976_s0 + $0x40] sm:$0xff] }
 0x637   :  { %1824 = vmatprep.mubr.bf16.mxu0 %v5980_v7 }
 0x68d   :  { %v1276_v5 = vpop.permute.xlu1 %1275 }
 0x691   :  { %v1264_v21 = vpop.permute.xlu1 %1263 }
 0x695   :  { %v1268_v56 = vpop.permute.xlu1 %1267 }
 0x6ee   :  { %v3695_v58 = vpop.f32.mrf.mxu0 }
 0x6ef   :  { %v1192_v6 = vsub.f32 %v4828_v59, %v3695_v58 }
 0x6f0   :  { %v1159_v49 = vpop.f32.mrf.mxu0 }
 0x6f1   :  { %v3503_v35 = vpack.c.bf16 %v1192_v6, %v1192_v6  ;;  %v1190_v50 = vsub.f32 %v4834_v40, %v1159_v49 }
 0x6f2   :  { %v3696_v2 = vpop.f32.mrf.mxu0 }
 0x6f3   :  { %1232 = vst [vmem:[#allocation3 + $0x14] sm:$0xf] %v3503_v35  ;;  %v3501_v47 = vpack.c.bf16 %v1190_v50, %v1190_v50  ;;  %v1193_v52 = vsub.f32 %v4840_v22, %v3696_v2  ;;  %v1272_v50 = vpop.permute.xlu0 %1271 }
 0x6f4   :  { %v1162_v9 = vpop.f32.mrf.mxu0 }
 0x6f5   :  { %1230 = vst [vmem:[#allocation3 + $0x4] sm:$0xf] %v3501_v47  ;;  %v3504_v13 = vpack.c.bf16 %v1193_v52, %v1193_v52  ;;  %v1191_v45 = vsub.f32 %v4846_v39, %v1162_v9 }
 0x6f6   :  { %v3699_v28 = vpop.f32.mrf.mxu0 }
 0x6f7   :  { %1233 = vst [vmem:[#allocation3 + $0x1c] sm:$0xf] %v3504_v13  ;;  %v3502_v31 = vpack.c.bf16 %v1191_v45, %v1191_v45  ;;  %v1196_v34 = vsub.f32 %v4852_v29, %v3699_v28 }
 0x6f8   :  { %v1175_v11 = vpop.f32.mrf.mxu0 }
 0x6f9   :  { %1231 = vst [vmem:[#allocation3 + $0xc] sm:$0xf] %v3502_v31  ;;  %v3507_v36 = vpack.c.bf16 %v1196_v34, %v1196_v34  ;;  %v1194_v33 = vsub.f32 %v4858_v62, %v1175_v11  ;;  %v1256_v34 = vpop.permute.xlu1 %1255 }
 0x6fa   :  { %v3700_v10 = vpop.f32.mrf.mxu0 }
 0x6fb   :  { %1236 = vst [vmem:[#allocation3 + $0x34] sm:$0xf] %v3507_v36  ;;  %v3505_v3 = vpack.c.bf16 %v1194_v33, %v1194_v33  ;;  %v1197_v46 = vsub.f32 %v4864_v63, %v3700_v10 }
 0x6fc   :  { %v1178_v25 = vpop.f32.mrf.mxu0 }
 0x6fd   :  { %1234 = vst [vmem:[#allocation3 + $0x24] sm:$0xf] %v3505_v3  ;;  %v3508_v60 = vpack.c.bf16 %v1197_v46, %v1197_v46  ;;  %v1195_v30 = vsub.f32 %v4870_v48, %v1178_v25 }
 0x6fe   :  { %v3844_v51 = vld [vmem:[#allocation3 + $0x14] ss:$8 sps:$4 sm:$0xff]  }
 0x6ff   :  { %1237 = vst [vmem:[#allocation3 + $0x3c] sm:$0xf] %v3508_v60  ;;  %v3506_v41 = vpack.c.bf16 %v1195_v30, %v1195_v30 }
 0x700   :  { %v3847_v15 = vld [vmem:[#allocation3 + $0x4] ss:$8 sps:$4 sm:$0xff]  }
 0x701   :  { %1235 = vst [vmem:[#allocation3 + $0x2c] sm:$0xf] %v3506_v41 }
 0x706   :  { %v3838_v4 = vld [vmem:[#allocation3 + $0x34] ss:$8 sps:$4 sm:$0xff]  }
 0x707   :  { %1358 = vmatprep.subr.bf16.mxu1 %v3838_v4  ;;  %v1260_v4 = vpop.permute.xlu1 %1259 }
 0x708   :  { %v3841_v0 = vld [vmem:[#allocation3 + $0x24] ss:$8 sps:$4 sm:$0xff]   ;;  %1359 = vmatpush1.bf16.msra.mxu1 %v3840_v18 }
 0x709   :  { %1360 = vmatprep.subr.bf16.mxu1 %v3841_v0 }
 0x70c   :  { %1361 = vmatpush1.bf16.msra.mxu1 %v3843_v38 }
 0x70d   :  { %1362 = vmatprep.subr.bf16.mxu1 %v3844_v51 }
 0x710   :  { %1363 = vmatpush1.bf16.msra.mxu1 %v3846_v14 }
 0x711   :  { %1364 = vmatprep.subr.bf16.mxu1 %v3847_v15 }
 0x714   :  { %1365 = vmatpush1.bf16.msra.mxu1 %v3849_v53 }
 0x717   :  { %3425 = vmatmul.mubr.msk.bf16.vlgmr.msra.gmra.mxu1 %vm145_vm0, %v3850_v16 }
 0x718   :  { %1392 = vmatprep.mubr.bf16.mxu1 %v5980_v7 }
 0x71f   :  { %3426 = vmatmul.mubr.msk.bf16.gmra.mxu1 %vm145_vm0, %v3851_v27 }
 0x720   :  { %1402 = vmatprep.mubr.bf16.mxu1 %v5980_v7 }
 0x727   :  { %3427 = vmatmul.mubr.msk.bf16.gmra.mxu1 %vm145_vm0, %v3852_v19  ;;  %v1248_v19 = vpop.permute.xlu1 %1247 }
 0x728   :  { %1412 = vmatprep.mubr.bf16.mxu1 %v5980_v7 }
 0x72f   :  { %3428 = vmatmul.mubr.msk.bf16.gmra.mxu1 %vm145_vm0, %v3853_v42 }
 0x7d7   :  { %v4892_v37 = vpop.f32.mrf.mxu1 }
 0x7d9   :  { %v4894_v23 = vpop.f32.mrf.mxu1 }
 0x7db   :  { %v4896_v12 = vpop.f32.mrf.mxu1 }
 0x7dd   :  { %v4898_v26 = vpop.f32.mrf.mxu1 }
 0x7df   :  { %v1394_v32 = vpop.f32.mrf.mxu1 }
 0x7e0   :  { %v4942_v53 = vadd.f32 %v1394_v32, %v1256_v34 }
 0x7e1   :  { %v1396_v54 = vpop.f32.mrf.mxu1 }
 0x7e2   :  { %v4936_v51 = vadd.f32 %v1396_v54, %v1256_v34  ;;  %v4259_v34 = vmov 2  }
 0x7e3   :  { %v1398_v43 = vpop.f32.mrf.mxu1  ;;  %3814 = vset.pattern.permute.xlu0 %v4259_v34 }
 0x7e4   :  { %v4938_v14 = vadd.f32 %v1398_v43, %v1260_v4  ;;  %v1461_v54 = vmul.f32 %v4936_v51, %v4936_v51 }
 0x7e5   :  { %v1400_v8 = vpop.f32.mrf.mxu1 }
 0x7e6   :  { %v4930_v18 = vadd.f32 %v1400_v8, %v1260_v4  ;;  %v4959_v8 = vadd.f32 %v4894_v23, %v1248_v19 }
 0x7e7   :  { %v1404_v20 = vpop.f32.mrf.mxu1 }
 0x7e8   :  { %v4900_v44 = vadd.f32 %v1404_v20, %v1264_v21  ;;  %v1432_v27 = vadd.f32 %v4930_v18, %v4938_v14  ;;  %v1463_v32 = vmul.f32 %v4930_v18, %v4930_v18  ;;  %v1462_v20 = vmul.f32 %v4938_v14, %v4938_v14 }
 0x7e9   :  { %v1406_v61 = vpop.f32.mrf.mxu1 }
 0x7ea   :  { %v4902_v24 = vadd.f32 %v1406_v61, %v1264_v21  ;;  %v1464_v52 = vmul.f32 %v4900_v44, %v4900_v44  ;;  %v1460_v21 = vmul.f32 %v4942_v53, %v4942_v53 }
 0x7eb   :  { %v1408_v58 = vpop.f32.mrf.mxu1 }
 0x7ec   :  { %v1435_v6 = vadd.f32 %v4902_v24, %v4900_v44  ;;  %v1465_v49 = vmul.f32 %v4902_v24, %v4902_v24  ;;  %v4908_v2 = vadd.f32 %v1408_v58, %v1268_v56  ;;  %v1478_v61 = vadd.f32 %v1461_v54, %v1460_v21 }
 0x7ed   :  { %v1410_v35 = vpop.f32.mrf.mxu1  ;;  %v4964_v58 = vadd.f32 %v4892_v37, %v1248_v19 }
 0x7ee   :  { %v4910_v47 = vadd.f32 %v1410_v35, %v1268_v56  ;;  %1436 = vadd.xlane.f32.xlu0 %v1435_v6  ;;  %v1484_v31 = vadd.f32 %v1465_v49, %v1464_v52  ;;  %v1466_v36 = vmul.f32 %v4908_v2, %v4908_v2  ;;  %v1252_v56 = vpop.permute.xlu1 %1251  ;;  %v1481_v49 = vadd.f32 %v1463_v32, %v1462_v20 }
 0x7ef   :  { %v1414_v9 = vpop.f32.mrf.mxu1  ;;  %v4967_v6 = vadd.f32 %v4898_v26, %v1252_v56  ;;  %v4970_v35 = vadd.f32 %v4896_v12, %v1252_v56  ;;  %v1423_v23 = vadd.f32 %v4959_v8, %v4964_v58  ;;  %v1456_v26 = vmul.f32 %v4964_v58, %v4964_v58 }
 0x7f0   :  { %v1467_v13 = vmul.f32 %v4910_v47, %v4910_v47  ;;  %v4916_v45 = vadd.f32 %v1414_v9, %v1272_v50  ;;  %v1438_v28 = vadd.f32 %v4910_v47, %v4908_v2 }
 0x7f1   :  { %v1416_v11 = vpop.f32.mrf.mxu1  ;;  %v1426_v37 = vadd.f32 %v4967_v6, %v4970_v35  ;;  %v1459_v52 = vmul.f32 %v4967_v6, %v4967_v6  ;;  %v1458_v9 = vmul.f32 %v4970_v35, %v4970_v35 }
 0x7f2   :  { %v4922_v33 = vadd.f32 %v1416_v11, %v1272_v50  ;;  %1439 = vadd.xlane.f32.xlu1 %v1438_v28  ;;  %1485 = vadd.xlane.f32.xlu0 %v1484_v31  ;;  %v1468_v10 = vmul.f32 %v4916_v45, %v4916_v45  ;;  %v1487_v46 = vadd.f32 %v1467_v13, %v1466_v36  ;;  %v4258_v28 = vmov 3   ;;  %v4988_v31 = vld [vmem:[%s5978_s2 + $0x30] sm:$0xff]  ;;  %v4995_v11 = vld [vmem:[%s5978_s2 + $0x38] sm:$0xff]  ;;  %v5001_v36 = vld [vmem:[%s5978_s2 + $0x20] sm:$0xff] }
 0x7f3   :  { %v1418_v3 = vpop.f32.mrf.mxu1  ;;  %v1457_v50 = vmul.f32 %v4959_v8, %v4959_v8  ;;  %v1475_v13 = vadd.f32 %v1459_v52, %v1458_v9  ;;  %3812 = vset.pattern.permute.xlu1 %v4258_v28 }
 0x7f4   :  { %v1469_v25 = vmul.f32 %v4922_v33, %v4922_v33  ;;  %v4932_v0 = vadd.f32 %v1418_v3, %v1276_v5  ;;  %v1441_v38 = vadd.f32 %v4922_v33, %v4916_v45 }
 0x7f5   :  { %v1420_v60 = vpop.f32.mrf.mxu1  ;;  %v1472_v12 = vadd.f32 %v1457_v50, %v1456_v26 }
 0x7f6   :  { %v4928_v30 = vadd.f32 %v1420_v60, %v1276_v5  ;;  %1488 = vadd.xlane.f32.xlu1 %v1487_v46  ;;  %v1490_v41 = vadd.f32 %v1469_v25, %v1468_v10  ;;  %v1470_v42 = vmul.f32 %v4932_v0, %v4932_v0  ;;  %v1429_v5 = vadd.f32 %v4936_v51, %v4942_v53  ;;  %v5007_v10 = vld [vmem:[%s5978_s2 + $0x28] sm:$0xff] }
 0x7f8   :  { %1491 = vadd.xlane.f32.xlu0 %v1490_v41  ;;  %v1444_v15 = vadd.f32 %v4928_v30, %v4932_v0  ;;  %v1471_v16 = vmul.f32 %v4928_v30, %v4928_v30 }
 0x7fa   :  { %1442 = vadd.xlane.f32.xlu1 %v1441_v38  ;;  %v1493_v43 = vadd.f32 %v1471_v16, %v1470_v42 }
 0x7fc   :  { %1445 = vadd.xlane.f32.xlu0 %v1444_v15 }
 0x7fe   :  { %1433 = vadd.xlane.f32.xlu1 %v1432_v27 }
 0x800   :  { %1430 = vadd.xlane.f32.xlu0 %v1429_v5 }
 0x802   :  { %1494 = vadd.xlane.f32.xlu1 %v1493_v43 }
 0x804   :  { %1479 = vadd.xlane.f32.xlu0 %v1478_v61 }
 0x806   :  { %1482 = vadd.xlane.f32.xlu1 %v1481_v49 }
 0x808   :  { %1424 = vadd.xlane.f32.xlu0 %v1423_v23 }
 0x80a   :  { %1427 = vadd.xlane.f32.xlu1 %v1426_v37 }
 0x80c   :  { %1473 = vadd.xlane.f32.xlu0 %v1472_v12 }
 0x80e   :  { %1476 = vadd.xlane.f32.xlu1 %v1475_v13 }
 0x81f   :  { %1641 = vperm.xlu1 %3812, %v4988_v31  }
 0x823   :  { %1645 = vperm.xlu1 %3812, %v4995_v11  }
 0x827   :  { %1633 = vperm.xlu1 %3812, %v5001_v36  }
 0x82b   :  { %1637 = vperm.xlu1 %3812, %v5007_v10  }
 0x82f   :  { %3813 = vset.pattern.permute.xlu1 %v4259_v34 }
 0x877   :  { %v1437_v3 = vpop.xlane.xlu0 %1436 }
 0x878   :  { %v5015_v5 = vmul.f32 0.00390625, %v1437_v3 }
 0x87a   :  { %v1508_v49 = vmul.f32 %v5015_v5, %v5015_v5 }
 0x87b   :  { %v1440_v46 = vpop.xlane.xlu1 %1439  ;;  %v1486_v25 = vpop.xlane.xlu0 %1485 }
 0x87c   :  { %v1500_v21 = vmul.f32 0.00390625, %v1486_v25  ;;  %v5021_v56 = vmul.f32 0.00390625, %v1440_v46 }
 0x87e   :  { %v1516_v26 = vsub.f32 %v1500_v21, %v1508_v49  ;;  %v1509_v46 = vmul.f32 %v5021_v56, %v5021_v56 }
 0x87f   :  { %v1489_v60 = vpop.xlane.xlu1 %1488 }
 0x880   :  { %v1501_v52 = vmul.f32 0.00390625, %v1489_v60 }
 0x881   :  { %v1492_v41 = vpop.xlane.xlu0 %1491 }
 0x882   :  { %v1502_v16 = vmul.f32 0.00390625, %v1492_v41 }
 0x883   :  { %v1443_v4 = vpop.xlane.xlu1 %1442 }
 0x884   :  { %v5011_v38 = vmul.f32 0.00390625, %v1443_v4 }
 0x885   :  { %v1446_v15 = vpop.xlane.xlu0 %1445 }
 0x886   :  { %v1510_v27 = vmul.f32 %v5011_v38, %v5011_v38  ;;  %v5031_v25 = vmul.f32 0.00390625, %v1446_v15 }
 0x887   :  { %v1434_v19 = vpop.xlane.xlu1 %1433 }
 0x888   :  { %v1518_v42 = vsub.f32 %v1502_v16, %v1510_v27  ;;  %v5019_v61 = vmul.f32 0.00390625, %v1434_v19  ;;  %v1524_v16 = vadd.f32 1e-05, %v1516_v26  ;;  %v1517_v27 = vsub.f32 %v1501_v52, %v1509_v46 }
 0x889   :  { %v1431_v54 = vpop.xlane.xlu0 %1430  ;;  %v1511_v21 = vmul.f32 %v5031_v25, %v5031_v25 }
 0x88a   :  { %v1526_v32 = vadd.f32 1e-05, %v1518_v42  ;;  %v5017_v43 = vmul.f32 0.00390625, %v1431_v54  ;;  %v1507_v13 = vmul.f32 %v5019_v61, %v5019_v61 }
 0x88b   :  { %v1495_v20 = vpop.xlane.xlu1 %1494 }
 0x88c   :  { %4010 = vrsqrt.f32 %v1526_v32  ;;  %v1506_v50 = vmul.f32 %v5017_v43, %v5017_v43  ;;  %v1503_v42 = vmul.f32 0.00390625, %v1495_v20 }
 0x88d   :  { %v1480_v23 = vpop.xlane.xlu0 %1479 }
 0x88e   :  { %v1498_v37 = vmul.f32 0.00390625, %v1480_v23  ;;  %v1525_v23 = vadd.f32 1e-05, %v1517_v27  ;;  %v1519_v15 = vsub.f32 %v1503_v42, %v1511_v21 }
 0x88f   :  { %v1483_v12 = vpop.xlane.xlu1 %1482 }
 0x890   :  { %v1514_v9 = vsub.f32 %v1498_v37, %v1506_v50  ;;  %v1499_v3 = vmul.f32 0.00390625, %v1483_v12 }
 0x891   :  { %v1425_v32 = vpop.xlane.xlu0 %1424 }
 0x892   :  { %v1522_v41 = vadd.f32 1e-05, %v1514_v9  ;;  %v1515_v4 = vsub.f32 %v1499_v3, %v1507_v13  ;;  %v1527_v9 = vadd.f32 1e-05, %v1519_v15  ;;  %v5040_v13 = vmul.f32 0.00390625, %v1425_v32 }
 0x893   :  { %v1428_v19 = vpop.xlane.xlu1 %1427 }
 0x894   :  { %4012 = vrsqrt.f32 %v1522_v41  ;;  %v1523_v54 = vadd.f32 1e-05, %v1515_v4  ;;  %v5033_v60 = vmul.f32 0.00390625, %v1428_v19  ;;  %v1504_v41 = vmul.f32 %v5040_v13, %v5040_v13 }
 0x895   :  { %v1474_v12 = vpop.xlane.xlu0 %1473 }
 0x896   :  { %4014 = vrsqrt.f32 %v1523_v54  ;;  %v1505_v50 = vmul.f32 %v5033_v60, %v5033_v60  ;;  %v1496_v46 = vmul.f32 0.00390625, %v1474_v12 }
 0x897   :  { %4016 = vrsqrt.f32 %v1524_v16  ;;  %v1477_v49 = vpop.xlane.xlu1 %1476 }
 0x898   :  { %v1497_v37 = vmul.f32 0.00390625, %v1477_v49  ;;  %4018 = vrsqrt.f32 %v1525_v23  ;;  %v1512_v16 = vsub.f32 %v1496_v46, %v1504_v41 }
 0x899   :  { %v4011_v26 = vpop.eup %4010 }
 0x89a   :  { %v1513_v52 = vsub.f32 %v1497_v37, %v1505_v50  ;;  %v1542_v20 = vmul.f32 %v4988_v31, %v4011_v26  ;;  %v1520_v54 = vadd.f32 1e-05, %v1512_v16 }
 0x89c   :  { %v1521_v3 = vadd.f32 1e-05, %v1513_v52  ;;  %1592 = vperm.xlu0 %3814, %v1542_v20  }
 0x89e   :  { %4020 = vrsqrt.f32 %v1521_v3 }
 0x89f   :  { %4022 = vrsqrt.f32 %v1527_v9 }
 0x8a0   :  { %3815 = vset.pattern.permute.xlu0 %v4258_v28  ;;  %4024 = vrsqrt.f32 %v1520_v54 }
 0x8a1   :  { %v4013_v4 = vpop.eup %4012  ;;  %1625 = vperm.xlu0 %3815, %v4804_v17  }
 0x8a2   :  { %v1538_v42 = vmul.f32 %v4804_v17, %v4013_v4 }
 0x8a3   :  { %v4015_v31 = vpop.eup %4014 }
 0x8a4   :  { %v4017_v27 = vpop.eup %4016  ;;  %v1539_v19 = vmul.f32 %v4810_v1, %v4015_v31 }
 0x8a5   :  { %3816 = vset.pattern.permute.xlu0 %v4259_v34  ;;  %v1540_v32 = vmul.f32 %v5001_v36, %v4017_v27  ;;  %v4019_v21 = vpop.eup %4018 }
 0x8a6   :  { %1577 = vperm.xlu1 %3813, %v1539_v19   ;;  %1572 = vperm.xlu0 %3816, %v1538_v42   ;;  %v1541_v23 = vmul.f32 %v5007_v10, %v4019_v21  ;;  %v1642_v10 = vpop.permute.xlu1 %1641 }
 0x8aa   :  { %1582 = vperm.xlu1 %3813, %v1540_v32   ;;  %v5060_v26 = vpop.permute.xlu1 %1645  ;;  %v1553_v32 = vsub.f32 %v4902_v24, %v5015_v5 }
 0x8ab   :  { %v4021_v49 = vpop.eup %4020 }
 0x8ac   :  { %v1537_v15 = vmul.f32 %v4822_v57, %v4021_v49  ;;  %v4023_v50 = vpop.eup %4022 }
 0x8ad   :  { %v1543_v17 = vmul.f32 %v4995_v11, %v4023_v50  ;;  %v4025_v37 = vpop.eup %4024  ;;  %v1556_v11 = vsub.f32 %v4916_v45, %v5011_v38  ;;  %v4195_v50 = vld [vmem:[%s5976_s0 + $0x10] sm:$0xff] }
 0x8ae   :  { %1587 = vperm.xlu1 %3813, %v1541_v23   ;;  %1567 = vperm.xlu0 %3816, %v1537_v15   ;;  %v1536_v36 = vmul.f32 %v4816_v55, %v4025_v37  ;;  %v1634_v52 = vpop.permute.xlu1 %1633 }
 0x8b2   :  { %1597 = vperm.xlu1 %3813, %v1543_v17   ;;  %v1638_v41 = vpop.permute.xlu1 %1637 }
 0x8b6   :  { %3817 = vset.pattern.permute.xlu1 %v4258_v28 }
 0x8b7   :  { %1629 = vperm.xlu1 %3817, %v4810_v1   ;;  %v1557_v1 = vsub.f32 %v4922_v33, %v5011_v38  ;;  %v1548_v33 = vsub.f32 %v4942_v53, %v5017_v43  ;;  %v1549_v38 = vsub.f32 %v4936_v51, %v5017_v43  ;;  %v1554_v51 = vsub.f32 %v4908_v2, %v5021_v56 }
 0x8b8   :  { %v1555_v43 = vsub.f32 %v4910_v47, %v5021_v56  ;;  %v1558_v56 = vsub.f32 %v4932_v0, %v5031_v25  ;;  %v1550_v0 = vsub.f32 %v4938_v14, %v5019_v61 }
 0x8bb   :  { %3818 = vset.pattern.permute.xlu1 %v4259_v34 }
 0x8bc   :  { %1562 = vperm.xlu1 %3818, %v1536_v36  }
 0x8c0   :  { %3819 = vset.pattern.permute.xlu1 %v4258_v28 }
 0x8c1   :  { %1617 = vperm.xlu1 %3819, %v4816_v55  }
 0x8c5   :  { %1621 = vperm.xlu1 %3819, %v4822_v57   ;;  %v4194_v57 = vld [vmem:[%s5976_s0 + $0x30] sm:$0xff] }
 0x917   :  { %v1593_v20 = vpop.permute.xlu0 %1592 }
 0x918   :  { %v1612_v12 = vmul.f32 %v1593_v20, %v1556_v11  ;;  %v1613_v34 = vmul.f32 %v1593_v20, %v1557_v1  ;;  %v1559_v11 = vsub.f32 %v4928_v30, %v5031_v25  ;;  %v1551_v30 = vsub.f32 %v4930_v18, %v5019_v61  ;;  %v4197_v25 = vld [vmem:[%s5976_s0 + $0x28] sm:$0xff]  ;;  %v4198_v61 = vld [vmem:[%s5976_s0 + $0x38] sm:$0xff] }
 0x91a   :  { %v1660_v9 = vadd.f32 %v1642_v10, %v1612_v12  ;;  %v1661_v3 = vadd.f32 %v1642_v10, %v1613_v34 }
 0x91c   :  { %v1676_v28 = vmax.f32 %v1660_v9, 0.0  ;;  %v1677_v46 = vmax.f32 %v1661_v3, 0.0  ;;  %v1626_v55 = vpop.permute.xlu0 %1625 }
 0x91e   :  { %v5069_v4 = vadd.f32 %v4194_v57, %v1676_v28  ;;  %v5072_v45 = vadd.f32 %v4852_v29, %v1677_v46  ;;  %v1552_v29 = vsub.f32 %v4900_v44, %v5015_v5 }
 0x920   :  { %3314 = vst [vmem:[#allocation4 + $0x30] sm:$0xff] %v5069_v4  ;;  %3331 = vst [vmem:[#allocation4 + $0xb0] sm:$0xff] %v5072_v45 }
 0x921   :  { %v1578_v16 = vpop.permute.xlu1 %1577  ;;  %v1573_v31 = vpop.permute.xlu0 %1572 }
 0x922   :  { %v1604_v27 = vmul.f32 %v1573_v31, %v1548_v33  ;;  %v1605_v19 = vmul.f32 %v1573_v31, %v1549_v38  ;;  %v1606_v33 = vmul.f32 %v1578_v16, %v1550_v0  ;;  %v1607_v38 = vmul.f32 %v1578_v16, %v1551_v30 }
 0x924   :  { %v1652_v42 = vadd.f32 %v1626_v55, %v1604_v27  ;;  %v1653_v54 = vadd.f32 %v1626_v55, %v1605_v19 }
 0x925   :  { %v1583_v21 = vpop.permute.xlu1 %1582 }
 0x926   :  { %v1668_v49 = vmax.f32 %v1652_v42, 0.0  ;;  %v1669_v23 = vmax.f32 %v1653_v54, 0.0  ;;  %v1608_v15 = vmul.f32 %v1583_v21, %v1552_v29  ;;  %v1609_v53 = vmul.f32 %v1583_v21, %v1553_v32  ;;  %v4199_v32 = vld [vmem:[%s5976_s0 + $0x18] sm:$0xff] }
 0x928   :  { %v5091_v17 = vadd.f32 %v4195_v50, %v1668_v49  ;;  %v5094_v44 = vadd.f32 %v4828_v59, %v1669_v23  ;;  %v1656_v24 = vadd.f32 %v1634_v52, %v1608_v15  ;;  %v1657_v5 = vadd.f32 %v1634_v52, %v1609_v53  ;;  %v4196_v59 = vld [vmem:[%s5976_s0 + $0x20] sm:$0xff] }
 0x929   :  { %v1588_v37 = vpop.permute.xlu1 %1587 }
 0x92a   :  { %3310 = vst [vmem:[#allocation4 + $0x10] sm:$0xff] %v5091_v17  ;;  %3327 = vst [vmem:[#allocation4 + $0x90] sm:$0xff] %v5094_v44  ;;  %v1672_v2 = vmax.f32 %v1656_v24, 0.0  ;;  %v1673_v36 = vmax.f32 %v1657_v5, 0.0  ;;  %v1610_v10 = vmul.f32 %v1588_v37, %v1554_v51  ;;  %v1611_v47 = vmul.f32 %v1588_v37, %v1555_v43 }
 0x92b   :  { %v1547_v5 = vsub.f32 %v4967_v6, %v5033_v60 }
 0x92c   :  { %v1688_v1 = vadd.f32 %v4196_v59, %v1672_v2  ;;  %v1689_v52 = vadd.f32 %v4858_v62, %v1673_v36  ;;  %v1658_v20 = vadd.f32 %v1638_v41, %v1610_v10  ;;  %v1659_v12 = vadd.f32 %v1638_v41, %v1611_v47 }
 0x92d   :  { %v1598_v34 = vpop.permute.xlu1 %1597 }
 0x92e   :  { %3312 = vst [vmem:[#allocation4 + $0x20] sm:$0xff] %v1688_v1  ;;  %3329 = vst [vmem:[#allocation4 + $0xa0] sm:$0xff] %v1689_v52  ;;  %v1674_v9 = vmax.f32 %v1658_v20, 0.0  ;;  %v1675_v3 = vmax.f32 %v1659_v12, 0.0  ;;  %v1614_v28 = vmul.f32 %v1598_v34, %v1558_v56  ;;  %v1615_v46 = vmul.f32 %v1598_v34, %v1559_v11  ;;  %v3855_v34 = vld [vmem:[%s5977_s1 + $0x68] sm:$0xff]  }
 0x930   :  { %v1690_v62 = vadd.f32 %v4197_v25, %v1674_v9  ;;  %v1691_v55 = vadd.f32 %v4870_v48, %v1675_v3  ;;  %v1662_v41 = vadd.f32 %v5060_v26, %v1614_v28  ;;  %v1663_v57 = vadd.f32 %v5060_v26, %v1615_v46  ;;  %v3857_v9 = vld [vmem:[%s5977_s1 + $0x78] sm:$0xff]   ;;  %v3858_v3 = vld [vmem:[%s5977_s1 + $0x80] sm:$0xff]   ;;  %v3859_v28 = vld [vmem:[%s5977_s1 + $0x88] sm:$0xff]  }
 0x931   :  { %v3860_v46 = vld [vmem:[%s5977_s1 + $0x90] sm:$0xff]  }
 0x932   :  { %3313 = vst [vmem:[#allocation4 + $0x28] sm:$0xff] %v1690_v62  ;;  %3330 = vst [vmem:[#allocation4 + $0xa8] sm:$0xff] %v1691_v55  ;;  %v1678_v31 = vmax.f32 %v1662_v41, 0.0  ;;  %v1679_v14 = vmax.f32 %v1663_v57, 0.0  ;;  %v1630_v27 = vpop.permute.xlu1 %1629  ;;  %v1725_v15 = vpack.c.bf16 %v1691_v55, %v1689_v52  ;;  %v1724_v43 = vpack.c.bf16 %v1690_v62, %v1688_v1  ;;  %v4201_v1 = vld [vmem:[%s5976_s0 + $0x8] sm:$0xff]  ;;  %v3861_v57 = vld [vmem:[%s5977_s1 + $0x98] sm:$0xff]  }
 0x933   :  { %v1654_v19 = vadd.f32 %v1630_v27, %v1606_v33  ;;  %v1655_v18 = vadd.f32 %v1630_v27, %v1607_v38 }
 0x934   :  { %v1694_v42 = vadd.f32 %v4198_v61, %v1678_v31  ;;  %v1695_v48 = vadd.f32 %v4864_v63, %v1679_v14  ;;  %v1544_v63 = vsub.f32 %v4964_v58, %v5040_v13 }
 0x935   :  { %v1670_v54 = vmax.f32 %v1654_v19, 0.0  ;;  %v1671_v29 = vmax.f32 %v1655_v18, 0.0 }
 0x936   :  { %3315 = vst [vmem:[#allocation4 + $0x38] sm:$0xff] %v1694_v42  ;;  %3332 = vst [vmem:[#allocation4 + $0xb8] sm:$0xff] %v1695_v48  ;;  %v1727_v26 = vpack.c.bf16 %v1695_v48, %v5072_v45  ;;  %v1726_v16 = vpack.c.bf16 %v1694_v42, %v5069_v4  ;;  %v1545_v45 = vsub.f32 %v4959_v8, %v5040_v13  ;;  %v1568_v4 = vpop.permute.xlu0 %1567 }
 0x937   :  { %v1686_v21 = vadd.f32 %v4199_v32, %v1670_v54  ;;  %v1687_v49 = vadd.f32 %v4840_v22, %v1671_v29  ;;  %v1563_v23 = vpop.permute.xlu1 %1562  ;;  %v1546_v22 = vsub.f32 %v4970_v35, %v5033_v60  ;;  %v1603_v8 = vmul.f32 %v1568_v4, %v1547_v5  ;;  %v4200_v35 = vld [vmem:[%s5976_s0] sm:$0xff] }
 0x938   :  { %1800 = vmatprep.subr.bf16.mxu0 %v1727_v26  ;;  %v1600_v53 = vmul.f32 %v1563_v23, %v1544_v63  ;;  %v1601_v51 = vmul.f32 %v1563_v23, %v1545_v45 }
 0x939   :  { %3311 = vst [vmem:[#allocation4 + $0x18] sm:$0xff] %v1686_v21  ;;  %3328 = vst [vmem:[#allocation4 + $0x98] sm:$0xff] %v1687_v49  ;;  %1801 = vmatpush1.bf16.msra.mxu0 %v1726_v16  ;;  %v1723_v24 = vpack.c.bf16 %v1687_v49, %v5094_v44  ;;  %v1602_v2 = vmul.f32 %v1568_v4, %v1546_v22  ;;  %v1722_v10 = vpack.c.bf16 %v1686_v21, %v5091_v17 }
 0x93a   :  { %1802 = vmatprep.subr.bf16.mxu0 %v1725_v15 }
 0x93c   :  { %v1618_v50 = vpop.permute.xlu1 %1617 }
 0x93d   :  { %v1648_v37 = vadd.f32 %v1618_v50, %v1600_v53  ;;  %v1649_v58 = vadd.f32 %v1618_v50, %v1601_v51  ;;  %1803 = vmatpush1.bf16.msra.mxu0 %v1724_v43 }
 0x93e   :  { %1804 = vmatprep.subr.bf16.mxu0 %v1723_v24 }
 0x93f   :  { %v1664_v13 = vmax.f32 %v1648_v37, 0.0  ;;  %v1665_v36 = vmax.f32 %v1649_v58, 0.0 }
 0x940   :  { %v1622_v47 = vpop.permute.xlu1 %1621 }
 0x941   :  { %v1680_v56 = vadd.f32 %v4200_v35, %v1664_v13  ;;  %v1681_v44 = vadd.f32 %v4834_v40, %v1665_v36  ;;  %v1650_v11 = vadd.f32 %v1622_v47, %v1602_v2  ;;  %v1651_v6 = vadd.f32 %v1622_v47, %v1603_v8  ;;  %1805 = vmatpush1.bf16.msra.mxu0 %v1722_v10  ;;  %v3854_v40 = vld [vmem:[%s5977_s1 + $0x60] sm:$0xff]  }
 0x943   :  { %3308 = vst [vmem:[#allocation4] sm:$0xff] %v1680_v56  ;;  %3325 = vst [vmem:[#allocation4 + $0x80] sm:$0xff] %v1681_v44  ;;  %v1666_v60 = vmax.f32 %v1650_v11, 0.0  ;;  %v1667_v59 = vmax.f32 %v1651_v6, 0.0 }
 0x945   :  { %v1682_v17 = vadd.f32 %v4201_v1, %v1666_v60  ;;  %v1683_v52 = vadd.f32 %v4846_v39, %v1667_v59  ;;  %v3856_v39 = vld [vmem:[%s5977_s1 + $0x70] sm:$0xff]  }
 0x947   :  { %3309 = vst [vmem:[#allocation4 + $0x8] sm:$0xff] %v1682_v17  ;;  %3326 = vst [vmem:[#allocation4 + $0x88] sm:$0xff] %v1683_v52  ;;  %v1721_v20 = vpack.c.bf16 %v1683_v52, %v1681_v44  ;;  %v1720_v12 = vpack.c.bf16 %v1682_v17, %v1680_v56 }
 0x949   :  { %1806 = vmatprep.subr.bf16.mxu0 %v1721_v20 }
 0x94a   :  { %1807 = vmatpush1.bf16.msra.mxu0 %v1720_v12 }
 0x94d   :  { %3437 = vmatmul.mubr.msk.bf16.vlgmr.msra.gmra.mxu0 %vm145_vm0, %v3854_v40 }
 0x94e   :  { %1834 = vmatprep.mubr.bf16.mxu0 %v5980_v7 }
 0x955   :  { %3438 = vmatmul.mubr.msk.bf16.gmra.mxu0 %vm145_vm0, %v3855_v34 }
 0x956   :  { %1844 = vmatprep.mubr.bf16.mxu0 %v5980_v7 }
 0x95d   :  { %3439 = vmatmul.mubr.msk.bf16.gmra.mxu0 %vm145_vm0, %v3856_v39 }
 0x95e   :  { %1854 = vmatprep.mubr.bf16.mxu0 %v5980_v7 }
 0x965   :  { %3440 = vmatmul.mubr.msk.bf16.gmra.mxu0 %vm145_vm0, %v3857_v9 }
 0x966   :  { %1864 = vmatprep.mubr.bf16.mxu0 %v5980_v7 }
 0x96d   :  { %3441 = vmatmul.mubr.msk.bf16.gmra.mxu0 %vm145_vm0, %v3858_v3 }
 0x96e   :  { %1874 = vmatprep.mubr.bf16.mxu0 %v5980_v7 }
 0x975   :  { %3442 = vmatmul.mubr.msk.bf16.gmra.mxu0 %vm145_vm0, %v3859_v28 }
 0x976   :  { %1884 = vmatprep.mubr.bf16.mxu0 %v5980_v7 }
 0x97d   :  { %3443 = vmatmul.mubr.msk.bf16.gmra.mxu0 %vm145_vm0, %v3860_v46 }
 0x97e   :  { %1894 = vmatprep.mubr.bf16.mxu0 %v5980_v7 }
 0x985   :  { %3444 = vmatmul.mubr.msk.bf16.gmra.mxu0 %vm145_vm0, %v3861_v57 }
 0xa0d   :  { %v1826_v0 = vpop.f32.mrf.mxu0 }
 0xa0f   :  { %v1828_v30 = vpop.f32.mrf.mxu0 }
 0xa11   :  { %v1830_v25 = vpop.f32.mrf.mxu0 }
 0xa12   :  { %v1905_v62 = vpack.c.bf16 %v1830_v25, %v1826_v0 }
 0xa13   :  { %v1832_v55 = vpop.f32.mrf.mxu0 }
 0xa14   :  { %v1906_v41 = vpack.c.bf16 %v1832_v55, %v1828_v30  ;;  %1969 = vxpose.xlu0.c.b16.start [1/2] (short) %v1905_v62, 128 }
 0xa15   :  { %v1836_v33 = vpop.f32.mrf.mxu0 }
 0xa16   :  { %2410 = vxpose.xlu1.c.b16.start [1/2] (short) %v1906_v41, 128 }
 0xa17   :  { %v1838_v38 = vpop.f32.mrf.mxu0 }
 0xa19   :  { %v1840_v31 = vpop.f32.mrf.mxu0 }
 0xa1a   :  { %v1907_v14 = vpack.c.bf16 %v1840_v31, %v1836_v33 }
 0xa1b   :  { %v1842_v27 = vpop.f32.mrf.mxu0 }
 0xa1c   :  { %1970 = vxpose.xlu0.c.b16.end [2/2] (short) %v1907_v14, 128  ;;  %v1908_v19 = vpack.c.bf16 %v1842_v27, %v1838_v38 }
 0xa1d   :  { %v1846_v18 = vpop.f32.mrf.mxu0 }
 0xa1e   :  { %2411 = vxpose.xlu1.c.b16.end [2/2] (short) %v1908_v19, 128 }
 0xa1f   :  { %v1848_v61 = vpop.f32.mrf.mxu0 }
 0xa21   :  { %v1850_v42 = vpop.f32.mrf.mxu0 }
 0xa22   :  { %v1909_v16 = vpack.c.bf16 %v1850_v42, %v1846_v18 }
 0xa23   :  { %v1852_v48 = vpop.f32.mrf.mxu0 }
 0xa24   :  { %v1910_v49 = vpack.c.bf16 %v1852_v48, %v1848_v61 }
 0xa25   :  { %v1856_v54 = vpop.f32.mrf.mxu0 }
 0xa27   :  { %v1858_v29 = vpop.f32.mrf.mxu0 }
 0xa29   :  { %v1860_v26 = vpop.f32.mrf.mxu0 }
 0xa2a   :  { %v1911_v32 = vpack.c.bf16 %v1860_v26, %v1856_v54 }
 0xa2b   :  { %v1862_v21 = vpop.f32.mrf.mxu0 }
 0xa2c   :  { %v1912_v23 = vpack.c.bf16 %v1862_v21, %v1858_v29  ;;  %3701 = vmatprep.subr.bf16.mxu1 %v1911_v32 }
 0xa2d   :  { %3702 = vmatpush3.bf16.msra.mxu1 %v1911_v32  ;;  %v5200_v36 = vpop.f32.mrf.mxu0 }
 0xa2e   :  { %3745 = vmatprep.subr.bf16.mxu0 %v1912_v23  ;;  %3703 = vmatprep.subr.bf16.mxu1 %v1909_v16 }
 0xa2f   :  { %3746 = vmatpush3.bf16.msra.mxu0 %v1912_v23  ;;  %v5202_v10 = vpop.f32.mrf.mxu0 }
 0xa30   :  { %3747 = vmatprep.subr.bf16.mxu0 %v1910_v49 }
 0xa31   :  { %3704 = vmatpush3.bf16.msra.mxu1 %v1909_v16  ;;  %v5204_v47 = vpop.f32.mrf.mxu0 }
 0xa33   :  { %3748 = vmatpush3.bf16.msra.mxu0 %v1910_v49  ;;  %v5206_v35 = vpop.f32.mrf.mxu0 }
 0xa35   :  { %v5208_v56 = vpop.f32.mrf.mxu0 }
 0xa37   :  { %v5210_v44 = vpop.f32.mrf.mxu0 }
 0xa39   :  { %v5212_v11 = vpop.f32.mrf.mxu0 }
 0xa3b   :  { %v5214_v6 = vpop.f32.mrf.mxu0 }
 0xa3d   :  { %v5216_v60 = vpop.f32.mrf.mxu0 }
 0xa3f   :  { %v5218_v59 = vpop.f32.mrf.mxu0 }
 0xa41   :  { %v5220_v1 = vpop.f32.mrf.mxu0 }
 0xa43   :  { %v5222_v17 = vpop.f32.mrf.mxu0 }
 0xa45   :  { %v5224_v52 = vpop.f32.mrf.mxu0 }
 0xa47   :  { %v5226_v20 = vpop.f32.mrf.mxu0 }
 0xa48   :  { %5996 = vst [vmem:[#allocation7_spill] sm:$0xff] %v5226_v20 }
 0xa49   :  { %v5228_v12 = vpop.f32.mrf.mxu0 }
 0xa4b   :  { %v5230_v40 = vpop.f32.mrf.mxu0 }
 0xa7a   :  { %v1977_v15 = vpop.trf.xlu0 }
 0xa7b   :  { %3705 = vmatprep.mubr.msk.bf16.mxu1 %vm371_vm1, %v1977_v15 }
 0xa7c   :  { %v2418_v63 = vpop.trf.xlu1 }
 0xa7d   :  { %3749 = vmatprep.mubr.msk.bf16.mxu0 %vm371_vm1, %v2418_v63  ;;  %v4260_v63 = vmov 4  }
 0xa7e   :  { %v1978_v45 = vpop.trf.xlu0  ;;  %3820 = vset.pattern.permute.xlu1 %v4260_v63  ;;  %3821 = vset.pattern.permute.xlu0 %v4260_v63 }
 0xa7f   :  { %3706 = vmatmul.mubr.msk.bf16.vlgmr.msra.gmra.mxu1 %vm371_vm1, %v1978_v45 }
 0xa80   :  { %v2419_v4 = vpop.trf.xlu1 }
 0xa81   :  { %3750 = vmatmul.mubr.msk.bf16.vlgmr.msra.gmra.mxu0 %vm371_vm1, %v2419_v4 }
 0xa82   :  { %v1979_v53 = vpop.trf.xlu0 }
 0xa83   :  { %3709 = vmatprep.mubr.msk.bf16.mxu1 %vm371_vm1, %v1979_v53 }
 0xa84   :  { %v2420_v51 = vpop.trf.xlu1 }
 0xa85   :  { %3753 = vmatprep.mubr.msk.bf16.mxu0 %vm371_vm1, %v2420_v51 }
 0xa86   :  { %v1980_v43 = vpop.trf.xlu0 }
 0xa87   :  { %3710 = vmatmul.mubr.msk.bf16.gmra.mxu1 %vm371_vm1, %v1980_v43 }
 0xa88   :  { %v2421_v22 = vpop.trf.xlu1 }
 0xa89   :  { %3754 = vmatmul.mubr.msk.bf16.gmra.mxu0 %vm371_vm1, %v2421_v22 }
 0xa8a   :  { %v1981_v50 = vpop.trf.xlu0 }
 0xa8b   :  { %3713 = vmatprep.mubr.msk.bf16.mxu1 %vm371_vm1, %v1981_v50 }
 0xa8c   :  { %v2422_v24 = vpop.trf.xlu1 }
 0xa8d   :  { %3757 = vmatprep.mubr.msk.bf16.mxu0 %vm371_vm1, %v2422_v24 }
 0xa8e   :  { %v1982_v5 = vpop.trf.xlu0 }
 0xa8f   :  { %3714 = vmatmul.mubr.msk.bf16.gmra.mxu1 %vm371_vm1, %v1982_v5 }
 0xa90   :  { %v2423_v37 = vpop.trf.xlu1 }
 0xa91   :  { %3758 = vmatmul.mubr.msk.bf16.gmra.mxu0 %vm371_vm1, %v2423_v37 }
 0xa92   :  { %v1983_v58 = vpop.trf.xlu0 }
 0xa93   :  { %3717 = vmatprep.mubr.msk.bf16.mxu1 %vm371_vm1, %v1983_v58 }
 0xa94   :  { %v2424_v2 = vpop.trf.xlu1 }
 0xa95   :  { %3761 = vmatprep.mubr.msk.bf16.mxu0 %vm371_vm1, %v2424_v2 }
 0xa96   :  { %v1984_v8 = vpop.trf.xlu0 }
 0xa97   :  { %3718 = vmatmul.mubr.msk.bf16.gmra.mxu1 %vm371_vm1, %v1984_v8 }
 0xa98   :  { %v2425_v13 = vpop.trf.xlu1 }
 0xa99   :  { %3762 = vmatmul.mubr.msk.bf16.gmra.mxu0 %vm371_vm1, %v2425_v13 }
 0xa9a   :  { %2995 = vmatprep.mubr.bf16.mxu0 %v5980_v7 }
 0xb3f   :  { %v5232_v34 = vpop.f32.mrf.mxu1 }
 0xb41   :  { %v5234_v39 = vpop.f32.mrf.mxu1  ;;  %v5236_v9 = vpop.f32.mrf.mxu0 }
 0xb42   :  { %2106 = vmax.xlane.f32.xlu0 %v5234_v39 }
 0xb43   :  { %v5239_v3 = vpop.f32.mrf.mxu1  ;;  %v5243_v46 = vpop.f32.mrf.mxu0 }
 0xb45   :  { %v5241_v28 = vpop.f32.mrf.mxu1  ;;  %v5251_v25 = vpop.f32.mrf.mxu0 }
 0xb46   :  { %2110 = vmax.xlane.f32.xlu0 %v5232_v34  ;;  %2108 = vmax.xlane.f32.xlu1 %v5241_v28 }
 0xb47   :  { %v5247_v0 = vpop.f32.mrf.mxu1  ;;  %v5259_v41 = vpop.f32.mrf.mxu0 }
 0xb49   :  { %v5249_v30 = vpop.f32.mrf.mxu1  ;;  %v5267_v38 = vpop.f32.mrf.mxu0 }
 0xb4a   :  { %2112 = vmax.xlane.f32.xlu0 %v5239_v3  ;;  %2114 = vmax.xlane.f32.xlu1 %v5249_v30 }
 0xb4b   :  { %v5255_v62 = vpop.f32.mrf.mxu1  ;;  %v5275_v27 = vpop.f32.mrf.mxu0 }
 0xb4d   :  { %v5257_v55 = vpop.f32.mrf.mxu1  ;;  %v5283_v61 = vpop.f32.mrf.mxu0 }
 0xb4e   :  { %2118 = vmax.xlane.f32.xlu1 %v5247_v0  ;;  %2116 = vmax.xlane.f32.xlu0 %v5257_v55 }
 0xb4f   :  { %v5263_v57 = vpop.f32.mrf.mxu1  ;;  %v5291_v54 = vpop.f32.mrf.mxu0 }
 0xb51   :  { %v5265_v33 = vpop.f32.mrf.mxu1  ;;  %v5295_v29 = vpop.f32.mrf.mxu0 }
 0xb52   :  { %2120 = vmax.xlane.f32.xlu0 %v5255_v62  ;;  %2122 = vmax.xlane.f32.xlu1 %v5265_v33 }
 0xb53   :  { %v5271_v31 = vpop.f32.mrf.mxu1  ;;  %v5299_v26 = vpop.f32.mrf.mxu0 }
 0xb55   :  { %v5273_v14 = vpop.f32.mrf.mxu1  ;;  %v5303_v16 = vpop.f32.mrf.mxu0 }
 0xb56   :  { %2126 = vmax.xlane.f32.xlu1 %v5263_v57  ;;  %2124 = vmax.xlane.f32.xlu0 %v5273_v14 }
 0xb57   :  { %v5279_v19 = vpop.f32.mrf.mxu1  ;;  %v5307_v32 = vpop.f32.mrf.mxu0 }
 0xb59   :  { %v5281_v18 = vpop.f32.mrf.mxu1  ;;  %v5311_v21 = vpop.f32.mrf.mxu0 }
 0xb5a   :  { %2128 = vmax.xlane.f32.xlu0 %v5271_v31  ;;  %2130 = vmax.xlane.f32.xlu1 %v5281_v18 }
 0xb5b   :  { %v5287_v42 = vpop.f32.mrf.mxu1  ;;  %v5315_v49 = vpop.f32.mrf.mxu0 }
 0xb5d   :  { %v5289_v48 = vpop.f32.mrf.mxu1  ;;  %v5319_v23 = vpop.f32.mrf.mxu0 }
 0xb5e   :  { %2134 = vmax.xlane.f32.xlu1 %v5279_v19  ;;  %2132 = vmax.xlane.f32.xlu0 %v5289_v48 }
 0xb5f   :  { %v5323_v15 = vpop.f32.mrf.mxu0 }
 0xb62   :  { %2136 = vmax.xlane.f32.xlu0 %v5287_v42  ;;  %2547 = vmax.xlane.f32.xlu1 %v5243_v46 }
 0xb66   :  { %2551 = vmax.xlane.f32.xlu1 %v5236_v9  ;;  %2549 = vmax.xlane.f32.xlu0 %v5259_v41 }
 0xb6a   :  { %2553 = vmax.xlane.f32.xlu0 %v5251_v25  ;;  %2555 = vmax.xlane.f32.xlu1 %v5275_v27 }
 0xb6e   :  { %2559 = vmax.xlane.f32.xlu1 %v5267_v38  ;;  %2557 = vmax.xlane.f32.xlu0 %v5291_v54 }
 0xb72   :  { %2561 = vmax.xlane.f32.xlu0 %v5283_v61  ;;  %2563 = vmax.xlane.f32.xlu1 %v5299_v26 }
 0xb76   :  { %2567 = vmax.xlane.f32.xlu1 %v5295_v29  ;;  %2565 = vmax.xlane.f32.xlu0 %v5307_v32 }
 0xb7a   :  { %2569 = vmax.xlane.f32.xlu0 %v5303_v16  ;;  %2571 = vmax.xlane.f32.xlu1 %v5315_v49 }
 0xb7e   :  { %2575 = vmax.xlane.f32.xlu1 %v5311_v21  ;;  %2573 = vmax.xlane.f32.xlu0 %v5323_v15 }
 0xb82   :  { %2577 = vmax.xlane.f32.xlu0 %v5319_v23 }
 0xbcb   :  { %v2107_v45 = vpop.xlane.xlu0 %2106 }
 0xbcc   :  { %v2138_v4 = vsub.f32 %v5234_v39, %v2107_v45 }
 0xbce   :  { %v2154_v53 = vmul.f32 1.442695, %v2138_v4 }
 0xbcf   :  { %v2111_v51 = vpop.xlane.xlu0 %2110  ;;  %v2109_v43 = vpop.xlane.xlu1 %2108 }
 0xbd0   :  { %4026 = vpow2.f32 %v2154_v53  ;;  %v2140_v22 = vsub.f32 %v5232_v34, %v2111_v51  ;;  %v2139_v50 = vsub.f32 %v5241_v28, %v2109_v43 }
 0xbd2   :  { %v2158_v24 = vmul.f32 1.442695, %v2140_v22  ;;  %v2156_v5 = vmul.f32 1.442695, %v2139_v50 }
 0xbd3   :  { %v2113_v37 = vpop.xlane.xlu0 %2112  ;;  %v2115_v58 = vpop.xlane.xlu1 %2114 }
 0xbd4   :  { %4028 = vpow2.f32 %v2158_v24  ;;  %v2141_v2 = vsub.f32 %v5239_v3, %v2113_v37  ;;  %v2142_v8 = vsub.f32 %v5249_v30, %v2115_v58 }
 0xbd5   :  { %4030 = vpow2.f32 %v2156_v5 }
 0xbd6   :  { %v2160_v13 = vmul.f32 1.442695, %v2141_v2  ;;  %v2162_v39 = vmul.f32 1.442695, %v2142_v8 }
 0xbd7   :  { %v2119_v63 = vpop.xlane.xlu1 %2118  ;;  %v2117_v45 = vpop.xlane.xlu0 %2116 }
 0xbd8   :  { %4032 = vpow2.f32 %v2160_v13  ;;  %v2144_v4 = vsub.f32 %v5247_v0, %v2119_v63  ;;  %v2143_v34 = vsub.f32 %v5257_v55, %v2117_v45 }
 0xbd9   :  { %4034 = vpow2.f32 %v2162_v39 }
 0xbda   :  { %v2166_v28 = vmul.f32 1.442695, %v2144_v4  ;;  %v2164_v53 = vmul.f32 1.442695, %v2143_v34 }
 0xbdb   :  { %v2121_v51 = vpop.xlane.xlu0 %2120  ;;  %v2123_v43 = vpop.xlane.xlu1 %2122 }
 0xbdc   :  { %4036 = vpow2.f32 %v2166_v28  ;;  %v2145_v3 = vsub.f32 %v5255_v62, %v2121_v51  ;;  %v2146_v30 = vsub.f32 %v5265_v33, %v2123_v43 }
 0xbdd   :  { %v5337_v22 = vpop.eup %4026  ;;  %4038 = vpow2.f32 %v2164_v53 }
 0xbde   :  { %v2168_v50 = vmul.f32 1.442695, %v2145_v3  ;;  %v2170_v24 = vmul.f32 1.442695, %v2146_v30  ;;  %2186 = vadd.xlane.f32.xlu1 %v5337_v22 }
 0xbdf   :  { %v2127_v0 = vpop.xlane.xlu1 %2126  ;;  %v2125_v5 = vpop.xlane.xlu0 %2124 }
 0xbe0   :  { %4040 = vpow2.f32 %v2168_v50  ;;  %v2148_v55 = vsub.f32 %v5263_v57, %v2127_v0  ;;  %v2147_v37 = vsub.f32 %v5273_v14, %v2125_v5 }
 0xbe1   :  { %v5342_v58 = vpop.eup %4028  ;;  %4042 = vpow2.f32 %v2170_v24 }
 0xbe2   :  { %v5344_v62 = vpop.eup %4030  ;;  %v2174_v33 = vmul.f32 1.442695, %v2148_v55  ;;  %v2172_v2 = vmul.f32 1.442695, %v2147_v37  ;;  %2190 = vadd.xlane.f32.xlu1 %v5342_v58 }
 0xbe3   :  { %2188 = vadd.xlane.f32.xlu0 %v5344_v62  ;;  %v2129_v8 = vpop.xlane.xlu0 %2128  ;;  %v2131_v13 = vpop.xlane.xlu1 %2130 }
 0xbe4   :  { %4044 = vpow2.f32 %v2174_v33  ;;  %v2149_v39 = vsub.f32 %v5271_v31, %v2129_v8  ;;  %v2150_v57 = vsub.f32 %v5281_v18, %v2131_v13 }
 0xbe5   :  { %v5350_v63 = vpop.eup %4032  ;;  %4046 = vpow2.f32 %v2172_v2 }
 0xbe6   :  { %v5352_v14 = vpop.eup %4034  ;;  %v2176_v45 = vmul.f32 1.442695, %v2149_v39  ;;  %v2178_v4 = vmul.f32 1.442695, %v2150_v57 }
 0xbe7   :  { %2194 = vadd.xlane.f32.xlu1 %v5352_v14  ;;  %2192 = vadd.xlane.f32.xlu0 %v5350_v63  ;;  %v2135_v34 = vpop.xlane.xlu1 %2134  ;;  %v2133_v28 = vpop.xlane.xlu0 %2132 }
 0xbe8   :  { %4048 = vpow2.f32 %v2176_v45  ;;  %v2152_v53 = vsub.f32 %v5279_v19, %v2135_v34  ;;  %v2151_v31 = vsub.f32 %v5289_v48, %v2133_v28 }
 0xbe9   :  { %v5358_v51 = vpop.eup %4036  ;;  %4050 = vpow2.f32 %v2178_v4 }
 0xbea   :  { %v5360_v18 = vpop.eup %4038  ;;  %v2182_v43 = vmul.f32 1.442695, %v2152_v53  ;;  %v2180_v3 = vmul.f32 1.442695, %v2151_v31 }
 0xbeb   :  { %2198 = vadd.xlane.f32.xlu1 %v5358_v51  ;;  %2196 = vadd.xlane.f32.xlu0 %v5360_v18  ;;  %v2137_v30 = vpop.xlane.xlu0 %2136  ;;  %v2548_v50 = vpop.xlane.xlu1 %2547 }
 0xbec   :  { %4052 = vpow2.f32 %v2182_v43  ;;  %v2153_v24 = vsub.f32 %v5287_v42, %v2137_v30  ;;  %v2579_v19 = vsub.f32 %v5243_v46, %v2548_v50 }
 0xbed   :  { %v5366_v0 = vpop.eup %4040  ;;  %4054 = vpow2.f32 %v2180_v3 }
 0xbee   :  { %v5368_v48 = vpop.eup %4042  ;;  %v2184_v5 = vmul.f32 1.442695, %v2153_v24  ;;  %v2595_v55 = vmul.f32 1.442695, %v2579_v19 }
 0xbef   :  { %2202 = vadd.xlane.f32.xlu1 %v5368_v48  ;;  %2200 = vadd.xlane.f32.xlu0 %v5366_v0  ;;  %v2552_v37 = vpop.xlane.xlu1 %2551  ;;  %v2550_v33 = vpop.xlane.xlu0 %2549 }
 0xbf0   :  { %4056 = vpow2.f32 %v2184_v5  ;;  %v2581_v2 = vsub.f32 %v5236_v9, %v2552_v37  ;;  %v2580_v42 = vsub.f32 %v5259_v41, %v2550_v33 }
 0xbf1   :  { %v5374_v8 = vpop.eup %4044  ;;  %4058 = vpow2.f32 %v2595_v55 }
 0xbf2   :  { %v5376_v46 = vpop.eup %4046  ;;  %v2599_v13 = vmul.f32 1.442695, %v2581_v2  ;;  %v2597_v39 = vmul.f32 1.442695, %v2580_v42 }
 0xbf3   :  { %2206 = vadd.xlane.f32.xlu1 %v5374_v8  ;;  %2204 = vadd.xlane.f32.xlu0 %v5376_v46  ;;  %v2554_v57 = vpop.xlane.xlu0 %2553  ;;  %v2556_v45 = vpop.xlane.xlu1 %2555 }
 0xbf4   :  { %4060 = vpow2.f32 %v2599_v13  ;;  %v2582_v4 = vsub.f32 %v5251_v25, %v2554_v57  ;;  %v2583_v9 = vsub.f32 %v5275_v27, %v2556_v45 }
 0xbf5   :  { %v5382_v34 = vpop.eup %4048  ;;  %4062 = vpow2.f32 %v2597_v39 }
 0xbf6   :  { %v5384_v41 = vpop.eup %4050  ;;  %v2601_v28 = vmul.f32 1.442695, %v2582_v4  ;;  %v2603_v53 = vmul.f32 1.442695, %v2583_v9 }
 0xbf7   :  { %2210 = vadd.xlane.f32.xlu1 %v5384_v41  ;;  %2208 = vadd.xlane.f32.xlu0 %v5382_v34  ;;  %v2560_v31 = vpop.xlane.xlu1 %2559  ;;  %v2558_v43 = vpop.xlane.xlu0 %2557 }
 0xbf8   :  { %4064 = vpow2.f32 %v2601_v28  ;;  %v2585_v3 = vsub.f32 %v5267_v38, %v2560_v31  ;;  %v2584_v25 = vsub.f32 %v5291_v54, %v2558_v43 }
 0xbf9   :  { %v5390_v30 = vpop.eup %4052  ;;  %4066 = vpow2.f32 %v2603_v53 }
 0xbfa   :  { %v5392_v27 = vpop.eup %4054  ;;  %v2607_v50 = vmul.f32 1.442695, %v2585_v3  ;;  %v2605_v24 = vmul.f32 1.442695, %v2584_v25 }
 0xbfb   :  { %2214 = vadd.xlane.f32.xlu1 %v5390_v30  ;;  %2212 = vadd.xlane.f32.xlu0 %v5392_v27  ;;  %v2562_v19 = vpop.xlane.xlu0 %2561  ;;  %v2564_v5 = vpop.xlane.xlu1 %2563 }
 0xbfc   :  { %4068 = vpow2.f32 %v2607_v50  ;;  %v2586_v55 = vsub.f32 %v5283_v61, %v2562_v19  ;;  %v2587_v38 = vsub.f32 %v5299_v26, %v2564_v5 }
 0xbfd   :  { %v5398_v37 = vpop.eup %4056  ;;  %4070 = vpow2.f32 %v2605_v24 }
 0xbfe   :  { %v5400_v54 = vpop.eup %4058  ;;  %v2609_v33 = vmul.f32 1.442695, %v2586_v55  ;;  %v2611_v2 = vmul.f32 1.442695, %v2587_v38 }
 0xbff   :  { %2627 = vadd.xlane.f32.xlu1 %v5400_v54  ;;  %2216 = vadd.xlane.f32.xlu0 %v5398_v37  ;;  %v2568_v42 = vpop.xlane.xlu1 %2567  ;;  %v2566_v13 = vpop.xlane.xlu0 %2565 }
 0xc00   :  { %4072 = vpow2.f32 %v2609_v33  ;;  %v2589_v39 = vsub.f32 %v5295_v29, %v2568_v42  ;;  %v2588_v61 = vsub.f32 %v5307_v32, %v2566_v13 }
 0xc01   :  { %v5406_v57 = vpop.eup %4060  ;;  %4074 = vpow2.f32 %v2611_v2 }
 0xc02   :  { %v5408_v26 = vpop.eup %4062  ;;  %v2615_v45 = vmul.f32 1.442695, %v2589_v39  ;;  %v2613_v4 = vmul.f32 1.442695, %v2588_v61 }
 0xc03   :  { %2631 = vadd.xlane.f32.xlu1 %v5406_v57  ;;  %2629 = vadd.xlane.f32.xlu0 %v5408_v26  ;;  %v2570_v9 = vpop.xlane.xlu0 %2569  ;;  %v2572_v28 = vpop.xlane.xlu1 %2571 }
 0xc04   :  { %4076 = vpow2.f32 %v2615_v45  ;;  %v2590_v53 = vsub.f32 %v5303_v16, %v2570_v9  ;;  %v2591_v29 = vsub.f32 %v5315_v49, %v2572_v28  ;;  %v5459_v9 = vld [vmem:[%s5978_s2] sm:$0xff]  ;;  %v5465_v28 = vld [vmem:[%s5978_s2 + $0x10] sm:$0xff] }
 0xc05   :  { %v5414_v31 = vpop.eup %4064  ;;  %4078 = vpow2.f32 %v2613_v4  ;;  %5997 = vst [vmem:[#allocation8_spill] sm:$0xff] %v5459_v9  ;;  %5998 = vst [vmem:[#allocation9_spill] sm:$0xff] %v5465_v28 }
 0xc06   :  { %v5416_v32 = vpop.eup %4066  ;;  %v2617_v43 = vmul.f32 1.442695, %v2590_v53  ;;  %v2619_v3 = vmul.f32 1.442695, %v2591_v29  ;;  %v5471_v53 = vld [vmem:[%s5978_s2 + $0x18] sm:$0xff]  ;;  %v5477_v29 = vld [vmem:[%s5978_s2 + $0x8] sm:$0xff] }
 0xc07   :  { %2635 = vadd.xlane.f32.xlu1 %v5416_v32  ;;  %2633 = vadd.xlane.f32.xlu0 %v5414_v31  ;;  %v2576_v25 = vpop.xlane.xlu1 %2575  ;;  %v2574_v50 = vpop.xlane.xlu0 %2573  ;;  %5999 = vst [vmem:[#allocation10_spill] sm:$0xff] %v5471_v53  ;;  %6000 = vst [vmem:[#allocation11_spill] sm:$0xff] %v5477_v29 }
 0xc08   :  { %4080 = vpow2.f32 %v2617_v43  ;;  %v2593_v24 = vsub.f32 %v5311_v21, %v2576_v25  ;;  %v2592_v16 = vsub.f32 %v5323_v15, %v2574_v50  ;;  %v5483_v43 = vld [vmem:[%s5978_s2 + $0x20] sm:$0xff]  ;;  %v5495_v25 = vld [vmem:[%s5978_s2 + $0x30] sm:$0xff]  ;;  %v5501_v50 = vld [vmem:[%s5978_s2 + $0x38] sm:$0xff] }
 0xc09   :  { %v5422_v19 = vpop.eup %4068  ;;  %4082 = vpow2.f32 %v2619_v3  ;;  %6001 = vst [vmem:[#allocation12_spill] sm:$0xff] %v5483_v43  ;;  %v5489_v3 = vld [vmem:[%s5978_s2 + $0x28] sm:$0xff]  ;;  %6003 = vst [vmem:[#allocation14_spill] sm:$0xff] %v5495_v25 }
 0xc0a   :  { %v5424_v49 = vpop.eup %4070  ;;  %v2623_v5 = vmul.f32 1.442695, %v2593_v24  ;;  %v2621_v55 = vmul.f32 1.442695, %v2592_v16  ;;  %6002 = vst [vmem:[#allocation13_spill] sm:$0xff] %v5489_v3  ;;  %6004 = vst [vmem:[#allocation15_spill] sm:$0xff] %v5501_v50 }
 0xc0b   :  { %2639 = vadd.xlane.f32.xlu1 %v5422_v19  ;;  %2637 = vadd.xlane.f32.xlu0 %v5424_v49  ;;  %v2578_v38 = vpop.xlane.xlu0 %2577 }
 0xc0c   :  { %4084 = vpow2.f32 %v2623_v5  ;;  %v2594_v33 = vsub.f32 %v5319_v23, %v2578_v38 }
 0xc0d   :  { %v5429_v2 = vpop.eup %4072  ;;  %4086 = vpow2.f32 %v2621_v55 }
 0xc0e   :  { %v5431_v21 = vpop.eup %4074  ;;  %v2625_v15 = vmul.f32 1.442695, %v2594_v33 }
 0xc0f   :  { %2643 = vadd.xlane.f32.xlu1 %v5431_v21  ;;  %2641 = vadd.xlane.f32.xlu0 %v5429_v2 }
 0xc10   :  { %4088 = vpow2.f32 %v2625_v15 }
 0xc11   :  { %v5435_v42 = vpop.eup %4076 }
 0xc12   :  { %v5437_v13 = vpop.eup %4078 }
 0xc13   :  { %2647 = vadd.xlane.f32.xlu1 %v5435_v42  ;;  %2645 = vadd.xlane.f32.xlu0 %v5437_v13 }
 0xc15   :  { %v5441_v23 = vpop.eup %4080 }
 0xc16   :  { %v5443_v39 = vpop.eup %4082 }
 0xc17   :  { %2651 = vadd.xlane.f32.xlu1 %v5443_v39  ;;  %2649 = vadd.xlane.f32.xlu0 %v5441_v23 }
 0xc19   :  { %v5447_v61 = vpop.eup %4084 }
 0xc1a   :  { %v5449_v45 = vpop.eup %4086 }
 0xc1b   :  { %2655 = vadd.xlane.f32.xlu1 %v5447_v61  ;;  %2653 = vadd.xlane.f32.xlu0 %v5449_v45 }
 0xc1d   :  { %v5453_v4 = vpop.eup %4088 }
 0xc1f   :  { %2657 = vadd.xlane.f32.xlu0 %v5453_v4 }
 0xc2c   :  { %1914 = vperm.xlu1 %3820, %v5459_v9  }
 0xc30   :  { %1922 = vperm.xlu1 %3820, %v5465_v28  }
 0xc34   :  { %1926 = vperm.xlu1 %3820, %v5471_v53  }
 0xc35   :  { %1918 = vperm.xlu0 %3821, %v5477_v29  }
 0xc38   :  { %1930 = vperm.xlu1 %3820, %v5483_v43  }
 0xc3c   :  { %1934 = vperm.xlu1 %3820, %v5489_v3  }
 0xc40   :  { %1938 = vperm.xlu1 %3820, %v5495_v25  }
 0xc44   :  { %1942 = vperm.xlu1 %3820, %v5501_v50  }
 0xc67   :  { %v2187_v24 = vpop.xlane.xlu1 %2186 }
 0xc68   :  { %4090 = vrcp.f32 %v2187_v24 }
 0xc6b   :  { %v2191_v16 = vpop.xlane.xlu1 %2190 }
 0xc6c   :  { %4092 = vrcp.f32 %v2191_v16  ;;  %v2189_v5 = vpop.xlane.xlu0 %2188 }
 0xc6d   :  { %4094 = vrcp.f32 %v2189_v5 }
 0xc70   :  { %v2195_v55 = vpop.xlane.xlu1 %2194  ;;  %v2193_v38 = vpop.xlane.xlu0 %2192 }
 0xc71   :  { %4096 = vrcp.f32 %v2195_v55 }
 0xc72   :  { %4098 = vrcp.f32 %v2193_v38 }
 0xc74   :  { %v2199_v33 = vpop.xlane.xlu1 %2198  ;;  %v2197_v15 = vpop.xlane.xlu0 %2196 }
 0xc75   :  { %4100 = vrcp.f32 %v2199_v33  ;;  %v4091_v7 = vpop.eup %4090 }
 0xc76   :  { %4102 = vrcp.f32 %v2197_v15  ;;  %v5505_v24 = vmul.f32 %v4091_v7, %v5337_v22 }
 0xc78   :  { %v2203_v25 = vpop.xlane.xlu1 %2202  ;;  %v2201_v43 = vpop.xlane.xlu0 %2200 }
 0xc79   :  { %v4093_v53 = vpop.eup %4092  ;;  %4104 = vrcp.f32 %v2203_v25 }
 0xc7a   :  { %v4095_v50 = vpop.eup %4094  ;;  %4106 = vrcp.f32 %v2201_v43  ;;  %v5511_v38 = vmul.f32 %v4093_v53, %v5342_v58 }
 0xc7b   :  { %v5508_v16 = vmul.f32 %v4095_v50, %v5344_v62 }
 0xc7c   :  { %v2207_v5 = vpop.xlane.xlu1 %2206  ;;  %v2205_v55 = vpop.xlane.xlu0 %2204 }
 0xc7d   :  { %v2250_v33 = vadd.f32 %v5508_v16, %v5505_v24  ;;  %4108 = vrcp.f32 %v2207_v5 }
 0xc7e   :  { %v4097_v15 = vpop.eup %4096  ;;  %4110 = vrcp.f32 %v2205_v55 }
 0xc7f   :  { %v4099_v25 = vpop.eup %4098  ;;  %v2251_v43 = vadd.f32 %v2250_v33, %v5511_v38  ;;  %v5520_v3 = vmul.f32 %v4097_v15, %v5352_v14 }
 0xc80   :  { %v5517_v7 = vmul.f32 %v4099_v25, %v5350_v63  ;;  %v2211_v22 = vpop.xlane.xlu1 %2210  ;;  %v2209_v62 = vpop.xlane.xlu0 %2208 }
 0xc81   :  { %4112 = vrcp.f32 %v2211_v22 }
 0xc82   :  { %v4101_v50 = vpop.eup %4100  ;;  %v2252_v58 = vadd.f32 %v2251_v43, %v5517_v7  ;;  %4114 = vrcp.f32 %v2209_v62 }
 0xc83   :  { %v4103_v53 = vpop.eup %4102  ;;  %v5528_v25 = vmul.f32 %v4101_v50, %v5358_v51 }
 0xc84   :  { %v2253_v5 = vadd.f32 %v2252_v58, %v5520_v3  ;;  %v5525_v55 = vmul.f32 %v4103_v53, %v5360_v18  ;;  %v2215_v33 = vpop.xlane.xlu1 %2214  ;;  %v2213_v29 = vpop.xlane.xlu0 %2212 }
 0xc85   :  { %4116 = vrcp.f32 %v2215_v33 }
 0xc86   :  { %v4105_v63 = vpop.eup %4104  ;;  %v2254_v22 = vadd.f32 %v2253_v5, %v5525_v55  ;;  %4118 = vrcp.f32 %v2213_v29 }
 0xc87   :  { %v4107_v14 = vpop.eup %4106  ;;  %v5536_v53 = vmul.f32 %v4105_v63, %v5368_v48 }
 0xc88   :  { %v2255_v15 = vadd.f32 %v2254_v22, %v5528_v25  ;;  %v5533_v43 = vmul.f32 %v4107_v14, %v5366_v0  ;;  %v2628_v62 = vpop.xlane.xlu1 %2627  ;;  %v2217_v58 = vpop.xlane.xlu0 %2216 }
 0xc89   :  { %4120 = vrcp.f32 %v2217_v58 }
 0xc8a   :  { %v4109_v18 = vpop.eup %4108  ;;  %v2256_v33 = vadd.f32 %v2255_v15, %v5533_v43  ;;  %4122 = vrcp.f32 %v2628_v62 }
 0xc8b   :  { %v4111_v51 = vpop.eup %4110  ;;  %v5544_v14 = vmul.f32 %v4109_v18, %v5374_v8 }
 0xc8c   :  { %v2257_v50 = vadd.f32 %v2256_v33, %v5536_v53  ;;  %v5541_v29 = vmul.f32 %v4111_v51, %v5376_v46  ;;  %v2632_v5 = vpop.xlane.xlu1 %2631  ;;  %v2630_v22 = vpop.xlane.xlu0 %2629 }
 0xc8d   :  { %4124 = vrcp.f32 %v2632_v5 }
 0xc8e   :  { %v4113_v0 = vpop.eup %4112  ;;  %v2258_v48 = vadd.f32 %v2257_v50, %v5541_v29  ;;  %4126 = vrcp.f32 %v2630_v22 }
 0xc8f   :  { %v4115_v63 = vpop.eup %4114  ;;  %v5552_v51 = vmul.f32 %v4113_v0, %v5384_v41 }
 0xc90   :  { %v5548_v15 = vmul.f32 %v4115_v63, %v5382_v34  ;;  %v2636_v58 = vpop.xlane.xlu1 %2635  ;;  %v2634_v33 = vpop.xlane.xlu0 %2633  ;;  %v2259_v46 = vadd.f32 %v2258_v48, %v5544_v14 }
 0xc91   :  { %4128 = vrcp.f32 %v2636_v58 }
 0xc92   :  { %v4117_v62 = vpop.eup %4116  ;;  %4130 = vrcp.f32 %v2634_v33  ;;  %v2260_v8 = vadd.f32 %v2259_v46, %v5548_v15 }
 0xc93   :  { %v4119_v18 = vpop.eup %4118  ;;  %v5560_v48 = vmul.f32 %v4117_v62, %v5390_v30 }
 0xc94   :  { %v2640_v5 = vpop.xlane.xlu1 %2639  ;;  %v2638_v50 = vpop.xlane.xlu0 %2637  ;;  %v5556_v22 = vmul.f32 %v4119_v18, %v5392_v27  ;;  %v2261_v34 = vadd.f32 %v2260_v8, %v5552_v51 }
 0xc95   :  { %4132 = vrcp.f32 %v2640_v5 }
 0xc96   :  { %4134 = vrcp.f32 %v2638_v50  ;;  %v2262_v63 = vadd.f32 %v2261_v34, %v5556_v22  ;;  %v4121_v41 = vpop.eup %4120 }
 0xc97   :  { %v5564_v33 = vmul.f32 %v4121_v41, %v5398_v37  ;;  %v4123_v28 = vpop.eup %4122 }
 0xc98   :  { %v2644_v0 = vpop.xlane.xlu1 %2643  ;;  %v2642_v58 = vpop.xlane.xlu0 %2641  ;;  %v2263_v46 = vadd.f32 %v2262_v63, %v5560_v48  ;;  %v5569_v30 = vmul.f32 %v4123_v28, %v5400_v54 }
 0xc99   :  { %4136 = vrcp.f32 %v2644_v0 }
 0xc9a   :  { %v4125_v27 = vpop.eup %4124  ;;  %4138 = vrcp.f32 %v2642_v58  ;;  %v2264_v8 = vadd.f32 %v2263_v46, %v5564_v33 }
 0xc9b   :  { %v4127_v18 = vpop.eup %4126  ;;  %v5575_v63 = vmul.f32 %v4125_v27, %v5406_v57 }
 0xc9c   :  { %v5572_v62 = vmul.f32 %v4127_v18, %v5408_v26  ;;  %v2648_v5 = vpop.xlane.xlu1 %2647  ;;  %v2646_v50 = vpop.xlane.xlu0 %2645  ;;  %v2265_v34 = vrot.slane %v2264_v8, 4 }
 0xc9d   :  { %4140 = vrcp.f32 %v2648_v5 }
 0xc9e   :  { %v4129_v37 = vpop.eup %4128  ;;  %v2691_v41 = vadd.f32 %v5572_v62, %v5569_v30  ;;  %4142 = vrcp.f32 %v2646_v50  ;;  %v2266_v0 = vadd.f32 %v2265_v34, %v2264_v8 }
 0xc9f   :  { %v4131_v58 = vpop.eup %4130  ;;  %v5584_v5 = vmul.f32 %v4129_v37, %v5416_v32 }
 0xca0   :  { %v2692_v54 = vadd.f32 %v2691_v41, %v5575_v63  ;;  %v5581_v28 = vmul.f32 %v4131_v58, %v5414_v31  ;;  %v2650_v26 = vpop.xlane.xlu0 %2649  ;;  %v2267_v46 = vrot.slane %v2266_v0, 2  ;;  %v2652_v27 = vpop.xlane.xlu1 %2651 }
 0xca1   :  { %4144 = vrcp.f32 %v2650_v26 }
 0xca2   :  { %v4133_v18 = vpop.eup %4132  ;;  %v2693_v57 = vadd.f32 %v2692_v54, %v5581_v28  ;;  %v2268_v9 = vadd.f32 %v2267_v46, %v2266_v0  ;;  %4146 = vrcp.f32 %v2652_v27 }
 0xca3   :  { %v4135_v20 = vpop.eup %4134  ;;  %v5592_v58 = vmul.f32 %v4133_v18, %v5422_v19 }
 0xca4   :  { %v2694_v8 = vadd.f32 %v2693_v57, %v5584_v5  ;;  %v5589_v50 = vmul.f32 %v4135_v20, %v5424_v49  ;;  %v2654_v34 = vpop.xlane.xlu0 %2653  ;;  %v2269_v31 = vrot.slane %v2268_v9, 1  ;;  %v2656_v46 = vpop.xlane.xlu1 %2655 }
 0xca5   :  { %4148 = vrcp.f32 %v2654_v34 }
 0xca6   :  { %v4137_v41 = vpop.eup %4136  ;;  %v2695_v32 = vadd.f32 %v2694_v8, %v5589_v50  ;;  %v2270_v37 = vadd.f32 %v2269_v31, %v2268_v9 }
 0xca7   :  { %v4139_v54 = vpop.eup %4138  ;;  %v5600_v57 = vmul.f32 %v4137_v41, %v5431_v21 }
 0xca8   :  { %v2696_v0 = vadd.f32 %v2695_v32, %v5592_v58  ;;  %v5597_v26 = vmul.f32 %v4139_v54, %v5429_v2  ;;  %v2271_v20 = vadd.f32 1e-09, %v2270_v37  ;;  %v2658_v19 = vpop.xlane.xlu0 %2657  ;;  %v5611_v31 = vpop.permute.xlu1 %1914 }
 0xcaa   :  { %v4141_v49 = vpop.eup %4140  ;;  %v2697_v27 = vadd.f32 %v2696_v0, %v5597_v26  ;;  %4150 = vrcp.f32 %v2271_v20 }
 0xcab   :  { %v4143_v18 = vpop.eup %4142  ;;  %4152 = vrcp.f32 %v2656_v46  ;;  %v5608_v2 = vmul.f32 %v4141_v49, %v5435_v42 }
 0xcac   :  { %v2698_v9 = vadd.f32 %v2697_v27, %v5600_v57  ;;  %v5605_v8 = vmul.f32 %v4143_v18, %v5437_v13  ;;  %4154 = vrcp.f32 %v2658_v19  ;;  %v1945_v13 = vadd.f32 %v5611_v31, %v5200_v36 }
 0xcae   :  { %v2699_v34 = vadd.f32 %v2698_v9, %v5605_v8  ;;  %v4145_v21 = vpop.eup %4144 }
 0xcaf   :  { %v5614_v41 = vmul.f32 %v4145_v21, %v5441_v23  ;;  %v4147_v42 = vpop.eup %4146 }
 0xcb0   :  { %v5616_v32 = vpop.permute.xlu0 %1918  ;;  %v2700_v37 = vadd.f32 %v2699_v34, %v5608_v2  ;;  %v5625_v49 = vmul.f32 %v4147_v42, %v5443_v39 }
 0xcb1   :  { %v1947_v54 = vadd.f32 %v5616_v32, %v5204_v47 }
 0xcb2   :  { %v2701_v46 = vadd.f32 %v2700_v37, %v5614_v41  ;;  %v4149_v20 = vpop.eup %4148 }
 0xcb3   :  { %v1961_v0 = vpack.c.bf16 %v1947_v54, %v1945_v13  ;;  %v5628_v27 = vmul.f32 %v4149_v20, %v5449_v45 }
 0xcb4   :  { %v2702_v19 = vadd.f32 %v2701_v46, %v5625_v49 }
 0xcb5   :  { %3737 = vmatprep.mubr.bf16.mxu1 %v1961_v0 }
 0xcb6   :  { %v2703_v13 = vadd.f32 %v2702_v19, %v5628_v27 }
 0xcb7   :  { %v4151_v23 = vpop.eup %4150 }
 0xcb8   :  { %v2287_v36 = vmul.f32 %v4151_v23, %v5560_v48  ;;  %v2288_v18 = vmul.f32 %v4151_v23, %v5564_v33  ;;  %v2285_v47 = vmul.f32 %v4151_v23, %v5552_v51  ;;  %v2286_v9 = vmul.f32 %v4151_v23, %v5556_v22  ;;  %v4153_v34 = vpop.eup %4152  ;;  %v5640_v33 = vpop.permute.xlu1 %1922 }
 0xcb9   :  { %v4155_v21 = vpop.eup %4154  ;;  %v2283_v39 = vmul.f32 %v4151_v23, %v5544_v14  ;;  %v2284_v54 = vmul.f32 %v4151_v23, %v5548_v15  ;;  %v2277_v42 = vmul.f32 %v4151_v23, %v5520_v3  ;;  %v2278_v48 = vmul.f32 %v4151_v23, %v5525_v55 }
 0xcba   :  { %v2296_v37 = vpack.c.bf16 %v2288_v18, %v2287_v36  ;;  %v2295_v45 = vpack.c.bf16 %v2286_v9, %v2285_v47  ;;  %v2275_v51 = vmul.f32 %v4151_v23, %v5511_v38  ;;  %v2276_v22 = vmul.f32 %v4151_v23, %v5517_v7 }
 0xcbb   :  { %v2689_v0 = vmul.f32 %v4153_v34, %v5447_v61  ;;  %v2690_v14 = vmul.f32 %v4155_v21, %v5453_v4  ;;  %v2291_v46 = vpack.c.bf16 %v2278_v48, %v2277_v42  ;;  %v2294_v15 = vpack.c.bf16 %v2284_v54, %v2283_v39 }
 0xcbc   :  { %3721 = vmatprep.subr.bf16.mxu1 %v2296_v37  ;;  %v2290_v20 = vpack.c.bf16 %v2276_v22, %v2275_v51  ;;  %v2281_v3 = vmul.f32 %v4151_v23, %v5536_v53  ;;  %v2282_v55 = vmul.f32 %v4151_v23, %v5541_v29  ;;  %v5648_v18 = vpop.permute.xlu1 %1926  ;;  %v2279_v61 = vmul.f32 %v4151_v23, %v5528_v25 }
 0xcbd   :  { %3722 = vmatpush3.bf16.msra.mxu1 %v2296_v37  ;;  %v2704_v19 = vadd.f32 %v2703_v13, %v2689_v0  ;;  %v2280_v4 = vmul.f32 %v4151_v23, %v5533_v43  ;;  %v2273_v25 = vmul.f32 %v4151_v23, %v5505_v24  ;;  %v2274_v43 = vmul.f32 %v4151_v23, %v5508_v16 }
 0xcbe   :  { %3723 = vmatprep.subr.bf16.mxu1 %v2295_v45  ;;  %v2293_v7 = vpack.c.bf16 %v2282_v55, %v2281_v3  ;;  %v1951_v42 = vadd.f32 %v5648_v18, %v5212_v11  ;;  %v1949_v51 = vadd.f32 %v5640_v33, %v5208_v56  ;;  %v1948_v56 = vadd.f32 %v5616_v32, %v5206_v35 }
 0xcbf   :  { %v2705_v36 = vadd.f32 %v2704_v19, %v2690_v14  ;;  %v2292_v34 = vpack.c.bf16 %v2280_v4, %v2279_v61  ;;  %v1946_v55 = vadd.f32 %v5611_v31, %v5202_v10 }
 0xcc0   :  { %v5652_v21 = vpop.permute.xlu1 %1930  ;;  %v1963_v16 = vpack.c.bf16 %v1951_v42, %v1949_v51  ;;  %v5714_v51 = vld [vmem:[#allocation4 + $0x18] sm:$0xff] }
 0xcc1   :  { %3724 = vmatpush3.bf16.msra.mxu1 %v2295_v45  ;;  %v2706_v38 = vrot.slane %v2705_v36, 4  ;;  %v2289_v45 = vpack.c.bf16 %v2274_v43, %v2273_v25  ;;  %v1953_v24 = vadd.f32 %v5652_v21, %v5216_v60  ;;  %v1954_v4 = vadd.f32 %v5652_v21, %v5218_v59  ;;  %v6008_v59 = vld [vmem:[#allocation11_spill] sm:$0xff]  ;;  %v6010_v21 = vld [vmem:[#allocation10_spill] sm:$0xff] }
 0xcc2   :  { %3725 = vmatprep.subr.bf16.mxu1 %v2294_v15 }
 0xcc3   :  { %v2707_v47 = vadd.f32 %v2706_v38, %v2705_v36  ;;  %v1962_v38 = vpack.c.bf16 %v1948_v56, %v1946_v55 }
 0xcc4   :  { %v5654_v39 = vpop.permute.xlu1 %1934 }
 0xcc5   :  { %3726 = vmatpush3.bf16.msra.mxu1 %v2294_v15  ;;  %v2708_v9 = vrot.slane %v2707_v47, 2  ;;  %v1955_v48 = vadd.f32 %v5654_v39, %v5220_v1 }
 0xcc6   :  { %3727 = vmatprep.subr.bf16.mxu1 %v2293_v7 }
 0xcc7   :  { %v2709_v53 = vadd.f32 %v2708_v9, %v2707_v47  ;;  %v1965_v23 = vpack.c.bf16 %v1955_v48, %v1953_v24  ;;  %v6005_v9 = vld [vmem:[#allocation7_spill] sm:$0xff] }
 0xcc8   :  { %v5658_v54 = vpop.permute.xlu1 %1938 }
 0xcc9   :  { %3728 = vmatpush3.bf16.msra.mxu1 %v2293_v7  ;;  %v2710_v29 = vrot.slane %v2709_v53, 1  ;;  %v1957_v60 = vadd.f32 %v5658_v54, %v5224_v52 }
 0xcca   :  { %3729 = vmatprep.subr.bf16.mxu1 %v2292_v34 }
 0xccb   :  { %v2711_v37 = vadd.f32 %v2710_v29, %v2709_v53  ;;  %v6011_v53 = vld [vmem:[#allocation15_spill] sm:$0xff]  ;;  %v6013_v29 = vld [vmem:[#allocation14_spill] sm:$0xff] }
 0xccc   :  { %v1943_v22 = vpop.permute.xlu1 %1942 }
 0xccd   :  { %3730 = vmatpush3.bf16.msra.mxu1 %v2292_v34  ;;  %v2712_v13 = vadd.f32 1e-09, %v2711_v37  ;;  %v1960_v47 = vadd.f32 %v1943_v22, %v5230_v40  ;;  %v4261_v34 = vmov 5   ;;  %v6012_v40 = vld [vmem:[#allocation12_spill] sm:$0xff] }
 0xcce   :  { %3731 = vmatprep.subr.bf16.mxu1 %v2291_v46  ;;  %3822 = vset.pattern.permute.xlu1 %v4261_v34 }
 0xccf   :  { %4156 = vrcp.f32 %v2712_v13  ;;  %3823 = vset.pattern.permute.xlu0 %v4261_v34 }
 0xcd1   :  { %3732 = vmatpush3.bf16.msra.mxu1 %v2291_v46 }
 0xcd2   :  { %3733 = vmatprep.subr.bf16.mxu1 %v2290_v20 }
 0xcd5   :  { %3734 = vmatpush3.bf16.msra.mxu1 %v2290_v20  ;;  %v1959_v20 = vadd.f32 %v1943_v22, %v5228_v12  ;;  %v5717_v22 = vld [vmem:[#allocation4 + $0x8] sm:$0xff] }
 0xcd6   :  { %3735 = vmatprep.subr.bf16.mxu1 %v2289_v45 }
 0xcd9   :  { %3736 = vmatpush3.bf16.msra.mxu1 %v2289_v45  ;;  %v5711_v45 = vld [vmem:[#allocation4] sm:$0xff] }
 0xcdc   :  { %3738 = vmatmul.mubr.bf16.vlgmr.msra.gmra.mxu1 %v1963_v16  ;;  %v4157_v46 = vpop.eup %4156 }
 0xcdd   :  { %3741 = vmatprep.mubr.bf16.mxu1 %v1965_v23  ;;  %v2728_v11 = vmul.f32 %v4157_v46, %v2689_v0  ;;  %v2729_v19 = vmul.f32 %v4157_v46, %v2690_v14  ;;  %v2726_v15 = vmul.f32 %v4157_v46, %v5625_v49  ;;  %v2727_v1 = vmul.f32 %v4157_v46, %v5628_v27 }
 0xcde   :  { %v2718_v36 = vmul.f32 %v4157_v46, %v5584_v5  ;;  %v2719_v12 = vmul.f32 %v4157_v46, %v5589_v50  ;;  %v1967_v0 = vpack.c.bf16 %v1959_v20, %v1957_v60  ;;  %v2724_v49 = vmul.f32 %v4157_v46, %v5608_v2  ;;  %v5723_v60 = vld [vmem:[#allocation4 + $0x20] sm:$0xff] }
 0xcdf   :  { %v2737_v3 = vpack.c.bf16 %v2729_v19, %v2728_v11  ;;  %v2736_v14 = vpack.c.bf16 %v2727_v1, %v2726_v15  ;;  %v2725_v27 = vmul.f32 %v4157_v46, %v5614_v41  ;;  %v2722_v10 = vmul.f32 %v4157_v46, %v5600_v57  ;;  %v5720_v19 = vld [vmem:[#allocation4 + $0x30] sm:$0xff] }
 0xce0   :  { %v2732_v35 = vpack.c.bf16 %v2719_v12, %v2718_v36  ;;  %v2723_v5 = vmul.f32 %v4157_v46, %v5605_v8  ;;  %v2720_v31 = vmul.f32 %v4157_v46, %v5592_v58  ;;  %v2721_v2 = vmul.f32 %v4157_v46, %v5597_v26  ;;  %v5726_v12 = vld [vmem:[#allocation4 + $0x38] sm:$0xff] }
 0xce1   :  { %3765 = vmatprep.subr.bf16.mxu1 %v2737_v3  ;;  %v2735_v52 = vpack.c.bf16 %v2725_v27, %v2724_v49  ;;  %v2716_v32 = vmul.f32 %v4157_v46, %v5575_v63  ;;  %v2717_v7 = vmul.f32 %v4157_v46, %v5581_v28  ;;  %v2714_v8 = vmul.f32 %v4157_v46, %v5569_v30  ;;  %v5729_v27 = vld [vmem:[#allocation4 + $0x28] sm:$0xff] }
 0xce2   :  { %3766 = vmatpush3.bf16.msra.mxu1 %v2737_v3  ;;  %v2734_v50 = vpack.c.bf16 %v2723_v5, %v2722_v10  ;;  %v2733_v41 = vpack.c.bf16 %v2721_v2, %v2720_v31  ;;  %v2715_v61 = vmul.f32 %v4157_v46, %v5572_v62  ;;  %v1952_v26 = vadd.f32 %v5648_v18, %v5214_v6  ;;  %v5732_v10 = vld [vmem:[#allocation4 + $0x90] sm:$0xff]  ;;  %v5735_v2 = vld [vmem:[#allocation4 + $0x80] sm:$0xff] }
 0xce3   :  { %3767 = vmatprep.subr.bf16.mxu1 %v2736_v14  ;;  %v2731_v57 = vpack.c.bf16 %v2717_v7, %v2716_v32  ;;  %v1956_v63 = vadd.f32 %v5654_v39, %v5222_v17  ;;  %v1950_v28 = vadd.f32 %v5640_v33, %v5210_v44  ;;  %v1958_v6 = vadd.f32 %v5658_v54, %v6005_v9  ;;  %v6006_v17 = vld [vmem:[#allocation8_spill] sm:$0xff]  ;;  %v6007_v44 = vld [vmem:[#allocation9_spill] sm:$0xff] }
 0xce4   :  { %3742 = vmatmul.mubr.bf16.gmra.mxu1 %v1967_v0  ;;  %v2730_v58 = vpack.c.bf16 %v2715_v61, %v2714_v8  ;;  %2860 = vperm.xlu1 %3822, %v6006_v17   ;;  %v6009_v33 = vld [vmem:[#allocation13_spill] sm:$0xff] }
 0xce5   :  { %3781 = vmatprep.mubr.bf16.mxu1 %v1962_v38  ;;  %v1964_v30 = vpack.c.bf16 %v1952_v26, %v1950_v28  ;;  %v1966_v62 = vpack.c.bf16 %v1956_v63, %v1954_v4  ;;  %v1968_v18 = vpack.c.bf16 %v1960_v47, %v1958_v6  ;;  %2868 = vperm.xlu0 %3823, %v6007_v44   ;;  %v5708_v39 = vld [vmem:[#allocation4 + $0x10] sm:$0xff]  ;;  %v5741_v26 = vld [vmem:[#allocation4 + $0x88] sm:$0xff]  ;;  %v5747_v6 = vld [vmem:[#allocation4 + $0xa0] sm:$0xff] }
 0xce6   :  { %3768 = vmatpush3.bf16.msra.mxu1 %v2736_v14 }
 0xce7   :  { %3769 = vmatprep.subr.bf16.mxu1 %v2735_v52 }
 0xce8   :  { %2864 = vperm.xlu1 %3822, %v6008_v59  }
 0xce9   :  { %2880 = vperm.xlu0 %3823, %v6009_v33  }
 0xcea   :  { %3770 = vmatpush3.bf16.msra.mxu1 %v2735_v52 }
 0xceb   :  { %3771 = vmatprep.subr.bf16.mxu1 %v2734_v50 }
 0xcec   :  { %2872 = vperm.xlu1 %3822, %v6010_v21  }
 0xced   :  { %2888 = vperm.xlu0 %3823, %v6011_v53  }
 0xcee   :  { %3772 = vmatpush3.bf16.msra.mxu1 %v2734_v50 }
 0xcef   :  { %3773 = vmatprep.subr.bf16.mxu1 %v2733_v41 }
 0xcf0   :  { %2876 = vperm.xlu1 %3822, %v6012_v40  }
 0xcf2   :  { %3774 = vmatpush3.bf16.msra.mxu1 %v2733_v41 }
 0xcf3   :  { %3775 = vmatprep.subr.bf16.mxu1 %v2732_v35 }
 0xcf4   :  { %2884 = vperm.xlu1 %3822, %v6013_v29   ;;  %v5750_v29 = vld [vmem:[#allocation4 + $0xb8] sm:$0xff] }
 0xcf6   :  { %3776 = vmatpush3.bf16.msra.mxu1 %v2732_v35 }
 0xcf7   :  { %3777 = vmatprep.subr.bf16.mxu1 %v2731_v57 }
 0xcfa   :  { %3778 = vmatpush3.bf16.msra.mxu1 %v2731_v57  ;;  %v5738_v57 = vld [vmem:[#allocation4 + $0x98] sm:$0xff] }
 0xcfb   :  { %3779 = vmatprep.subr.bf16.mxu1 %v2730_v58 }
 0xcfe   :  { %3780 = vmatpush3.bf16.msra.mxu1 %v2730_v58 }
 0xd01   :  { %3782 = vmatmul.mubr.bf16.vlgmr.msra.gmra.mxu1 %v1964_v30  ;;  %v5744_v30 = vld [vmem:[#allocation4 + $0xb0] sm:$0xff] }
 0xd02   :  { %3785 = vmatprep.mubr.bf16.mxu1 %v1966_v62 }
 0xd09   :  { %3786 = vmatmul.mubr.bf16.gmra.mxu1 %v1968_v18 }
 0xd9c   :  { %v3739_v37 = vpop.f32.mrf.mxu1 }
 0xd9d   :  { %v2364_v13 = vsub.f32 %v5708_v39, %v3739_v37 }
 0xd9e   :  { %v2331_v25 = vpop.f32.mrf.mxu1 }
 0xd9f   :  { %v3511_v43 = vpack.c.bf16 %v2364_v13, %v2364_v13  ;;  %v2362_v54 = vsub.f32 %v5711_v45, %v2331_v25 }
 0xda0   :  { %v3740_v42 = vpop.f32.mrf.mxu1 }
 0xda1   :  { %2404 = vst [vmem:[#allocation3 + $0x10] sm:$0xf] %v3511_v43  ;;  %v3509_v48 = vpack.c.bf16 %v2362_v54, %v2362_v54  ;;  %v2365_v24 = vsub.f32 %v5714_v51, %v3740_v42  ;;  %v5753_v43 = vld [vmem:[#allocation4 + $0xa8] sm:$0xff] }
 0xda2   :  { %v2334_v16 = vpop.f32.mrf.mxu1 }
 0xda3   :  { %2402 = vst [vmem:[#allocation3] sm:$0xf] %v3509_v48  ;;  %v3512_v23 = vpack.c.bf16 %v2365_v24, %v2365_v24  ;;  %v2363_v46 = vsub.f32 %v5717_v22, %v2334_v16 }
 0xda4   :  { %v3743_v11 = vpop.f32.mrf.mxu1 }
 0xda5   :  { %2405 = vst [vmem:[#allocation3 + $0x18] sm:$0xf] %v3512_v23  ;;  %v3510_v20 = vpack.c.bf16 %v2363_v46, %v2363_v46  ;;  %v2368_v15 = vsub.f32 %v5720_v19, %v3743_v11 }
 0xda6   :  { %v2347_v1 = vpop.f32.mrf.mxu1 }
 0xda7   :  { %2403 = vst [vmem:[#allocation3 + $0x8] sm:$0xf] %v3510_v20  ;;  %v3515_v56 = vpack.c.bf16 %v2368_v15, %v2368_v15  ;;  %v2366_v3 = vsub.f32 %v5723_v60, %v2347_v1  ;;  %v3874_v1 = vld [vmem:[%s5977_s1 + $0xa0] sm:$0xff]  }
 0xda8   :  { %v3744_v55 = vpop.f32.mrf.mxu1 }
 0xda9   :  { %2408 = vst [vmem:[#allocation3 + $0x30] sm:$0xf] %v3515_v56  ;;  %v3513_v36 = vpack.c.bf16 %v2366_v3, %v2366_v3  ;;  %v2369_v0 = vsub.f32 %v5726_v12, %v3744_v55  ;;  %v6014_v56 = vmov 0   ;;  %v3875_v3 = vld [vmem:[%s5977_s1 + $0xa8] sm:$0xff]   ;;  %v3876_v55 = vld [vmem:[%s5977_s1 + $0xb0] sm:$0xff]  }
 0xdaa   :  { %v2350_v14 = vpop.f32.mrf.mxu1 }
 0xdab   :  { %2406 = vst [vmem:[#allocation3 + $0x20] sm:$0xf] %v3513_v36  ;;  %v3516_v49 = vpack.c.bf16 %v2369_v0, %v2369_v0  ;;  %v2367_v38 = vsub.f32 %v5729_v27, %v2350_v14  ;;  %v3877_v36 = vld [vmem:[%s5977_s1 + $0xb8] sm:$0xff]   ;;  %v2861_v0 = vpop.permute.xlu1 %2860 }
 0xdac   :  { %v3868_v20 = vld [vmem:[#allocation3 + $0x10] ss:$8 sps:$4 sm:$0xff]  }
 0xdad   :  { %2409 = vst [vmem:[#allocation3 + $0x38] sm:$0xf] %v3516_v49  ;;  %v3514_v35 = vpack.c.bf16 %v2367_v38, %v2367_v38 }
 0xdae   :  { %v3871_v15 = vld [vmem:[#allocation3] ss:$8 sps:$4 sm:$0xff]  }
 0xdaf   :  { %2407 = vst [vmem:[#allocation3 + $0x28] sm:$0xf] %v3514_v35 }
 0xdb4   :  { %v3862_v48 = vld [vmem:[#allocation3 + $0x30] ss:$8 sps:$4 sm:$0xff]  }
 0xdb6   :  { %v3865_v23 = vld [vmem:[#allocation3 + $0x20] ss:$8 sps:$4 sm:$0xff]  }
 0xdc1   :  { %v3783_v52 = vpop.f32.mrf.mxu1 }
 0xdc2   :  { %v2805_v5 = vsub.f32 %v5732_v10, %v3783_v52 }
 0xdc3   :  { %v2772_v50 = vpop.f32.mrf.mxu1 }
 0xdc4   :  { %v3519_v31 = vpack.c.bf16 %v2805_v5, %v2805_v5  ;;  %v2803_v41 = vsub.f32 %v5735_v2, %v2772_v50  ;;  %v2865_v5 = vpop.permute.xlu1 %2864 }
 0xdc5   :  { %v3784_v32 = vpop.f32.mrf.mxu1 }
 0xdc6   :  { %2845 = vst [vmem:[#allocation3 + $0x14] sm:$0xf] %v3519_v31  ;;  %v3517_v7 = vpack.c.bf16 %v2803_v41, %v2803_v41  ;;  %v2806_v8 = vsub.f32 %v5738_v57, %v3784_v32 }
 0xdc7   :  { %v2775_v61 = vpop.f32.mrf.mxu1 }
 0xdc8   :  { %2843 = vst [vmem:[#allocation3 + $0x4] sm:$0xf] %v3517_v7  ;;  %v3520_v58 = vpack.c.bf16 %v2806_v8, %v2806_v8  ;;  %v2804_v63 = vsub.f32 %v5741_v26, %v2775_v61 }
 0xdc9   :  { %v3787_v28 = vpop.f32.mrf.mxu1 }
 0xdca   :  { %2846 = vst [vmem:[#allocation3 + $0x1c] sm:$0xf] %v3520_v58  ;;  %v3518_v4 = vpack.c.bf16 %v2804_v63, %v2804_v63  ;;  %v2809_v62 = vsub.f32 %v5744_v30, %v3787_v28  ;;  %v2869_v63 = vpop.permute.xlu0 %2868 }
 0xdcb   :  { %v2788_v47 = vpop.f32.mrf.mxu1 }
 0xdcc   :  { %2844 = vst [vmem:[#allocation3 + $0xc] sm:$0xf] %v3518_v4  ;;  %v3523_v9 = vpack.c.bf16 %v2809_v62, %v2809_v62  ;;  %v2807_v18 = vsub.f32 %v5747_v6, %v2788_v47 }
 0xdcd   :  { %v3788_v34 = vpop.f32.mrf.mxu1 }
 0xdce   :  { %2849 = vst [vmem:[#allocation3 + $0x34] sm:$0xf] %v3523_v9  ;;  %v3521_v53 = vpack.c.bf16 %v2807_v18, %v2807_v18  ;;  %v2810_v37 = vsub.f32 %v5750_v29, %v3788_v34 }
 0xdcf   :  { %v2791_v13 = vpop.f32.mrf.mxu1 }
 0xdd0   :  { %2847 = vst [vmem:[#allocation3 + $0x24] sm:$0xf] %v3521_v53  ;;  %v3524_v25 = vpack.c.bf16 %v2810_v37, %v2810_v37  ;;  %v2808_v54 = vsub.f32 %v5753_v43, %v2791_v13  ;;  %v2873_v37 = vpop.permute.xlu1 %2872 }
 0xdd1   :  { %v3870_v46 = vld [vmem:[#allocation3 + $0x14] ss:$8 sps:$4 sm:$0xff]  }
 0xdd2   :  { %2850 = vst [vmem:[#allocation3 + $0x3c] sm:$0xf] %v3524_v25  ;;  %v3522_v42 = vpack.c.bf16 %v2808_v54, %v2808_v54 }
 0xdd3   :  { %v3873_v11 = vld [vmem:[#allocation3 + $0x4] ss:$8 sps:$4 sm:$0xff]  }
 0xdd4   :  { %2848 = vst [vmem:[#allocation3 + $0x2c] sm:$0xf] %v3522_v42 }
 0xdd9   :  { %v3864_v24 = vld [vmem:[#allocation3 + $0x34] ss:$8 sps:$4 sm:$0xff]  }
 0xdda   :  { %2971 = vmatprep.subr.bf16.mxu0 %v3864_v24 }
 0xddb   :  { %v3867_v16 = vld [vmem:[#allocation3 + $0x24] ss:$8 sps:$4 sm:$0xff]   ;;  %2972 = vmatpush1.bf16.msra.mxu0 %v3862_v48 }
 0xddc   :  { %2973 = vmatprep.subr.bf16.mxu0 %v3867_v16 }
 0xddf   :  { %2974 = vmatpush1.bf16.msra.mxu0 %v3865_v23 }
 0xde0   :  { %2975 = vmatprep.subr.bf16.mxu0 %v3870_v46 }
 0xde3   :  { %2976 = vmatpush1.bf16.msra.mxu0 %v3868_v20 }
 0xde4   :  { %2977 = vmatprep.subr.bf16.mxu0 %v3873_v11  ;;  %v2877_v11 = vpop.permute.xlu1 %2876 }
 0xde7   :  { %2978 = vmatpush1.bf16.msra.mxu0 %v3871_v15 }
 0xdea   :  { %3489 = vmatmul.mubr.msk.bf16.vlgmr.msra.gmra.mxu0 %vm145_vm0, %v3874_v1 }
 0xdeb   :  { %3005 = vmatprep.mubr.bf16.mxu0 %v6014_v56 }
 0xdf2   :  { %3490 = vmatmul.mubr.msk.bf16.gmra.mxu0 %vm145_vm0, %v3875_v3 }
 0xdf3   :  { %3015 = vmatprep.mubr.bf16.mxu0 %v6014_v56 }
 0xdfa   :  { %3491 = vmatmul.mubr.msk.bf16.gmra.mxu0 %vm145_vm0, %v3876_v55 }
 0xdfb   :  { %3025 = vmatprep.mubr.bf16.mxu0 %v6014_v56 }
 0xe02   :  { %3492 = vmatmul.mubr.msk.bf16.gmra.mxu0 %vm145_vm0, %v3877_v36 }
 0xeaa   :  { %v2997_v14 = vpop.f32.mrf.mxu0 }
 0xeab   :  { %v5775_v49 = vadd.f32 %v2997_v14, %v2861_v0  ;;  %v2881_v14 = vpop.permute.xlu0 %2880 }
 0xeac   :  { %v2999_v38 = vpop.f32.mrf.mxu0 }
 0xead   :  { %v5777_v35 = vadd.f32 %v2999_v38, %v2861_v0  ;;  %v3068_v32 = vmul.f32 %v5775_v49, %v5775_v49 }
 0xeae   :  { %v3001_v52 = vpop.f32.mrf.mxu0 }
 0xeaf   :  { %v3069_v50 = vmul.f32 %v5777_v35, %v5777_v35  ;;  %v3036_v31 = vadd.f32 %v5777_v35, %v5775_v49  ;;  %v5783_v41 = vadd.f32 %v3001_v52, %v2865_v5 }
 0xeb0   :  { %v3003_v7 = vpop.f32.mrf.mxu0 }
 0xeb1   :  { %3037 = vadd.xlane.f32.xlu1 %v3036_v31  ;;  %v5787_v8 = vadd.f32 %v3003_v7, %v2865_v5  ;;  %v3084_v61 = vadd.f32 %v3069_v50, %v3068_v32  ;;  %v3070_v28 = vmul.f32 %v5783_v41, %v5783_v41 }
 0xeb2   :  { %v3007_v58 = vpop.f32.mrf.mxu0 }
 0xeb3   :  { %3085 = vadd.xlane.f32.xlu0 %v3084_v61  ;;  %v3071_v4 = vmul.f32 %v5787_v8, %v5787_v8  ;;  %v5793_v47 = vadd.f32 %v3007_v58, %v2869_v63  ;;  %v3039_v18 = vadd.f32 %v5787_v8, %v5783_v41 }
 0xeb4   :  { %v3009_v62 = vpop.f32.mrf.mxu0 }
 0xeb5   :  { %v5795_v9 = vadd.f32 %v3009_v62, %v2869_v63  ;;  %v3087_v34 = vadd.f32 %v3071_v4, %v3070_v28  ;;  %v3072_v25 = vmul.f32 %v5793_v47, %v5793_v47  ;;  %v2885_v63 = vpop.permute.xlu1 %2884 }
 0xeb6   :  { %v3011_v53 = vpop.f32.mrf.mxu0 }
 0xeb7   :  { %3040 = vadd.xlane.f32.xlu0 %v3039_v18  ;;  %3088 = vadd.xlane.f32.xlu1 %v3087_v34  ;;  %v5801_v54 = vadd.f32 %v3011_v53, %v2873_v37  ;;  %v3042_v48 = vadd.f32 %v5795_v9, %v5793_v47  ;;  %v3073_v24 = vmul.f32 %v5795_v9, %v5795_v9  ;;  %v2889_v53 = vpop.permute.xlu0 %2888 }
 0xeb8   :  { %v3013_v13 = vpop.f32.mrf.mxu0 }
 0xeb9   :  { %v5803_v42 = vadd.f32 %v3013_v13, %v2873_v37  ;;  %v3090_v1 = vadd.f32 %v3073_v24, %v3072_v25  ;;  %v3074_v56 = vmul.f32 %v5801_v54, %v5801_v54 }
 0xeba   :  { %v3017_v16 = vpop.f32.mrf.mxu0 }
 0xebb   :  { %v3075_v23 = vmul.f32 %v5803_v42, %v5803_v42  ;;  %3043 = vadd.xlane.f32.xlu0 %v3042_v48  ;;  %v3045_v46 = vadd.f32 %v5803_v42, %v5801_v54  ;;  %v5817_v55 = vadd.f32 %v3017_v16, %v2877_v11 }
 0xebc   :  { %v3019_v20 = vpop.f32.mrf.mxu0 }
 0xebd   :  { %3046 = vadd.xlane.f32.xlu1 %v3045_v46  ;;  %v5813_v15 = vadd.f32 %v3019_v20, %v2877_v11  ;;  %v3093_v36 = vadd.f32 %v3075_v23, %v3074_v56  ;;  %v3076_v7 = vmul.f32 %v5817_v55, %v5817_v55  ;;  %v4262_v23 = vmov 7  }
 0xebe   :  { %v3021_v3 = vpop.f32.mrf.mxu0  ;;  %3824 = vset.pattern.permute.xlu0 %v4262_v23  ;;  %3825 = vset.pattern.permute.xlu1 %v4262_v23 }
 0xebf   :  { %3091 = vadd.xlane.f32.xlu0 %v3090_v1  ;;  %v5819_v38 = vadd.f32 %v3021_v3, %v2881_v14  ;;  %v3048_v5 = vadd.f32 %v5813_v15, %v5817_v55  ;;  %v3077_v50 = vmul.f32 %v5813_v15, %v5813_v15 }
 0xec0   :  { %v3023_v0 = vpop.f32.mrf.mxu0 }
 0xec1   :  { %v5821_v52 = vadd.f32 %v3023_v0, %v2881_v14  ;;  %3094 = vadd.xlane.f32.xlu1 %v3093_v36  ;;  %v3096_v4 = vadd.f32 %v3077_v50, %v3076_v7  ;;  %v3078_v62 = vmul.f32 %v5819_v38, %v5819_v38  ;;  %v4263_v36 = vmov 6  }
 0xec2   :  { %v3027_v31 = vpop.f32.mrf.mxu0 }
 0xec3   :  { %3049 = vadd.xlane.f32.xlu0 %v3048_v5  ;;  %v3051_v32 = vadd.f32 %v5821_v52, %v5819_v38  ;;  %v3079_v61 = vmul.f32 %v5821_v52, %v5821_v52  ;;  %v5837_v34 = vadd.f32 %v3027_v31, %v2885_v63 }
 0xec4   :  { %v3029_v58 = vpop.f32.mrf.mxu0 }
 0xec5   :  { %v5833_v28 = vadd.f32 %v3029_v58, %v2885_v63  ;;  %3052 = vadd.xlane.f32.xlu1 %v3051_v32  ;;  %v3099_v37 = vadd.f32 %v3079_v61, %v3078_v62  ;;  %v3080_v20 = vmul.f32 %v5837_v34, %v5837_v34 }
 0xec6   :  { %v3031_v18 = vpop.f32.mrf.mxu0 }
 0xec7   :  { %3097 = vadd.xlane.f32.xlu0 %v3096_v4  ;;  %v5839_v25 = vadd.f32 %v3031_v18, %v2889_v53  ;;  %v3054_v24 = vadd.f32 %v5833_v28, %v5837_v34  ;;  %v3081_v16 = vmul.f32 %v5833_v28, %v5833_v28 }
 0xec8   :  { %v3033_v13 = vpop.f32.mrf.mxu0 }
 0xec9   :  { %v5841_v48 = vadd.f32 %v3033_v13, %v2889_v53  ;;  %3100 = vadd.xlane.f32.xlu1 %v3099_v37  ;;  %v3102_v1 = vadd.f32 %v3081_v16, %v3080_v20  ;;  %v3082_v56 = vmul.f32 %v5839_v25, %v5839_v25 }
 0xecb   :  { %3055 = vadd.xlane.f32.xlu0 %v3054_v24  ;;  %v3057_v46 = vadd.f32 %v5841_v48, %v5839_v25  ;;  %v3083_v11 = vmul.f32 %v5841_v48, %v5841_v48 }
 0xecd   :  { %3058 = vadd.xlane.f32.xlu1 %v3057_v46  ;;  %v3105_v3 = vadd.f32 %v3083_v11, %v3082_v56 }
 0xecf   :  { %3103 = vadd.xlane.f32.xlu0 %v3102_v1 }
 0xed1   :  { %3106 = vadd.xlane.f32.xlu1 %v3105_v3 }
 0xee2   :  { %3233 = vperm.xlu1 %3825, %v6008_v59  }
 0xee5   :  { %3229 = vperm.xlu0 %3824, %v6006_v17  }
 0xee6   :  { %3237 = vperm.xlu1 %3825, %v6007_v44  }
 0xee9   :  { %3241 = vperm.xlu0 %3824, %v6010_v21  }
 0xeea   :  { %3245 = vperm.xlu1 %3825, %v6012_v40  }
 0xeed   :  { %3249 = vperm.xlu0 %3824, %v6009_v33  }
 0xeee   :  { %3827 = vset.pattern.permute.xlu1 %v4263_v36 }
 0xef1   :  { %3826 = vset.pattern.permute.xlu0 %v4263_v36 }
 0xf3a   :  { %v3038_v0 = vpop.xlane.xlu1 %3037 }
 0xf3b   :  { %v5863_v14 = vmul.f32 0.00390625, %v3038_v0 }
 0xf3c   :  { %v3086_v5 = vpop.xlane.xlu0 %3085 }
 0xf3d   :  { %v3116_v59 = vmul.f32 %v5863_v14, %v5863_v14  ;;  %v3108_v50 = vmul.f32 0.00390625, %v3086_v5 }
 0xf3f   :  { %v3124_v17 = vsub.f32 %v3108_v50, %v3116_v59 }
 0xf40   :  { %v3041_v31 = vpop.xlane.xlu0 %3040  ;;  %v3089_v44 = vpop.xlane.xlu1 %3088 }
 0xf41   :  { %v3132_v32 = vadd.f32 1e-05, %v3124_v17  ;;  %v5867_v21 = vmul.f32 0.00390625, %v3041_v31  ;;  %v3109_v40 = vmul.f32 0.00390625, %v3089_v44  ;;  %v4226_v31 = vld [vmem:[%s5978_s2] sm:$0xff] }
 0xf43   :  { %4158 = vrsqrt.f32 %v3132_v32  ;;  %v3117_v33 = vmul.f32 %v5867_v21, %v5867_v21 }
 0xf44   :  { %v3044_v7 = vpop.xlane.xlu0 %3043 }
 0xf45   :  { %v3125_v61 = vsub.f32 %v3109_v40, %v3117_v33  ;;  %v5871_v58 = vmul.f32 0.00390625, %v3044_v7 }
 0xf46   :  { %v3047_v63 = vpop.xlane.xlu1 %3046 }
 0xf47   :  { %v3133_v4 = vadd.f32 1e-05, %v3125_v61  ;;  %v5873_v62 = vmul.f32 0.00390625, %v3047_v63  ;;  %v3118_v53 = vmul.f32 %v5871_v58, %v5871_v58 }
 0xf48   :  { %v3092_v18 = vpop.xlane.xlu0 %3091 }
 0xf49   :  { %4160 = vrsqrt.f32 %v3133_v4  ;;  %v3110_v37 = vmul.f32 0.00390625, %v3092_v18  ;;  %v3119_v16 = vmul.f32 %v5873_v62, %v5873_v62 }
 0xf4a   :  { %v3095_v13 = vpop.xlane.xlu1 %3094 }
 0xf4b   :  { %v3126_v24 = vsub.f32 %v3110_v37, %v3118_v53  ;;  %v3111_v46 = vmul.f32 0.00390625, %v3095_v13 }
 0xf4c   :  { %v3050_v20 = vpop.xlane.xlu0 %3049 }
 0xf4d   :  { %v3134_v11 = vadd.f32 1e-05, %v3126_v24  ;;  %v3127_v1 = vsub.f32 %v3111_v46, %v3119_v16  ;;  %v5879_v56 = vmul.f32 0.00390625, %v3050_v20  ;;  %v4227_v46 = vld [vmem:[%s5978_s2 + $0x8] sm:$0xff] }
 0xf4e   :  { %v3053_v3 = vpop.xlane.xlu1 %3052 }
 0xf4f   :  { %4162 = vrsqrt.f32 %v3134_v11  ;;  %v3135_v36 = vadd.f32 1e-05, %v3127_v1  ;;  %v5881_v0 = vmul.f32 0.00390625, %v3053_v3  ;;  %v3120_v50 = vmul.f32 %v5879_v56, %v5879_v56  ;;  %v4228_v11 = vld [vmem:[%s5978_s2 + $0x38] sm:$0xff] }
 0xf50   :  { %v4159_v5 = vpop.eup %4158  ;;  %v3098_v59 = vpop.xlane.xlu0 %3097 }
 0xf51   :  { %4164 = vrsqrt.f32 %v3135_v36  ;;  %v3112_v17 = vmul.f32 0.00390625, %v3098_v59  ;;  %v3148_v44 = vmul.f32 %v4226_v31, %v4159_v5  ;;  %v3121_v33 = vmul.f32 %v5881_v0, %v5881_v0 }
 0xf52   :  { %v3101_v32 = vpop.xlane.xlu1 %3100 }
 0xf53   :  { %v3128_v40 = vsub.f32 %v3112_v17, %v3120_v50  ;;  %v3113_v7 = vmul.f32 0.00390625, %v3101_v32  ;;  %3174 = vperm.xlu0 %3826, %v3148_v44   ;;  %v4229_v32 = vld [vmem:[%s5978_s2 + $0x10] sm:$0xff] }
 0xf54   :  { %v3056_v61 = vpop.xlane.xlu0 %3055 }
 0xf55   :  { %v3136_v63 = vadd.f32 1e-05, %v3128_v40  ;;  %v3129_v4 = vsub.f32 %v3113_v7, %v3121_v33  ;;  %v5890_v18 = vmul.f32 0.00390625, %v3056_v61  ;;  %v4230_v61 = vld [vmem:[%s5978_s2 + $0x18] sm:$0xff] }
 0xf56   :  { %v4161_v53 = vpop.eup %4160  ;;  %v3059_v37 = vpop.xlane.xlu1 %3058 }
 0xf57   :  { %4166 = vrsqrt.f32 %v3136_v63  ;;  %v3137_v13 = vadd.f32 1e-05, %v3129_v4  ;;  %v5892_v24 = vmul.f32 0.00390625, %v3059_v37  ;;  %3829 = vset.pattern.permute.xlu0 %v4262_v23  ;;  %v3149_v20 = vmul.f32 %v4227_v46, %v4161_v53  ;;  %v4231_v53 = vld [vmem:[%s5978_s2 + $0x20] sm:$0xff] }
 0xf58   :  { %v3104_v16 = vpop.xlane.xlu0 %3103  ;;  %3257 = vperm.xlu0 %3829, %v4228_v11   ;;  %v3122_v1 = vmul.f32 %v5890_v18, %v5890_v18 }
 0xf59   :  { %4168 = vrsqrt.f32 %v3137_v13  ;;  %v3114_v3 = vmul.f32 0.00390625, %v3104_v16  ;;  %3179 = vperm.xlu1 %3827, %v3149_v20   ;;  %v3123_v59 = vmul.f32 %v5892_v24, %v5892_v24  ;;  %v4232_v16 = vld [vmem:[%s5978_s2 + $0x28] sm:$0xff] }
 0xf5a   :  { %v3107_v36 = vpop.xlane.xlu1 %3106 }
 0xf5b   :  { %v3130_v5 = vsub.f32 %v3114_v3, %v3122_v1  ;;  %v3115_v50 = vmul.f32 0.00390625, %v3107_v36  ;;  %v4233_v1 = vld [vmem:[%s5978_s2 + $0x30] sm:$0xff]  ;;  %s4264_s2 = smov [#allocation4]  }
 0xf5c   :  { %v4163_v17 = vpop.eup %4162  ;;  %s3346_s4 = sshll.u32 %s4264_s2, 4  ;;  %s3347_s4 = int_to_ptr.vmem [resolvable:$true] %s3346_s4 }
 0xf5d   :  { %v3138_v31 = vadd.f32 1e-05, %v3130_v5  ;;  %v3131_v44 = vsub.f32 %v3115_v50, %v3123_v59  ;;  %v3150_v40 = vmul.f32 %v4229_v32, %v4163_v17  ;;  %v3156_v32 = vsub.f32 %v5775_v49, %v5863_v14  ;;  %s4234_s5 = scalar_lea.vmem %s3347_s4, 4096  ;;  %p4239_p1 = scmp.lt.s32.totalorder %s3347_s4, %s3347_s4 }
 0xf5e   :  { %v4165_v33 = vpop.eup %4164  ;;  %v3234_v17 = vpop.permute.xlu1 %3233  ;;  %p4235_p0 = scmp.ne.s32.totalorder %s3347_s4, %s4234_s5  ;;  %p4240_p2 = scmp.lt.s32.totalorder %s4234_s5, %s4234_s5 }
 0xf5f   :  { %4170 = vrsqrt.f32 %v3138_v31  ;;  %v3139_v7 = vadd.f32 1e-05, %v3131_v44  ;;  %3184 = vperm.xlu1 %3827, %v3150_v40   ;;  %v3151_v63 = vmul.f32 %v4230_v61, %v4165_v33  ;;  %v3157_v40 = vsub.f32 %v5777_v35, %v5863_v14 }
 0xf60   :  { %v3230_v59 = vpop.permute.xlu0 %3229  ;;  %p4241_p3 = por %p4240_p2, %p4239_p1 }
 0xf61   :  { %4172 = vrsqrt.f32 %v3139_v7 }
 0xf62   :  { %v3238_v44 = vpop.permute.xlu1 %3237  ;;  %p4242_p4 = pnand %p4241_p3, %p4235_p0 }
 0xf63   :  { %3189 = vperm.xlu1 %3827, %v3151_v63  }
 0xf64   :  { %v4167_v4 = vpop.eup %4166  ;;  %v3242_v50 = vpop.permute.xlu0 %3241 }
 0xf65   :  { %v3152_v37 = vmul.f32 %v4231_v53, %v4167_v4 }
 0xf66   :  { %v4169_v13 = vpop.eup %4168  ;;  %v3246_v4 = vpop.permute.xlu1 %3245 }
 0xf67   :  { %3194 = vperm.xlu1 %3827, %v3152_v37   ;;  %v3153_v46 = vmul.f32 %v4232_v16, %v4169_v13  ;;  %v3158_v37 = vsub.f32 %v5783_v41, %v5867_v21  ;;  %v3159_v13 = vsub.f32 %v5787_v8, %v5867_v21  ;;  %v3161_v41 = vsub.f32 %v5795_v9, %v5871_v58 }
 0xf68   :  { %v5921_v31 = vpop.permute.xlu0 %3249 }
 0xf6b   :  { %3199 = vperm.xlu1 %3827, %v3153_v46  }
 0xf6c   :  { %v4171_v20 = vpop.eup %4170 }
 0xf6d   :  { %v3154_v3 = vmul.f32 %v4233_v1, %v4171_v20 }
 0xf6e   :  { %v4173_v36 = vpop.eup %4172 }
 0xf6f   :  { %3204 = vperm.xlu1 %3827, %v3154_v3   ;;  %v3155_v5 = vmul.f32 %v4228_v11, %v4173_v36  ;;  %v3160_v3 = vsub.f32 %v5793_v47, %v5871_v58  ;;  %v3163_v47 = vsub.f32 %v5803_v42, %v5873_v62 }
 0xf73   :  { %3209 = vperm.xlu1 %3827, %v3155_v5  }
 0xf77   :  { %3828 = vset.pattern.permute.xlu1 %v4262_v23 }
 0xf78   :  { %3253 = vperm.xlu1 %3828, %v4233_v1  }
 0xfce   :  { %v3175_v33 = vpop.permute.xlu0 %3174 }
 0xfcf   :  { %v3212_v7 = vmul.f32 %v3175_v33, %v3156_v32  ;;  %v3213_v61 = vmul.f32 %v3175_v33, %v3157_v40 }
 0xfd1   :  { %v3260_v11 = vadd.f32 %v3230_v59, %v3212_v7  ;;  %v3261_v63 = vadd.f32 %v3230_v59, %v3213_v61 }
 0xfd3   :  { %v3276_v23 = vmax.f32 %v3260_v11, 0.0  ;;  %v3277_v53 = vmax.f32 %v3261_v63, 0.0 }
 0xfd4   :  { %v3180_v46 = vpop.permute.xlu1 %3179 }
 0xfd5   :  { %v3292_v16 = vadd.f32 %v5711_v45, %v3276_v23  ;;  %v3293_v49 = vadd.f32 %v5735_v2, %v3277_v53  ;;  %v3214_v35 = vmul.f32 %v3180_v46, %v3158_v37  ;;  %v3215_v14 = vmul.f32 %v3180_v46, %v3159_v13 }
 0xfd6   :  { %v3166_v13 = vsub.f32 %v5819_v38, %v5881_v0 }
 0xfd7   :  { %3316 = vst [vmem:[#allocation4 + $0x40] sm:$0xff] %v3292_v16  ;;  %3333 = vst [vmem:[#allocation4 + $0xc0] sm:$0xff] %v3293_v49  ;;  %v3262_v20 = vadd.f32 %v3234_v17, %v3214_v35  ;;  %v3263_v1 = vadd.f32 %v3234_v17, %v3215_v14  ;;  %v3162_v17 = vsub.f32 %v5801_v54, %v5873_v62 }
 0xfd9   :  { %v3278_v36 = vmax.f32 %v3262_v20, 0.0  ;;  %v3279_v5 = vmax.f32 %v3263_v1, 0.0 }
 0xfda   :  { %v3185_v8 = vpop.permute.xlu1 %3184 }
 0xfdb   :  { %v3216_v21 = vmul.f32 %v3185_v8, %v3160_v3  ;;  %v3217_v45 = vmul.f32 %v3185_v8, %v3161_v41  ;;  %v3294_v2 = vadd.f32 %v5717_v22, %v3278_v36  ;;  %v3295_v59 = vadd.f32 %v5741_v26, %v3279_v5  ;;  %v3258_v41 = vpop.permute.xlu0 %3257 }
 0xfdc   :  { %v3164_v22 = vsub.f32 %v5817_v55, %v5879_v56  ;;  %v3165_v26 = vsub.f32 %v5813_v15, %v5879_v56  ;;  %v3167_v55 = vsub.f32 %v5821_v52, %v5881_v0  ;;  %v3170_v3 = vsub.f32 %v5839_v25, %v5892_v24 }
 0xfdd   :  { %v3264_v32 = vadd.f32 %v3238_v44, %v3216_v21  ;;  %v3265_v40 = vadd.f32 %v3238_v44, %v3217_v45  ;;  %3317 = vst [vmem:[#allocation4 + $0x48] sm:$0xff] %v3294_v2  ;;  %3334 = vst [vmem:[#allocation4 + $0xc8] sm:$0xff] %v3295_v59  ;;  %v3168_v5 = vsub.f32 %v5837_v34, %v5890_v18 }
 0xfde   :  { %v3190_v9 = vpop.permute.xlu1 %3189 }
 0xfdf   :  { %v3280_v58 = vmax.f32 %v3264_v32, 0.0  ;;  %v3281_v33 = vmax.f32 %v3265_v40, 0.0  ;;  %v3218_v7 = vmul.f32 %v3190_v9, %v3162_v17  ;;  %v3219_v61 = vmul.f32 %v3190_v9, %v3163_v47 }
 0xfe1   :  { %v3296_v44 = vadd.f32 %v5708_v39, %v3280_v58  ;;  %v3297_v54 = vadd.f32 %v5732_v10, %v3281_v33  ;;  %v3266_v11 = vadd.f32 %v3242_v50, %v3218_v7  ;;  %v3267_v63 = vadd.f32 %v3242_v50, %v3219_v61 }
 0xfe2   :  { %v3195_v42 = vpop.permute.xlu1 %3194 }
 0xfe3   :  { %3318 = vst [vmem:[#allocation4 + $0x50] sm:$0xff] %v3296_v44  ;;  %3335 = vst [vmem:[#allocation4 + $0xd0] sm:$0xff] %v3297_v54  ;;  %v3282_v62 = vmax.f32 %v3266_v11, 0.0  ;;  %v3283_v23 = vmax.f32 %v3267_v63, 0.0  ;;  %v3220_v53 = vmul.f32 %v3195_v42, %v3164_v22  ;;  %v3221_v37 = vmul.f32 %v3195_v42, %v3165_v26 }
 0xfe5   :  { %v3298_v15 = vadd.f32 %v5714_v51, %v3282_v62  ;;  %v3299_v39 = vadd.f32 %v5738_v57, %v3283_v23  ;;  %v3268_v10 = vadd.f32 %v3246_v4, %v3220_v53  ;;  %v3269_v56 = vadd.f32 %v3246_v4, %v3221_v37 }
 0xfe6   :  { %v3200_v50 = vpop.permute.xlu1 %3199 }
 0xfe7   :  { %3319 = vst [vmem:[#allocation4 + $0x58] sm:$0xff] %v3298_v15  ;;  %3336 = vst [vmem:[#allocation4 + $0xd8] sm:$0xff] %v3299_v39  ;;  %v3284_v16 = vmax.f32 %v3268_v10, 0.0  ;;  %v3285_v49 = vmax.f32 %v3269_v56, 0.0  ;;  %v3222_v46 = vmul.f32 %v3200_v50, %v3166_v13  ;;  %v3223_v35 = vmul.f32 %v3200_v50, %v3167_v55 }
 0xfe9   :  { %v3300_v14 = vadd.f32 %v5723_v60, %v3284_v16  ;;  %v3301_v38 = vadd.f32 %v5747_v6, %v3285_v49  ;;  %v3270_v20 = vadd.f32 %v5921_v31, %v3222_v46  ;;  %v3271_v52 = vadd.f32 %v5921_v31, %v3223_v35 }
 0xfea   :  { %v3205_v51 = vpop.permute.xlu1 %3204  ;;  %v3171_v60 = vsub.f32 %v5841_v48, %v5892_v24 }
 0xfeb   :  { %3320 = vst [vmem:[#allocation4 + $0x60] sm:$0xff] %v3300_v14  ;;  %3337 = vst [vmem:[#allocation4 + $0xe0] sm:$0xff] %v3301_v38  ;;  %v3286_v57 = vmax.f32 %v3270_v20, 0.0  ;;  %v3287_v0 = vmax.f32 %v3271_v52, 0.0  ;;  %v3224_v21 = vmul.f32 %v3205_v51, %v3168_v5 }
 0xfed   :  { %v3302_v4 = vadd.f32 %v5729_v27, %v3286_v57  ;;  %v3303_v1 = vadd.f32 %v5753_v43, %v3287_v0  ;;  %v3169_v27 = vsub.f32 %v5833_v28, %v5890_v18 }
 0xfee   :  { %v3210_v6 = vpop.permute.xlu1 %3209 }
 0xfef   :  { %3321 = vst [vmem:[#allocation4 + $0x68] sm:$0xff] %v3302_v4  ;;  %3338 = vst [vmem:[#allocation4 + $0xe8] sm:$0xff] %v3303_v1  ;;  %v3226_v31 = vmul.f32 %v3210_v6, %v3170_v3  ;;  %v3227_v36 = vmul.f32 %v3210_v6, %v3171_v60  ;;  %v3225_v45 = vmul.f32 %v3205_v51, %v3169_v27 }
 0xff1   :  { %v3274_v8 = vadd.f32 %v3258_v41, %v3226_v31  ;;  %v3275_v43 = vadd.f32 %v3258_v41, %v3227_v36 }
 0xff3   :  { %v3290_v25 = vmax.f32 %v3274_v8, 0.0  ;;  %v3291_v2 = vmax.f32 %v3275_v43, 0.0  ;;  %v3254_v59 = vpop.permute.xlu1 %3253 }
 0xff4   :  { %v3272_v48 = vadd.f32 %v3254_v59, %v3224_v21  ;;  %v3273_v24 = vadd.f32 %v3254_v59, %v3225_v45 }
 0xff5   :  { %v3306_v32 = vadd.f32 %v5726_v12, %v3290_v25  ;;  %v3307_v40 = vadd.f32 %v5750_v29, %v3291_v2 }
 0xff6   :  { %v3288_v17 = vmax.f32 %v3272_v48, 0.0  ;;  %v3289_v34 = vmax.f32 %v3273_v24, 0.0 }
 0xff7   :  { %3323 = vst [vmem:[#allocation4 + $0x78] sm:$0xff] %v3306_v32  ;;  %3340 = vst [vmem:[#allocation4 + $0xf8] sm:$0xff] %v3307_v40 }
 0xff8   :  { %v3304_v28 = vadd.f32 %v5720_v19, %v3288_v17  ;;  %v3305_v18 = vadd.f32 %v5744_v30, %v3289_v34 }
 0xffa   :  { %3322 = vst [vmem:[#allocation4 + $0x70] sm:$0xff] %v3304_v28  ;;  %3339 = vst [vmem:[#allocation4 + $0xf0] sm:$0xff] %v3305_v18 }
 0xffb   :  { %4245 = shalt.err (!%p4242_p4)
}
 0xffc   :  { %s4265_s6 = smov 128   ;;  %s4266_s7 = smov 8  }
 0xffd   :  { %3352 = dma.vmem_to_hbm [thread:$0]  %s3347_s4, 4096, %s5979_s3, [#allocation5], %s4265_s6, %s4265_s6, %s4266_s7  }
 0xffe   :  { %4254 = dma.done.wait [#allocation5], 4096  }
 0xfff   :  { %4255 = vsyncadd [#allocation5], 4294963200 }
0x1000   :  { %3356 = vsyncpa [#allocation5], 1 }

</bundles_post_ra>
